<compile_context>
chip_gen: v6e
topology: v6e:2x2x1
jax: 0.10.0
libtpu: 0.0.40
codegen_flags: <defaults>
</compile_context>

<pallas_src>
import numpy as np

import jax
import jax.numpy as jnp
from jax.experimental import pallas as pl
from jax.experimental.pallas import tpu as pltpu


# ------------------------------ fused kernel --------------------------------

def _dqn_fused_kernel(x_ref, f_ref,
                      s44_ref, scol1_ref, t1_ref, b1_ref,
                      t2_ref, b2_ref,
                      s12_ref, scol2_ref, t3_ref, b3_ref,
                      t4_ref, b4_ref,
                      g1_ref, w1f_ref, lb1_ref,
                      w2_ref, lb2_ref, w3_ref, lb3_ref,
                      o_ref):
    f32, bf16 = jnp.float32, jnp.bfloat16

    def dotbf(a, b):
        # bf16 MXU operands, f32 accumulation.
        return jnp.dot(a.astype(bf16), b.astype(bf16),
                       preferred_element_type=f32)

    # ---- stage 1: 3x3/s3 max-pool on the channel-packed (132, 396) input ----
    # rows first (sublane slices + selection matmul), lane shifts only on the
    # already row-subsampled 44-row slab.
    xp = x_ref[0]                                                   # (132, 396)
    rm = jnp.maximum(jnp.maximum(xp[0:130, :], xp[1:131, :]), xp[2:132, :])
    p1r = dotbf(s44_ref[...], rm)                                   # (44, 396)
    cm1 = jnp.maximum(jnp.maximum(p1r[:, 0:394], p1r[:, 1:395]), p1r[:, 2:396])
    p1 = dotbf(cm1, scol1_ref[...])                                 # (44, 3*44)

    # ---- conv1 (3->4, 5x5) + ReLU : banded (Toeplitz) matmuls on the MXU ----
    a1 = dotbf(p1[0:40, :], t1_ref[0])
    for kh in range(1, 5):
        a1 = a1 + dotbf(p1[kh:kh + 40, :], t1_ref[kh])
    a1 = jnp.maximum(a1 + b1_ref[...], 0.0)                         # (40, 4*40)

    # ---- conv2 (4->8, 5x5) + ReLU ----
    a2 = dotbf(a1[0:36, :], t2_ref[0])
    for kh in range(1, 5):
        a2 = a2 + dotbf(a1[kh:kh + 36, :], t2_ref[kh])
    a2 = jnp.maximum(a2 + b2_ref[...], 0.0)                         # (36, 8*36)

    # ---- pool2: 3x3/s3 (rows first, lane shifts on the 12-row slab) ----
    rm2 = jnp.maximum(jnp.maximum(a2[0:34, :], a2[1:35, :]), a2[2:36, :])
    p2r = dotbf(s12_ref[...], rm2)                                  # (12, 288)
    cm2 = jnp.maximum(jnp.maximum(p2r[:, 0:286], p2r[:, 1:287]), p2r[:, 2:288])
    p2 = dotbf(cm2, scol2_ref[...])                                 # (12, 8*12)

    # ---- conv3 (8->8, 4x4) + ReLU ----
    a3 = dotbf(p2[0:9, :], t3_ref[0])
    for kh in range(1, 4):
        a3 = a3 + dotbf(p2[kh:kh + 9, :], t3_ref[kh])
    a3 = jnp.maximum(a3 + b3_ref[...], 0.0)                         # (9, 8*9)

    # ---- conv4 (8->16, 4x4) + ReLU ----
    a4 = dotbf(a3[0:6, :], t4_ref[0])
    for kh in range(1, 4):
        a4 = a4 + dotbf(a3[kh:kh + 6, :], t4_ref[kh])
    a4 = jnp.maximum(a4 + b4_ref[...], 0.0)                         # (6, 16*6)

    # ---- pool3: only the two needed output rows; the column subsample,
    #      NCHW flatten and concat(f) are folded into linear1 (g1, w1f). ----
    rA = jnp.maximum(jnp.maximum(a4[0:1, :], a4[1:2, :]), a4[2:3, :])   # (1,96)
    rB = jnp.maximum(jnp.maximum(a4[3:4, :], a4[4:5, :]), a4[5:6, :])   # (1,96)
    cA = jnp.maximum(jnp.maximum(rA[:, 0:94], rA[:, 1:95]), rA[:, 2:96])
    cB = jnp.maximum(jnp.maximum(rB[:, 0:94], rB[:, 1:95]), rB[:, 2:96])

    # ---- MLP: linear1 -> ReLU -> linear2 -> ReLU -> linear3 ----
    h = (dotbf(cA, g1_ref[0]) + dotbf(cB, g1_ref[1])
         + dotbf(f_ref[0], w1f_ref[...]) + lb1_ref[...])
    h = jnp.maximum(h, 0.0)                                         # (1, 64)
    h = jnp.maximum(dotbf(h, w2_ref[...]) + lb2_ref[...], 0.0)      # (1, 64)
    o_ref[0] = dotbf(h, w3_ref[...]) + lb3_ref[...]                 # (1, 3)


# ------------------------------ forward wrapper ------------------------------

_PREP_ORDER = ("s44", "scol1", "t1", "b1r", "t2", "b2r", "s12", "scol2",
               "t3", "b3r", "t4", "b4r", "g1", "w1f", "l1b", "w2t", "l2b",
               "w3t", "l3b")


def _const_spec(arr):
    idx = (0,) * arr.ndim
    return pl.BlockSpec(tuple(arr.shape), lambda b, _idx=idx: _idx)


def dqn_forward(prep, x, f):
    """x: (B, 3, 132, 132) NCHW, f: (B, 4) -> (B, 3)."""
    B, C, H, W = x.shape
    assert (C, H, W) == (3, 132, 132), "kernel is specialized to 3x132x132"
    # channel-pack once in XLA, outside the kernel: (B, H, C*W)
    xp = jnp.transpose(x, (0, 2, 1, 3)).reshape(B, H, C * W)
    f3 = f.reshape(B, 1, f.shape[1])

    in_specs = ([pl.BlockSpec((1, H, C * W), lambda b: (b, 0, 0)),
                 pl.BlockSpec((1, 1, f.shape[1]), lambda b: (b, 0, 0))]
                + [_const_spec(prep[k]) for k in _PREP_ORDER])

    out = pl.pallas_call(
        _dqn_fused_kernel,
        out_shape=jax.ShapeDtypeStruct((B, 1, 3), jnp.float32),
        grid=(B,),
        in_specs=in_specs,
        out_specs=pl.BlockSpec((1, 1, 3), lambda b: (b, 0, 0)),
        compiler_params=pltpu.CompilerParams(dimension_semantics=("parallel",)),
    )(xp, f3, *[prep[k] for k in _PREP_ORDER])
    return out.reshape(B, 3)


# ------------------------ parameters & one-time prep --------------------------

def init_params(key):
    """Deterministic synthetic init, PyTorch parameter shapes."""
    def conv(k, co, ci, kh, kw):
        k1, k2 = jax.random.split(k)
        bound = 1.0 / (ci * kh * kw) ** 0.5
        w = jax.random.uniform(k1, (co, ci, kh, kw), jnp.float32, -bound, bound)
        b = jax.random.uniform(k2, (co,), jnp.float32, -bound, bound)
        return w, b

    def linear(k, out_f, in_f):
        k1, k2 = jax.random.split(k)
        bound = 1.0 / in_f ** 0.5
        w = jax.random.uniform(k1, (out_f, in_f), jnp.float32, -bound, bound)
        b = jax.random.uniform(k2, (out_f,), jnp.float32, -bound, bound)
        return w, b

    ks = jax.random.split(key, 7)
    return {
        "c11": conv(ks[0], 4, 3, 5, 5),
        "c12": conv(ks[1], 8, 4, 5, 5),
        "c21": conv(ks[2], 8, 8, 4, 4),
        "c22": conv(ks[3], 16, 8, 4, 4),
        "l1": linear(ks[4], 64, 68),
        "l2": linear(ks[5], 64, 64),
        "l3": linear(ks[6], 3, 64),
    }


def prepare_params(params):
    """One-time host-side prep: bf16 Toeplitz conv matrices, bf16 0/1 pool
    selection matrices, f32 broadcast bias rows, bf16 transposed MLP weights.
    All weight reshaping/transposition is hoisted out of the forward pass."""
    np32 = lambda a: np.asarray(a, np.float32)
    w1, b1 = np32(params["c11"][0]), np32(params["c11"][1])
    w2, b2 = np32(params["c12"][0]), np32(params["c12"][1])
    w3, b3 = np32(params["c21"][0]), np32(params["c21"][1])
    w4, b4 = np32(params["c22"][0]), np32(params["c22"][1])
    l1w, l1b = np32(params["l1"][0]), np32(params["l1"][1])
    l2w, l2b = np32(params["l2"][0]), np32(params["l2"][1])
    l3w, l3b = np32(params["l3"][0]), np32(params["l3"][1])

    def toeplitz(w, Wi, Wo):
        # T[kh, ci*Wi + (wo+kw), co*Wo + wo] = w[co, ci, kh, kw]
        Co, Ci, KH, KW = w.shape
        T = np.zeros((KH, Ci * Wi, Co * Wo), np.float32)
        rows = np.arange(Ci)[:, None] * Wi
        cols = np.arange(Co)[None, :] * Wo
        for kh in range(KH):
            for kw in range(KW):
                for wo in range(Wo):
                    T[kh, rows + wo + kw, cols + wo] = w[:, :, kh, kw].T
        return T

    def row_sel(n, m):        # stride-3 row selection: S[i, 3i] = 1
        S = np.zeros((n, m), np.float32)
        S[np.arange(n), 3 * np.arange(n)] = 1.0
        return S

    def col_sel(n_ch, w_in, w_out, n_rows):
        # stride-3 column subsample of a lane-packed (.., n_ch*w_in) slab.
        # Invariant: pooling window never crosses a channel block, so the
        # cross-channel garbage lanes produced by the lane-shift max are
        # never selected here.
        assert 3 * (w_out - 1) + 2 < w_in
        S = np.zeros((n_rows, n_ch * w_out), np.float32)
        for c in range(n_ch):
            for j in range(w_out):
                S[c * w_in + 3 * j, c * w_out + j] = 1.0
        return S

    # pool3 column subsample + NCHW flatten folded into linear1
    assert 3 * (2 - 1) + 2 < 6
    g1 = np.zeros((2, 94, 64), np.float32)
    for c in range(16):
        for i in range(2):
            for j in range(2):
                g1[i, c * 6 + 3 * j, :] = l1w[:, c * 4 + i * 2 + j]

    bf16_arrays = {
        "s44": row_sel(44, 130),
        "scol1": col_sel(3, 132, 44, 394),
        "t1": toeplitz(w1, 44, 40),          # (5, 132, 160)
        "t2": toeplitz(w2, 40, 36),          # (5, 160, 288)
        "s12": row_sel(12, 34),
        "scol2": col_sel(8, 36, 12, 286),
        "t3": toeplitz(w3, 12, 9),           # (4,  96,  72)
        "t4": toeplitz(w4, 9, 6),            # (4,  72,  96)
        "g1": g1,
        "w1f": l1w[:, 64:].T.copy(),
        "w2t": l2w.T.copy(),
        "w3t": l3w.T.copy(),
    }
    f32_arrays = {
        "b1r": np.repeat(b1, 40)[None, :],
        "b2r": np.repeat(b2, 36)[None, :],
        "b3r": np.repeat(b3, 9)[None, :],
        "b4r": np.repeat(b4, 6)[None, :],
        "l1b": l1b[None, :],
        "l2b": l2b[None, :],
        "l3b": l3b[None, :],
    }
    prep = {k: jnp.asarray(v, jnp.bfloat16) for k, v in bf16_arrays.items()}
    prep.update({k: jnp.asarray(v, jnp.float32) for k, v in f32_arrays.items()})
    return prep


# ------------------------------ pure-JAX reference ----------------------------

def dqn_reference(params, x, f):
    def conv(y, w, b):
        y = jax.lax.conv_general_dilated(
            y, w, window_strides=(1, 1), padding="VALID",
            dimension_numbers=("NCHW", "OIHW", "NCHW"))
        return y + b[None, :, None, None]

    def pool(y):
        return jax.lax.reduce_window(
            y, -jnp.inf, jax.lax.max, (1, 1, 3, 3), (1, 1, 3, 3), "VALID")

    relu = lambda v: jnp.maximum(v, 0.0)
    y = pool(x)
    y = relu(conv(y, *params["c11"]))
    y = relu(conv(y, *params["c12"]))
    y = pool(y)
    y = relu(conv(y, *params["c21"]))
    y = relu(conv(y, *params["c22"]))
    y = pool(y)
    y = y.reshape(y.shape[0], -1)
    y = jnp.concatenate([y, f], axis=-1)
    w, b = params["l1"]; y = relu(y @ w.T + b)
    w, b = params["l2"]; y = relu(y @ w.T + b)
    w, b = params["l3"]; y = y @ w.T + b
    return y


# ----------------------------------- main -------------------------------------

if __name__ == "__main__":
    key = jax.random.PRNGKey(0)
    kp, kx, kf = jax.random.split(key, 3)
    params = init_params(kp)
    prep = prepare_params(params)   # one-time weight prep (hoisted out of forward)

    # Smallest clean size consistent with the module: 132x132 image ->
    # 44 -> 40 -> 36 -> 12 -> 9 -> 6 -> 2x2x16 = 64 conv feats, +4 extra = 68.
    B, H, W = 2, 132, 132
    x = jax.random.normal(kx, (B, 3, H, W), jnp.float32)
    f = jax.random.normal(kf, (B, 4), jnp.float32)

    fwd = jax.jit(dqn_forward)
    out = jax.block_until_ready(fwd(prep, x, f))
    assert out.shape == (B, 3) and out.dtype == jnp.float32

    ref = jax.block_until_ready(jax.jit(dqn_reference)(params, x, f))
    rel_err = float(jnp.linalg.norm(out - ref) / (jnp.linalg.norm(ref) + 1e-12))
    # bf16 MXU operands with f32 accumulation: a few 1e-3 relative error.
    assert rel_err < 5e-2, (rel_err, out, ref)

    print("KERNEL_OK")
</pallas_src>

<mosaic_0001>
module attributes {stable_mosaic.version = 11 : i64} {
  func.func @_dqn_fused_kernel(%arg0: i32, %arg1: memref<1x132x396xf32, #tpu.memory_space<vmem>>, %arg2: memref<1x1x4xf32, #tpu.memory_space<vmem>>, %arg3: memref<44x130xbf16, #tpu.memory_space<vmem>>, %arg4: memref<394x132xbf16, #tpu.memory_space<vmem>>, %arg5: memref<5x132x160xbf16, #tpu.memory_space<vmem>>, %arg6: memref<1x160xf32, #tpu.memory_space<vmem>>, %arg7: memref<5x160x288xbf16, #tpu.memory_space<vmem>>, %arg8: memref<1x288xf32, #tpu.memory_space<vmem>>, %arg9: memref<12x34xbf16, #tpu.memory_space<vmem>>, %arg10: memref<286x96xbf16, #tpu.memory_space<vmem>>, %arg11: memref<4x96x72xbf16, #tpu.memory_space<vmem>>, %arg12: memref<1x72xf32, #tpu.memory_space<vmem>>, %arg13: memref<4x72x96xbf16, #tpu.memory_space<vmem>>, %arg14: memref<1x96xf32, #tpu.memory_space<vmem>>, %arg15: memref<2x94x64xbf16, #tpu.memory_space<vmem>>, %arg16: memref<4x64xbf16, #tpu.memory_space<vmem>>, %arg17: memref<1x64xf32, #tpu.memory_space<vmem>>, %arg18: memref<64x64xbf16, #tpu.memory_space<vmem>>, %arg19: memref<1x64xf32, #tpu.memory_space<vmem>>, %arg20: memref<64x3xbf16, #tpu.memory_space<vmem>>, %arg21: memref<1x3xf32, #tpu.memory_space<vmem>>, %arg22: memref<1x1x3xf32, #tpu.memory_space<vmem>>) attributes {dimension_semantics = [#tpu.dimension_semantics<parallel>], iteration_bounds = array<i64: 2>, scalar_prefetch = 0 : i64, scratch_operands = 0 : i64, tpu.core_type = #tpu.core_type<tc>, window_params = [{transform_indices = @transform_0, window_bounds = array<i64: 1, 132, 396>}, {transform_indices = @transform_1, window_bounds = array<i64: 1, 1, 4>}, {pipeline_mode = #tpu.pipeline_mode<synchronous>, transform_indices = @transform_2, window_bounds = array<i64: 44, 130>}, {pipeline_mode = #tpu.pipeline_mode<synchronous>, transform_indices = @transform_3, window_bounds = array<i64: 394, 132>}, {pipeline_mode = #tpu.pipeline_mode<synchronous>, transform_indices = @transform_4, window_bounds = array<i64: 5, 132, 160>}, {pipeline_mode = #tpu.pipeline_mode<synchronous>, transform_indices = @transform_5, window_bounds = array<i64: 1, 160>}, {pipeline_mode = #tpu.pipeline_mode<synchronous>, transform_indices = @transform_6, window_bounds = array<i64: 5, 160, 288>}, {pipeline_mode = #tpu.pipeline_mode<synchronous>, transform_indices = @transform_7, window_bounds = array<i64: 1, 288>}, {pipeline_mode = #tpu.pipeline_mode<synchronous>, transform_indices = @transform_8, window_bounds = array<i64: 12, 34>}, {pipeline_mode = #tpu.pipeline_mode<synchronous>, transform_indices = @transform_9, window_bounds = array<i64: 286, 96>}, {pipeline_mode = #tpu.pipeline_mode<synchronous>, transform_indices = @transform_10, window_bounds = array<i64: 4, 96, 72>}, {pipeline_mode = #tpu.pipeline_mode<synchronous>, transform_indices = @transform_11, window_bounds = array<i64: 1, 72>}, {pipeline_mode = #tpu.pipeline_mode<synchronous>, transform_indices = @transform_12, window_bounds = array<i64: 4, 72, 96>}, {pipeline_mode = #tpu.pipeline_mode<synchronous>, transform_indices = @transform_13, window_bounds = array<i64: 1, 96>}, {pipeline_mode = #tpu.pipeline_mode<synchronous>, transform_indices = @transform_14, window_bounds = array<i64: 2, 94, 64>}, {pipeline_mode = #tpu.pipeline_mode<synchronous>, transform_indices = @transform_15, window_bounds = array<i64: 4, 64>}, {pipeline_mode = #tpu.pipeline_mode<synchronous>, transform_indices = @transform_16, window_bounds = array<i64: 1, 64>}, {pipeline_mode = #tpu.pipeline_mode<synchronous>, transform_indices = @transform_17, window_bounds = array<i64: 64, 64>}, {pipeline_mode = #tpu.pipeline_mode<synchronous>, transform_indices = @transform_18, window_bounds = array<i64: 1, 64>}, {pipeline_mode = #tpu.pipeline_mode<synchronous>, transform_indices = @transform_19, window_bounds = array<i64: 64, 3>}, {pipeline_mode = #tpu.pipeline_mode<synchronous>, transform_indices = @transform_20, window_bounds = array<i64: 1, 3>}, {transform_indices = @transform_21, window_bounds = array<i64: 1, 1, 3>}]} {
    %c0 = arith.constant 0 : index
    %c0_0 = arith.constant 0 : index
    %c0_1 = arith.constant 0 : index
    %0 = vector.load %arg1[%c0, %c0_0, %c0_1] : memref<1x132x396xf32, #tpu.memory_space<vmem>>, vector<1x132x396xf32>
    %1 = vector.shape_cast %0 : vector<1x132x396xf32> to vector<132x396xf32>
    %2 = vector.extract_strided_slice %1 {offsets = [0, 0], sizes = [130, 396], strides = [1, 1]} : vector<132x396xf32> to vector<130x396xf32>
    %3 = vector.extract_strided_slice %1 {offsets = [1, 0], sizes = [130, 396], strides = [1, 1]} : vector<132x396xf32> to vector<130x396xf32>
    %4 = arith.maximumf %2, %3 : vector<130x396xf32>
    %5 = vector.extract_strided_slice %1 {offsets = [2, 0], sizes = [130, 396], strides = [1, 1]} : vector<132x396xf32> to vector<130x396xf32>
    %6 = arith.maximumf %4, %5 : vector<130x396xf32>
    %c0_2 = arith.constant 0 : index
    %c0_3 = arith.constant 0 : index
    %7 = vector.load %arg3[%c0_2, %c0_3] : memref<44x130xbf16, #tpu.memory_space<vmem>>, vector<44x130xbf16>
    %8 = arith.truncf %6 : vector<130x396xf32> to vector<130x396xbf16>
    %cst = arith.constant dense<0.000000e+00> : vector<44x396xf32>
    %9 = tpu.matmul %7, %8, %cst {dimension_numbers = #tpu.dot_dimension_numbers<[1], [0], [0], [1], [0, 0, 1, 1], [], []>} : vector<44x130xbf16>, vector<130x396xbf16>, vector<44x396xf32> -> vector<44x396xf32>
    %10 = vector.extract_strided_slice %9 {offsets = [0, 0], sizes = [44, 394], strides = [1, 1]} : vector<44x396xf32> to vector<44x394xf32>
    %11 = vector.extract_strided_slice %9 {offsets = [0, 1], sizes = [44, 394], strides = [1, 1]} : vector<44x396xf32> to vector<44x394xf32>
    %12 = arith.maximumf %10, %11 : vector<44x394xf32>
    %13 = vector.extract_strided_slice %9 {offsets = [0, 2], sizes = [44, 394], strides = [1, 1]} : vector<44x396xf32> to vector<44x394xf32>
    %14 = arith.maximumf %12, %13 : vector<44x394xf32>
    %c0_4 = arith.constant 0 : index
    %c0_5 = arith.constant 0 : index
    %15 = vector.load %arg4[%c0_4, %c0_5] : memref<394x132xbf16, #tpu.memory_space<vmem>>, vector<394x132xbf16>
    %16 = arith.truncf %14 : vector<44x394xf32> to vector<44x394xbf16>
    %cst_6 = arith.constant dense<0.000000e+00> : vector<44x132xf32>
    %17 = tpu.matmul %16, %15, %cst_6 {dimension_numbers = #tpu.dot_dimension_numbers<[1], [0], [0], [1], [0, 0, 1, 1], [], []>} : vector<44x394xbf16>, vector<394x132xbf16>, vector<44x132xf32> -> vector<44x132xf32>
    %18 = vector.extract_strided_slice %17 {offsets = [0, 0], sizes = [40, 132], strides = [1, 1]} : vector<44x132xf32> to vector<40x132xf32>
    %c0_7 = arith.constant 0 : index
    %c0_8 = arith.constant 0 : index
    %c0_9 = arith.constant 0 : index
    %19 = vector.load %arg5[%c0_7, %c0_8, %c0_9] : memref<5x132x160xbf16, #tpu.memory_space<vmem>>, vector<1x132x160xbf16>
    %20 = vector.shape_cast %19 : vector<1x132x160xbf16> to vector<132x160xbf16>
    %21 = arith.truncf %18 : vector<40x132xf32> to vector<40x132xbf16>
    %cst_10 = arith.constant dense<0.000000e+00> : vector<40x160xf32>
    %22 = tpu.matmul %21, %20, %cst_10 {dimension_numbers = #tpu.dot_dimension_numbers<[1], [0], [0], [1], [0, 0, 1, 1], [], []>} : vector<40x132xbf16>, vector<132x160xbf16>, vector<40x160xf32> -> vector<40x160xf32>
    %23 = vector.extract_strided_slice %17 {offsets = [1, 0], sizes = [40, 132], strides = [1, 1]} : vector<44x132xf32> to vector<40x132xf32>
    %c1 = arith.constant 1 : index
    %c0_11 = arith.constant 0 : index
    %c0_12 = arith.constant 0 : index
    %24 = vector.load %arg5[%c1, %c0_11, %c0_12] : memref<5x132x160xbf16, #tpu.memory_space<vmem>>, vector<1x132x160xbf16>
    %25 = vector.shape_cast %24 : vector<1x132x160xbf16> to vector<132x160xbf16>
    %26 = arith.truncf %23 : vector<40x132xf32> to vector<40x132xbf16>
    %cst_13 = arith.constant dense<0.000000e+00> : vector<40x160xf32>
    %27 = tpu.matmul %26, %25, %cst_13 {dimension_numbers = #tpu.dot_dimension_numbers<[1], [0], [0], [1], [0, 0, 1, 1], [], []>} : vector<40x132xbf16>, vector<132x160xbf16>, vector<40x160xf32> -> vector<40x160xf32>
    %28 = arith.addf %22, %27 : vector<40x160xf32>
    %29 = vector.extract_strided_slice %17 {offsets = [2, 0], sizes = [40, 132], strides = [1, 1]} : vector<44x132xf32> to vector<40x132xf32>
    %c2 = arith.constant 2 : index
    %c0_14 = arith.constant 0 : index
    %c0_15 = arith.constant 0 : index
    %30 = vector.load %arg5[%c2, %c0_14, %c0_15] : memref<5x132x160xbf16, #tpu.memory_space<vmem>>, vector<1x132x160xbf16>
    %31 = vector.shape_cast %30 : vector<1x132x160xbf16> to vector<132x160xbf16>
    %32 = arith.truncf %29 : vector<40x132xf32> to vector<40x132xbf16>
    %cst_16 = arith.constant dense<0.000000e+00> : vector<40x160xf32>
    %33 = tpu.matmul %32, %31, %cst_16 {dimension_numbers = #tpu.dot_dimension_numbers<[1], [0], [0], [1], [0, 0, 1, 1], [], []>} : vector<40x132xbf16>, vector<132x160xbf16>, vector<40x160xf32> -> vector<40x160xf32>
    %34 = arith.addf %28, %33 : vector<40x160xf32>
    %35 = vector.extract_strided_slice %17 {offsets = [3, 0], sizes = [40, 132], strides = [1, 1]} : vector<44x132xf32> to vector<40x132xf32>
    %c3 = arith.constant 3 : index
    %c0_17 = arith.constant 0 : index
    %c0_18 = arith.constant 0 : index
    %36 = vector.load %arg5[%c3, %c0_17, %c0_18] : memref<5x132x160xbf16, #tpu.memory_space<vmem>>, vector<1x132x160xbf16>
    %37 = vector.shape_cast %36 : vector<1x132x160xbf16> to vector<132x160xbf16>
    %38 = arith.truncf %35 : vector<40x132xf32> to vector<40x132xbf16>
    %cst_19 = arith.constant dense<0.000000e+00> : vector<40x160xf32>
    %39 = tpu.matmul %38, %37, %cst_19 {dimension_numbers = #tpu.dot_dimension_numbers<[1], [0], [0], [1], [0, 0, 1, 1], [], []>} : vector<40x132xbf16>, vector<132x160xbf16>, vector<40x160xf32> -> vector<40x160xf32>
    %40 = arith.addf %34, %39 : vector<40x160xf32>
    %41 = vector.extract_strided_slice %17 {offsets = [4, 0], sizes = [40, 132], strides = [1, 1]} : vector<44x132xf32> to vector<40x132xf32>
    %c4 = arith.constant 4 : index
    %c0_20 = arith.constant 0 : index
    %c0_21 = arith.constant 0 : index
    %42 = vector.load %arg5[%c4, %c0_20, %c0_21] : memref<5x132x160xbf16, #tpu.memory_space<vmem>>, vector<1x132x160xbf16>
    %43 = vector.shape_cast %42 : vector<1x132x160xbf16> to vector<132x160xbf16>
    %44 = arith.truncf %41 : vector<40x132xf32> to vector<40x132xbf16>
    %cst_22 = arith.constant dense<0.000000e+00> : vector<40x160xf32>
    %45 = tpu.matmul %44, %43, %cst_22 {dimension_numbers = #tpu.dot_dimension_numbers<[1], [0], [0], [1], [0, 0, 1, 1], [], []>} : vector<40x132xbf16>, vector<132x160xbf16>, vector<40x160xf32> -> vector<40x160xf32>
    %46 = arith.addf %40, %45 : vector<40x160xf32>
    %c0_23 = arith.constant 0 : index
    %c0_24 = arith.constant 0 : index
    %47 = vector.load %arg6[%c0_23, %c0_24] : memref<1x160xf32, #tpu.memory_space<vmem>>, vector<1x160xf32>
    %48 = vector.broadcast %47 : vector<1x160xf32> to vector<40x160xf32>
    %49 = arith.addf %46, %48 : vector<40x160xf32>
    %cst_25 = arith.constant 0.000000e+00 : f32
    %50 = vector.broadcast %cst_25 : f32 to vector<40x160xf32>
    %51 = arith.maximumf %49, %50 : vector<40x160xf32>
    %52 = vector.extract_strided_slice %51 {offsets = [0, 0], sizes = [36, 160], strides = [1, 1]} : vector<40x160xf32> to vector<36x160xf32>
    %c0_26 = arith.constant 0 : index
    %c0_27 = arith.constant 0 : index
    %c0_28 = arith.constant 0 : index
    %53 = vector.load %arg7[%c0_26, %c0_27, %c0_28] : memref<5x160x288xbf16, #tpu.memory_space<vmem>>, vector<1x160x288xbf16>
    %54 = vector.shape_cast %53 : vector<1x160x288xbf16> to vector<160x288xbf16>
    %55 = arith.truncf %52 : vector<36x160xf32> to vector<36x160xbf16>
    %cst_29 = arith.constant dense<0.000000e+00> : vector<36x288xf32>
    %56 = tpu.matmul %55, %54, %cst_29 {dimension_numbers = #tpu.dot_dimension_numbers<[1], [0], [0], [1], [0, 0, 1, 1], [], []>} : vector<36x160xbf16>, vector<160x288xbf16>, vector<36x288xf32> -> vector<36x288xf32>
    %57 = vector.extract_strided_slice %51 {offsets = [1, 0], sizes = [36, 160], strides = [1, 1]} : vector<40x160xf32> to vector<36x160xf32>
    %c1_30 = arith.constant 1 : index
    %c0_31 = arith.constant 0 : index
    %c0_32 = arith.constant 0 : index
    %58 = vector.load %arg7[%c1_30, %c0_31, %c0_32] : memref<5x160x288xbf16, #tpu.memory_space<vmem>>, vector<1x160x288xbf16>
    %59 = vector.shape_cast %58 : vector<1x160x288xbf16> to vector<160x288xbf16>
    %60 = arith.truncf %57 : vector<36x160xf32> to vector<36x160xbf16>
    %cst_33 = arith.constant dense<0.000000e+00> : vector<36x288xf32>
    %61 = tpu.matmul %60, %59, %cst_33 {dimension_numbers = #tpu.dot_dimension_numbers<[1], [0], [0], [1], [0, 0, 1, 1], [], []>} : vector<36x160xbf16>, vector<160x288xbf16>, vector<36x288xf32> -> vector<36x288xf32>
    %62 = arith.addf %56, %61 : vector<36x288xf32>
    %63 = vector.extract_strided_slice %51 {offsets = [2, 0], sizes = [36, 160], strides = [1, 1]} : vector<40x160xf32> to vector<36x160xf32>
    %c2_34 = arith.constant 2 : index
    %c0_35 = arith.constant 0 : index
    %c0_36 = arith.constant 0 : index
    %64 = vector.load %arg7[%c2_34, %c0_35, %c0_36] : memref<5x160x288xbf16, #tpu.memory_space<vmem>>, vector<1x160x288xbf16>
    %65 = vector.shape_cast %64 : vector<1x160x288xbf16> to vector<160x288xbf16>
    %66 = arith.truncf %63 : vector<36x160xf32> to vector<36x160xbf16>
    %cst_37 = arith.constant dense<0.000000e+00> : vector<36x288xf32>
    %67 = tpu.matmul %66, %65, %cst_37 {dimension_numbers = #tpu.dot_dimension_numbers<[1], [0], [0], [1], [0, 0, 1, 1], [], []>} : vector<36x160xbf16>, vector<160x288xbf16>, vector<36x288xf32> -> vector<36x288xf32>
    %68 = arith.addf %62, %67 : vector<36x288xf32>
    %69 = vector.extract_strided_slice %51 {offsets = [3, 0], sizes = [36, 160], strides = [1, 1]} : vector<40x160xf32> to vector<36x160xf32>
    %c3_38 = arith.constant 3 : index
    %c0_39 = arith.constant 0 : index
    %c0_40 = arith.constant 0 : index
    %70 = vector.load %arg7[%c3_38, %c0_39, %c0_40] : memref<5x160x288xbf16, #tpu.memory_space<vmem>>, vector<1x160x288xbf16>
    %71 = vector.shape_cast %70 : vector<1x160x288xbf16> to vector<160x288xbf16>
    %72 = arith.truncf %69 : vector<36x160xf32> to vector<36x160xbf16>
    %cst_41 = arith.constant dense<0.000000e+00> : vector<36x288xf32>
    %73 = tpu.matmul %72, %71, %cst_41 {dimension_numbers = #tpu.dot_dimension_numbers<[1], [0], [0], [1], [0, 0, 1, 1], [], []>} : vector<36x160xbf16>, vector<160x288xbf16>, vector<36x288xf32> -> vector<36x288xf32>
    %74 = arith.addf %68, %73 : vector<36x288xf32>
    %75 = vector.extract_strided_slice %51 {offsets = [4, 0], sizes = [36, 160], strides = [1, 1]} : vector<40x160xf32> to vector<36x160xf32>
    %c4_42 = arith.constant 4 : index
    %c0_43 = arith.constant 0 : index
    %c0_44 = arith.constant 0 : index
    %76 = vector.load %arg7[%c4_42, %c0_43, %c0_44] : memref<5x160x288xbf16, #tpu.memory_space<vmem>>, vector<1x160x288xbf16>
    %77 = vector.shape_cast %76 : vector<1x160x288xbf16> to vector<160x288xbf16>
    %78 = arith.truncf %75 : vector<36x160xf32> to vector<36x160xbf16>
    %cst_45 = arith.constant dense<0.000000e+00> : vector<36x288xf32>
    %79 = tpu.matmul %78, %77, %cst_45 {dimension_numbers = #tpu.dot_dimension_numbers<[1], [0], [0], [1], [0, 0, 1, 1], [], []>} : vector<36x160xbf16>, vector<160x288xbf16>, vector<36x288xf32> -> vector<36x288xf32>
    %80 = arith.addf %74, %79 : vector<36x288xf32>
    %c0_46 = arith.constant 0 : index
    %c0_47 = arith.constant 0 : index
    %81 = vector.load %arg8[%c0_46, %c0_47] : memref<1x288xf32, #tpu.memory_space<vmem>>, vector<1x288xf32>
    %82 = vector.broadcast %81 : vector<1x288xf32> to vector<36x288xf32>
    %83 = arith.addf %80, %82 : vector<36x288xf32>
    %cst_48 = arith.constant 0.000000e+00 : f32
    %84 = vector.broadcast %cst_48 : f32 to vector<36x288xf32>
    %85 = arith.maximumf %83, %84 : vector<36x288xf32>
    %86 = vector.extract_strided_slice %85 {offsets = [0, 0], sizes = [34, 288], strides = [1, 1]} : vector<36x288xf32> to vector<34x288xf32>
    %87 = vector.extract_strided_slice %85 {offsets = [1, 0], sizes = [34, 288], strides = [1, 1]} : vector<36x288xf32> to vector<34x288xf32>
    %88 = arith.maximumf %86, %87 : vector<34x288xf32>
    %89 = vector.extract_strided_slice %85 {offsets = [2, 0], sizes = [34, 288], strides = [1, 1]} : vector<36x288xf32> to vector<34x288xf32>
    %90 = arith.maximumf %88, %89 : vector<34x288xf32>
    %c0_49 = arith.constant 0 : index
    %c0_50 = arith.constant 0 : index
    %91 = vector.load %arg9[%c0_49, %c0_50] : memref<12x34xbf16, #tpu.memory_space<vmem>>, vector<12x34xbf16>
    %92 = arith.truncf %90 : vector<34x288xf32> to vector<34x288xbf16>
    %cst_51 = arith.constant dense<0.000000e+00> : vector<12x288xf32>
    %93 = tpu.matmul %91, %92, %cst_51 {dimension_numbers = #tpu.dot_dimension_numbers<[1], [0], [0], [1], [0, 0, 1, 1], [], []>} : vector<12x34xbf16>, vector<34x288xbf16>, vector<12x288xf32> -> vector<12x288xf32>
    %94 = vector.extract_strided_slice %93 {offsets = [0, 0], sizes = [12, 286], strides = [1, 1]} : vector<12x288xf32> to vector<12x286xf32>
    %95 = vector.extract_strided_slice %93 {offsets = [0, 1], sizes = [12, 286], strides = [1, 1]} : vector<12x288xf32> to vector<12x286xf32>
    %96 = arith.maximumf %94, %95 : vector<12x286xf32>
    %97 = vector.extract_strided_slice %93 {offsets = [0, 2], sizes = [12, 286], strides = [1, 1]} : vector<12x288xf32> to vector<12x286xf32>
    %98 = arith.maximumf %96, %97 : vector<12x286xf32>
    %c0_52 = arith.constant 0 : index
    %c0_53 = arith.constant 0 : index
    %99 = vector.load %arg10[%c0_52, %c0_53] : memref<286x96xbf16, #tpu.memory_space<vmem>>, vector<286x96xbf16>
    %100 = arith.truncf %98 : vector<12x286xf32> to vector<12x286xbf16>
    %cst_54 = arith.constant dense<0.000000e+00> : vector<12x96xf32>
    %101 = tpu.matmul %100, %99, %cst_54 {dimension_numbers = #tpu.dot_dimension_numbers<[1], [0], [0], [1], [0, 0, 1, 1], [], []>} : vector<12x286xbf16>, vector<286x96xbf16>, vector<12x96xf32> -> vector<12x96xf32>
    %102 = vector.extract_strided_slice %101 {offsets = [0, 0], sizes = [9, 96], strides = [1, 1]} : vector<12x96xf32> to vector<9x96xf32>
    %c0_55 = arith.constant 0 : index
    %c0_56 = arith.constant 0 : index
    %c0_57 = arith.constant 0 : index
    %103 = vector.load %arg11[%c0_55, %c0_56, %c0_57] : memref<4x96x72xbf16, #tpu.memory_space<vmem>>, vector<1x96x72xbf16>
    %104 = vector.shape_cast %103 : vector<1x96x72xbf16> to vector<96x72xbf16>
    %105 = arith.truncf %102 : vector<9x96xf32> to vector<9x96xbf16>
    %cst_58 = arith.constant dense<0.000000e+00> : vector<9x72xf32>
    %106 = tpu.matmul %105, %104, %cst_58 {dimension_numbers = #tpu.dot_dimension_numbers<[1], [0], [0], [1], [0, 0, 1, 1], [], []>} : vector<9x96xbf16>, vector<96x72xbf16>, vector<9x72xf32> -> vector<9x72xf32>
    %107 = vector.extract_strided_slice %101 {offsets = [1, 0], sizes = [9, 96], strides = [1, 1]} : vector<12x96xf32> to vector<9x96xf32>
    %c1_59 = arith.constant 1 : index
    %c0_60 = arith.constant 0 : index
    %c0_61 = arith.constant 0 : index
    %108 = vector.load %arg11[%c1_59, %c0_60, %c0_61] : memref<4x96x72xbf16, #tpu.memory_space<vmem>>, vector<1x96x72xbf16>
    %109 = vector.shape_cast %108 : vector<1x96x72xbf16> to vector<96x72xbf16>
    %110 = arith.truncf %107 : vector<9x96xf32> to vector<9x96xbf16>
    %cst_62 = arith.constant dense<0.000000e+00> : vector<9x72xf32>
    %111 = tpu.matmul %110, %109, %cst_62 {dimension_numbers = #tpu.dot_dimension_numbers<[1], [0], [0], [1], [0, 0, 1, 1], [], []>} : vector<9x96xbf16>, vector<96x72xbf16>, vector<9x72xf32> -> vector<9x72xf32>
    %112 = arith.addf %106, %111 : vector<9x72xf32>
    %113 = vector.extract_strided_slice %101 {offsets = [2, 0], sizes = [9, 96], strides = [1, 1]} : vector<12x96xf32> to vector<9x96xf32>
    %c2_63 = arith.constant 2 : index
    %c0_64 = arith.constant 0 : index
    %c0_65 = arith.constant 0 : index
    %114 = vector.load %arg11[%c2_63, %c0_64, %c0_65] : memref<4x96x72xbf16, #tpu.memory_space<vmem>>, vector<1x96x72xbf16>
    %115 = vector.shape_cast %114 : vector<1x96x72xbf16> to vector<96x72xbf16>
    %116 = arith.truncf %113 : vector<9x96xf32> to vector<9x96xbf16>
    %cst_66 = arith.constant dense<0.000000e+00> : vector<9x72xf32>
    %117 = tpu.matmul %116, %115, %cst_66 {dimension_numbers = #tpu.dot_dimension_numbers<[1], [0], [0], [1], [0, 0, 1, 1], [], []>} : vector<9x96xbf16>, vector<96x72xbf16>, vector<9x72xf32> -> vector<9x72xf32>
    %118 = arith.addf %112, %117 : vector<9x72xf32>
    %119 = vector.extract_strided_slice %101 {offsets = [3, 0], sizes = [9, 96], strides = [1, 1]} : vector<12x96xf32> to vector<9x96xf32>
    %c3_67 = arith.constant 3 : index
    %c0_68 = arith.constant 0 : index
    %c0_69 = arith.constant 0 : index
    %120 = vector.load %arg11[%c3_67, %c0_68, %c0_69] : memref<4x96x72xbf16, #tpu.memory_space<vmem>>, vector<1x96x72xbf16>
    %121 = vector.shape_cast %120 : vector<1x96x72xbf16> to vector<96x72xbf16>
    %122 = arith.truncf %119 : vector<9x96xf32> to vector<9x96xbf16>
    %cst_70 = arith.constant dense<0.000000e+00> : vector<9x72xf32>
    %123 = tpu.matmul %122, %121, %cst_70 {dimension_numbers = #tpu.dot_dimension_numbers<[1], [0], [0], [1], [0, 0, 1, 1], [], []>} : vector<9x96xbf16>, vector<96x72xbf16>, vector<9x72xf32> -> vector<9x72xf32>
    %124 = arith.addf %118, %123 : vector<9x72xf32>
    %c0_71 = arith.constant 0 : index
    %c0_72 = arith.constant 0 : index
    %125 = vector.load %arg12[%c0_71, %c0_72] : memref<1x72xf32, #tpu.memory_space<vmem>>, vector<1x72xf32>
    %126 = vector.broadcast %125 : vector<1x72xf32> to vector<9x72xf32>
    %127 = arith.addf %124, %126 : vector<9x72xf32>
    %cst_73 = arith.constant 0.000000e+00 : f32
    %128 = vector.broadcast %cst_73 : f32 to vector<9x72xf32>
    %129 = arith.maximumf %127, %128 : vector<9x72xf32>
    %130 = vector.extract_strided_slice %129 {offsets = [0, 0], sizes = [6, 72], strides = [1, 1]} : vector<9x72xf32> to vector<6x72xf32>
    %c0_74 = arith.constant 0 : index
    %c0_75 = arith.constant 0 : index
    %c0_76 = arith.constant 0 : index
    %131 = vector.load %arg13[%c0_74, %c0_75, %c0_76] : memref<4x72x96xbf16, #tpu.memory_space<vmem>>, vector<1x72x96xbf16>
    %132 = vector.shape_cast %131 : vector<1x72x96xbf16> to vector<72x96xbf16>
    %133 = arith.truncf %130 : vector<6x72xf32> to vector<6x72xbf16>
    %cst_77 = arith.constant dense<0.000000e+00> : vector<6x96xf32>
    %134 = tpu.matmul %133, %132, %cst_77 {dimension_numbers = #tpu.dot_dimension_numbers<[1], [0], [0], [1], [0, 0, 1, 1], [], []>} : vector<6x72xbf16>, vector<72x96xbf16>, vector<6x96xf32> -> vector<6x96xf32>
    %135 = vector.extract_strided_slice %129 {offsets = [1, 0], sizes = [6, 72], strides = [1, 1]} : vector<9x72xf32> to vector<6x72xf32>
    %c1_78 = arith.constant 1 : index
    %c0_79 = arith.constant 0 : index
    %c0_80 = arith.constant 0 : index
    %136 = vector.load %arg13[%c1_78, %c0_79, %c0_80] : memref<4x72x96xbf16, #tpu.memory_space<vmem>>, vector<1x72x96xbf16>
    %137 = vector.shape_cast %136 : vector<1x72x96xbf16> to vector<72x96xbf16>
    %138 = arith.truncf %135 : vector<6x72xf32> to vector<6x72xbf16>
    %cst_81 = arith.constant dense<0.000000e+00> : vector<6x96xf32>
    %139 = tpu.matmul %138, %137, %cst_81 {dimension_numbers = #tpu.dot_dimension_numbers<[1], [0], [0], [1], [0, 0, 1, 1], [], []>} : vector<6x72xbf16>, vector<72x96xbf16>, vector<6x96xf32> -> vector<6x96xf32>
    %140 = arith.addf %134, %139 : vector<6x96xf32>
    %141 = vector.extract_strided_slice %129 {offsets = [2, 0], sizes = [6, 72], strides = [1, 1]} : vector<9x72xf32> to vector<6x72xf32>
    %c2_82 = arith.constant 2 : index
    %c0_83 = arith.constant 0 : index
    %c0_84 = arith.constant 0 : index
    %142 = vector.load %arg13[%c2_82, %c0_83, %c0_84] : memref<4x72x96xbf16, #tpu.memory_space<vmem>>, vector<1x72x96xbf16>
    %143 = vector.shape_cast %142 : vector<1x72x96xbf16> to vector<72x96xbf16>
    %144 = arith.truncf %141 : vector<6x72xf32> to vector<6x72xbf16>
    %cst_85 = arith.constant dense<0.000000e+00> : vector<6x96xf32>
    %145 = tpu.matmul %144, %143, %cst_85 {dimension_numbers = #tpu.dot_dimension_numbers<[1], [0], [0], [1], [0, 0, 1, 1], [], []>} : vector<6x72xbf16>, vector<72x96xbf16>, vector<6x96xf32> -> vector<6x96xf32>
    %146 = arith.addf %140, %145 : vector<6x96xf32>
    %147 = vector.extract_strided_slice %129 {offsets = [3, 0], sizes = [6, 72], strides = [1, 1]} : vector<9x72xf32> to vector<6x72xf32>
    %c3_86 = arith.constant 3 : index
    %c0_87 = arith.constant 0 : index
    %c0_88 = arith.constant 0 : index
    %148 = vector.load %arg13[%c3_86, %c0_87, %c0_88] : memref<4x72x96xbf16, #tpu.memory_space<vmem>>, vector<1x72x96xbf16>
    %149 = vector.shape_cast %148 : vector<1x72x96xbf16> to vector<72x96xbf16>
    %150 = arith.truncf %147 : vector<6x72xf32> to vector<6x72xbf16>
    %cst_89 = arith.constant dense<0.000000e+00> : vector<6x96xf32>
    %151 = tpu.matmul %150, %149, %cst_89 {dimension_numbers = #tpu.dot_dimension_numbers<[1], [0], [0], [1], [0, 0, 1, 1], [], []>} : vector<6x72xbf16>, vector<72x96xbf16>, vector<6x96xf32> -> vector<6x96xf32>
    %152 = arith.addf %146, %151 : vector<6x96xf32>
    %c0_90 = arith.constant 0 : index
    %c0_91 = arith.constant 0 : index
    %153 = vector.load %arg14[%c0_90, %c0_91] : memref<1x96xf32, #tpu.memory_space<vmem>>, vector<1x96xf32>
    %154 = vector.broadcast %153 : vector<1x96xf32> to vector<6x96xf32>
    %155 = arith.addf %152, %154 : vector<6x96xf32>
    %cst_92 = arith.constant 0.000000e+00 : f32
    %156 = vector.broadcast %cst_92 : f32 to vector<6x96xf32>
    %157 = arith.maximumf %155, %156 : vector<6x96xf32>
    %158 = vector.extract_strided_slice %157 {offsets = [0, 0], sizes = [1, 96], strides = [1, 1]} : vector<6x96xf32> to vector<1x96xf32>
    %159 = vector.extract_strided_slice %157 {offsets = [1, 0], sizes = [1, 96], strides = [1, 1]} : vector<6x96xf32> to vector<1x96xf32>
    %160 = arith.maximumf %158, %159 : vector<1x96xf32>
    %161 = vector.extract_strided_slice %157 {offsets = [2, 0], sizes = [1, 96], strides = [1, 1]} : vector<6x96xf32> to vector<1x96xf32>
    %162 = arith.maximumf %160, %161 : vector<1x96xf32>
    %163 = vector.extract_strided_slice %157 {offsets = [3, 0], sizes = [1, 96], strides = [1, 1]} : vector<6x96xf32> to vector<1x96xf32>
    %164 = vector.extract_strided_slice %157 {offsets = [4, 0], sizes = [1, 96], strides = [1, 1]} : vector<6x96xf32> to vector<1x96xf32>
    %165 = arith.maximumf %163, %164 : vector<1x96xf32>
    %166 = vector.extract_strided_slice %157 {offsets = [5, 0], sizes = [1, 96], strides = [1, 1]} : vector<6x96xf32> to vector<1x96xf32>
    %167 = arith.maximumf %165, %166 : vector<1x96xf32>
    %168 = vector.extract_strided_slice %162 {offsets = [0, 0], sizes = [1, 94], strides = [1, 1]} : vector<1x96xf32> to vector<1x94xf32>
    %169 = vector.extract_strided_slice %162 {offsets = [0, 1], sizes = [1, 94], strides = [1, 1]} : vector<1x96xf32> to vector<1x94xf32>
    %170 = arith.maximumf %168, %169 : vector<1x94xf32>
    %171 = vector.extract_strided_slice %162 {offsets = [0, 2], sizes = [1, 94], strides = [1, 1]} : vector<1x96xf32> to vector<1x94xf32>
    %172 = arith.maximumf %170, %171 : vector<1x94xf32>
    %173 = vector.extract_strided_slice %167 {offsets = [0, 0], sizes = [1, 94], strides = [1, 1]} : vector<1x96xf32> to vector<1x94xf32>
    %174 = vector.extract_strided_slice %167 {offsets = [0, 1], sizes = [1, 94], strides = [1, 1]} : vector<1x96xf32> to vector<1x94xf32>
    %175 = arith.maximumf %173, %174 : vector<1x94xf32>
    %176 = vector.extract_strided_slice %167 {offsets = [0, 2], sizes = [1, 94], strides = [1, 1]} : vector<1x96xf32> to vector<1x94xf32>
    %177 = arith.maximumf %175, %176 : vector<1x94xf32>
    %c0_93 = arith.constant 0 : index
    %c0_94 = arith.constant 0 : index
    %c0_95 = arith.constant 0 : index
    %178 = vector.load %arg15[%c0_93, %c0_94, %c0_95] : memref<2x94x64xbf16, #tpu.memory_space<vmem>>, vector<1x94x64xbf16>
    %179 = vector.shape_cast %178 : vector<1x94x64xbf16> to vector<94x64xbf16>
    %180 = arith.truncf %172 : vector<1x94xf32> to vector<1x94xbf16>
    %cst_96 = arith.constant dense<0.000000e+00> : vector<1x64xf32>
    %181 = tpu.matmul %180, %179, %cst_96 {dimension_numbers = #tpu.dot_dimension_numbers<[1], [0], [0], [1], [0, 0, 1, 1], [], []>} : vector<1x94xbf16>, vector<94x64xbf16>, vector<1x64xf32> -> vector<1x64xf32>
    %c1_97 = arith.constant 1 : index
    %c0_98 = arith.constant 0 : index
    %c0_99 = arith.constant 0 : index
    %182 = vector.load %arg15[%c1_97, %c0_98, %c0_99] : memref<2x94x64xbf16, #tpu.memory_space<vmem>>, vector<1x94x64xbf16>
    %183 = vector.shape_cast %182 : vector<1x94x64xbf16> to vector<94x64xbf16>
    %184 = arith.truncf %177 : vector<1x94xf32> to vector<1x94xbf16>
    %cst_100 = arith.constant dense<0.000000e+00> : vector<1x64xf32>
    %185 = tpu.matmul %184, %183, %cst_100 {dimension_numbers = #tpu.dot_dimension_numbers<[1], [0], [0], [1], [0, 0, 1, 1], [], []>} : vector<1x94xbf16>, vector<94x64xbf16>, vector<1x64xf32> -> vector<1x64xf32>
    %186 = arith.addf %181, %185 : vector<1x64xf32>
    %c0_101 = arith.constant 0 : index
    %c0_102 = arith.constant 0 : index
    %c0_103 = arith.constant 0 : index
    %187 = vector.load %arg2[%c0_101, %c0_102, %c0_103] : memref<1x1x4xf32, #tpu.memory_space<vmem>>, vector<1x1x4xf32>
    %188 = vector.shape_cast %187 : vector<1x1x4xf32> to vector<1x4xf32>
    %c0_104 = arith.constant 0 : index
    %c0_105 = arith.constant 0 : index
    %189 = vector.load %arg16[%c0_104, %c0_105] : memref<4x64xbf16, #tpu.memory_space<vmem>>, vector<4x64xbf16>
    %190 = arith.truncf %188 : vector<1x4xf32> to vector<1x4xbf16>
    %cst_106 = arith.constant dense<0.000000e+00> : vector<1x64xf32>
    %191 = tpu.matmul %190, %189, %cst_106 {dimension_numbers = #tpu.dot_dimension_numbers<[1], [0], [0], [1], [0, 0, 1, 1], [], []>} : vector<1x4xbf16>, vector<4x64xbf16>, vector<1x64xf32> -> vector<1x64xf32>
    %192 = arith.addf %186, %191 : vector<1x64xf32>
    %c0_107 = arith.constant 0 : index
    %c0_108 = arith.constant 0 : index
    %193 = vector.load %arg17[%c0_107, %c0_108] : memref<1x64xf32, #tpu.memory_space<vmem>>, vector<1x64xf32>
    %194 = arith.addf %192, %193 : vector<1x64xf32>
    %cst_109 = arith.constant 0.000000e+00 : f32
    %195 = vector.broadcast %cst_109 : f32 to vector<1x64xf32>
    %196 = arith.maximumf %194, %195 : vector<1x64xf32>
    %c0_110 = arith.constant 0 : index
    %c0_111 = arith.constant 0 : index
    %197 = vector.load %arg18[%c0_110, %c0_111] : memref<64x64xbf16, #tpu.memory_space<vmem>>, vector<64x64xbf16>
    %198 = arith.truncf %196 : vector<1x64xf32> to vector<1x64xbf16>
    %cst_112 = arith.constant dense<0.000000e+00> : vector<1x64xf32>
    %199 = tpu.matmul %198, %197, %cst_112 {dimension_numbers = #tpu.dot_dimension_numbers<[1], [0], [0], [1], [0, 0, 1, 1], [], []>} : vector<1x64xbf16>, vector<64x64xbf16>, vector<1x64xf32> -> vector<1x64xf32>
    %c0_113 = arith.constant 0 : index
    %c0_114 = arith.constant 0 : index
    %200 = vector.load %arg19[%c0_113, %c0_114] : memref<1x64xf32, #tpu.memory_space<vmem>>, vector<1x64xf32>
    %201 = arith.addf %199, %200 : vector<1x64xf32>
    %cst_115 = arith.constant 0.000000e+00 : f32
    %202 = vector.broadcast %cst_115 : f32 to vector<1x64xf32>
    %203 = arith.maximumf %201, %202 : vector<1x64xf32>
    %c0_116 = arith.constant 0 : index
    %c0_117 = arith.constant 0 : index
    %204 = vector.load %arg20[%c0_116, %c0_117] : memref<64x3xbf16, #tpu.memory_space<vmem>>, vector<64x3xbf16>
    %205 = arith.truncf %203 : vector<1x64xf32> to vector<1x64xbf16>
    %cst_118 = arith.constant dense<0.000000e+00> : vector<1x3xf32>
    %206 = tpu.matmul %205, %204, %cst_118 {dimension_numbers = #tpu.dot_dimension_numbers<[1], [0], [0], [1], [0, 0, 1, 1], [], []>} : vector<1x64xbf16>, vector<64x3xbf16>, vector<1x3xf32> -> vector<1x3xf32>
    %c0_119 = arith.constant 0 : index
    %c0_120 = arith.constant 0 : index
    %207 = vector.load %arg21[%c0_119, %c0_120] : memref<1x3xf32, #tpu.memory_space<vmem>>, vector<1x3xf32>
    %208 = arith.addf %206, %207 : vector<1x3xf32>
    %c0_121 = arith.constant 0 : index
    %c0_122 = arith.constant 0 : index
    %c0_123 = arith.constant 0 : index
    %209 = vector.load %arg22[%c0_121, %c0_122, %c0_123] : memref<1x1x3xf32, #tpu.memory_space<vmem>>, vector<1x1x3xf32>
    %210 = vector.shape_cast %209 : vector<1x1x3xf32> to vector<1x3xf32>
    %211 = vector.shape_cast %208 : vector<1x3xf32> to vector<1x1x3xf32>
    tpu.vector_store %arg22[%c0_121, %c0_122, %c0_123], %211 {strides = array<i32>} : memref<1x1x3xf32, #tpu.memory_space<vmem>>, vector<1x1x3xf32>,
    return
  }
  func.func @transform_0(%arg0: i32) -> (i32, i32, i32) {
    %c0_i32 = arith.constant 0 : i32
    %c0_i32_0 = arith.constant 0 : i32
    %c0_i32_1 = arith.constant 0 : i32
    return %arg0, %c0_i32, %c0_i32_0 : i32, i32, i32
  }
  func.func @transform_1(%arg0: i32) -> (i32, i32, i32) {
    %c0_i32 = arith.constant 0 : i32
    %c0_i32_0 = arith.constant 0 : i32
    %c0_i32_1 = arith.constant 0 : i32
    return %arg0, %c0_i32, %c0_i32_0 : i32, i32, i32
  }
  func.func @transform_2(%arg0: i32) -> (i32, i32) {
    %c0_i32 = arith.constant 0 : i32
    %c0_i32_0 = arith.constant 0 : i32
    %c0_i32_1 = arith.constant 0 : i32
    return %c0_i32, %c0_i32_0 : i32, i32
  }
  func.func @transform_3(%arg0: i32) -> (i32, i32) {
    %c0_i32 = arith.constant 0 : i32
    %c0_i32_0 = arith.constant 0 : i32
    %c0_i32_1 = arith.constant 0 : i32
    return %c0_i32, %c0_i32_0 : i32, i32
  }
  func.func @transform_4(%arg0: i32) -> (i32, i32, i32) {
    %c0_i32 = arith.constant 0 : i32
    %c0_i32_0 = arith.constant 0 : i32
    %c0_i32_1 = arith.constant 0 : i32
    %c0_i32_2 = arith.constant 0 : i32
    return %c0_i32, %c0_i32_0, %c0_i32_1 : i32, i32, i32
  }
  func.func @transform_5(%arg0: i32) -> (i32, i32) {
    %c0_i32 = arith.constant 0 : i32
    %c0_i32_0 = arith.constant 0 : i32
    %c0_i32_1 = arith.constant 0 : i32
    return %c0_i32, %c0_i32_0 : i32, i32
  }
  func.func @transform_6(%arg0: i32) -> (i32, i32, i32) {
    %c0_i32 = arith.constant 0 : i32
    %c0_i32_0 = arith.constant 0 : i32
    %c0_i32_1 = arith.constant 0 : i32
    %c0_i32_2 = arith.constant 0 : i32
    return %c0_i32, %c0_i32_0, %c0_i32_1 : i32, i32, i32
  }
  func.func @transform_7(%arg0: i32) -> (i32, i32) {
    %c0_i32 = arith.constant 0 : i32
    %c0_i32_0 = arith.constant 0 : i32
    %c0_i32_1 = arith.constant 0 : i32
    return %c0_i32, %c0_i32_0 : i32, i32
  }
  func.func @transform_8(%arg0: i32) -> (i32, i32) {
    %c0_i32 = arith.constant 0 : i32
    %c0_i32_0 = arith.constant 0 : i32
    %c0_i32_1 = arith.constant 0 : i32
    return %c0_i32, %c0_i32_0 : i32, i32
  }
  func.func @transform_9(%arg0: i32) -> (i32, i32) {
    %c0_i32 = arith.constant 0 : i32
    %c0_i32_0 = arith.constant 0 : i32
    %c0_i32_1 = arith.constant 0 : i32
    return %c0_i32, %c0_i32_0 : i32, i32
  }
  func.func @transform_10(%arg0: i32) -> (i32, i32, i32) {
    %c0_i32 = arith.constant 0 : i32
    %c0_i32_0 = arith.constant 0 : i32
    %c0_i32_1 = arith.constant 0 : i32
    %c0_i32_2 = arith.constant 0 : i32
    return %c0_i32, %c0_i32_0, %c0_i32_1 : i32, i32, i32
  }
  func.func @transform_11(%arg0: i32) -> (i32, i32) {
    %c0_i32 = arith.constant 0 : i32
    %c0_i32_0 = arith.constant 0 : i32
    %c0_i32_1 = arith.constant 0 : i32
    return %c0_i32, %c0_i32_0 : i32, i32
  }
  func.func @transform_12(%arg0: i32) -> (i32, i32, i32) {
    %c0_i32 = arith.constant 0 : i32
    %c0_i32_0 = arith.constant 0 : i32
    %c0_i32_1 = arith.constant 0 : i32
    %c0_i32_2 = arith.constant 0 : i32
    return %c0_i32, %c0_i32_0, %c0_i32_1 : i32, i32, i32
  }
  func.func @transform_13(%arg0: i32) -> (i32, i32) {
    %c0_i32 = arith.constant 0 : i32
    %c0_i32_0 = arith.constant 0 : i32
    %c0_i32_1 = arith.constant 0 : i32
    return %c0_i32, %c0_i32_0 : i32, i32
  }
  func.func @transform_14(%arg0: i32) -> (i32, i32, i32) {
    %c0_i32 = arith.constant 0 : i32
    %c0_i32_0 = arith.constant 0 : i32
    %c0_i32_1 = arith.constant 0 : i32
    %c0_i32_2 = arith.constant 0 : i32
    return %c0_i32, %c0_i32_0, %c0_i32_1 : i32, i32, i32
  }
  func.func @transform_15(%arg0: i32) -> (i32, i32) {
    %c0_i32 = arith.constant 0 : i32
    %c0_i32_0 = arith.constant 0 : i32
    %c0_i32_1 = arith.constant 0 : i32
    return %c0_i32, %c0_i32_0 : i32, i32
  }
  func.func @transform_16(%arg0: i32) -> (i32, i32) {
    %c0_i32 = arith.constant 0 : i32
    %c0_i32_0 = arith.constant 0 : i32
    %c0_i32_1 = arith.constant 0 : i32
    return %c0_i32, %c0_i32_0 : i32, i32
  }
  func.func @transform_17(%arg0: i32) -> (i32, i32) {
    %c0_i32 = arith.constant 0 : i32
    %c0_i32_0 = arith.constant 0 : i32
    %c0_i32_1 = arith.constant 0 : i32
    return %c0_i32, %c0_i32_0 : i32, i32
  }
  func.func @transform_18(%arg0: i32) -> (i32, i32) {
    %c0_i32 = arith.constant 0 : i32
    %c0_i32_0 = arith.constant 0 : i32
    %c0_i32_1 = arith.constant 0 : i32
    return %c0_i32, %c0_i32_0 : i32, i32
  }
  func.func @transform_19(%arg0: i32) -> (i32, i32) {
    %c0_i32 = arith.constant 0 : i32
    %c0_i32_0 = arith.constant 0 : i32
    %c0_i32_1 = arith.constant 0 : i32
    return %c0_i32, %c0_i32_0 : i32, i32
  }
  func.func @transform_20(%arg0: i32) -> (i32, i32) {
    %c0_i32 = arith.constant 0 : i32
    %c0_i32_0 = arith.constant 0 : i32
    %c0_i32_1 = arith.constant 0 : i32
    return %c0_i32, %c0_i32_0 : i32, i32
  }
  func.func @transform_21(%arg0: i32) -> (i32, i32, i32) {
    %c0_i32 = arith.constant 0 : i32
    %c0_i32_0 = arith.constant 0 : i32
    %c0_i32_1 = arith.constant 0 : i32
    return %arg0, %c0_i32, %c0_i32_0 : i32, i32, i32
  }
}

</mosaic_0001>

<bundles_post_ra>
// kernel: dqn_forward.1
= control target key start
LH: loop header
LB: loop body
LE: loop exit
PB: predicated region body
PF: predicated region fallthrough
CT: control target
= control target key end

     0   :  { %s11730_s0 = inlined_call_operand.vmem [shape: f32[2,132,396], index: 0, kind: input, shape index: {}]   ;;  %s11731_s1 = inlined_call_operand.vmem [shape: f32[2,1,4], index: 1, kind: input, shape index: {}]   ;;  %s11732_s2 = inlined_call_operand.vmem [shape: bf16[44,130], index: 2, kind: input, shape index: {}]   ;;  %s11733_s3 = inlined_call_operand.vmem [shape: bf16[394,132], index: 3, kind: input, shape index: {}]   ;;  %s11734_s4 = inlined_call_operand.vmem [shape: bf16[5,132,160], index: 4, kind: input, shape index: {}]   ;;  %s11735_s5 = inlined_call_operand.vmem [shape: f32[1,160], index: 5, kind: input, shape index: {}]   ;;  %s11736_s6 = inlined_call_operand.vmem [shape: bf16[5,160,288], index: 6, kind: input, shape index: {}]   ;;  %s11737_s7 = inlined_call_operand.vmem [shape: f32[1,288], index: 7, kind: input, shape index: {}]   ;;  %s11738_s8 = inlined_call_operand.vmem [shape: bf16[12,34], index: 8, kind: input, shape index: {}]   ;;  %s11739_s9 = inlined_call_operand.vmem [shape: bf16[286,96], index: 9, kind: input, shape index: {}]   ;;  %s11740_s10 = inlined_call_operand.vmem [shape: bf16[4,96,72], index: 10, kind: input, shape index: {}]   ;;  %s11741_s11 = inlined_call_operand.vmem [shape: f32[1,72], index: 11, kind: input, shape index: {}]   ;;  %s11742_s12 = inlined_call_operand.vmem [shape: bf16[4,72,96], index: 12, kind: input, shape index: {}]   ;;  %s11743_s13 = inlined_call_operand.vmem [shape: f32[1,96], index: 13, kind: input, shape index: {}]   ;;  %s11744_s14 = inlined_call_operand.vmem [shape: bf16[2,94,64], index: 14, kind: input, shape index: {}]   ;;  %s11745_s15 = inlined_call_operand.vmem [shape: bf16[4,64], index: 15, kind: input, shape index: {}]   ;;  %s11746_s16 = inlined_call_operand.vmem [shape: f32[1,64], index: 16, kind: input, shape index: {}]   ;;  %s11747_s17 = inlined_call_operand.vmem [shape: bf16[64,64], index: 17, kind: input, shape index: {}]   ;;  %s11748_s18 = inlined_call_operand.vmem [shape: f32[1,64], index: 18, kind: input, shape index: {}]   ;;  %s11749_s19 = inlined_call_operand.vmem [shape: bf16[64,3], index: 19, kind: input, shape index: {}]   ;;  %s11750_s20 = inlined_call_operand.vmem [shape: f32[1,3], index: 20, kind: input, shape index: {}]   ;;  %s11751_s21 = inlined_call_operand.hbm [shape: f32[2,1,3], index: 21, kind: output, shape index: {}]  }
   0x1   :  { %11767 = sst [smem:[#allocation11_spill]] %s11730_s0 }
   0x2   :  { %11768 = sst [smem:[#allocation12_spill]] %s11731_s1 }
   0x3   :  { %11769 = sst [smem:[#allocation13_spill]] %s11732_s2 }
   0x4   :  { %11770 = sst [smem:[#allocation14_spill]] %s11733_s3 }
   0x5   :  { %11771 = sst [smem:[#allocation15_spill]] %s11734_s4 }
   0x6   :  { %11772 = sst [smem:[#allocation16_spill]] %s11735_s5 }
   0x7   :  { %11773 = sst [smem:[#allocation17_spill]] %s11736_s6 }
   0x8   :  { %11774 = sst [smem:[#allocation18_spill]] %s11751_s21 }
   0x9   :  { %26 = vsyncpa [#allocation3], 0 }
   0xa   :  { %28 = vsyncpa [#allocation3 + $0x1], 0  ;;  %s8926_s2 = smov 0   ;;  %s8928_s25 = smov 0  }
   0xb   :  { %s8930_s26 = smov 0   ;;  %s8932_s27 = smov 0  }
   0xc LB: > { %11775 = sst [smem:[#allocation5_spill]] %s8796_s2  ;;  %s8947_s3 = sadd.s32 4294967295, %s8808_s27   ;;  %s8808_s27 = sphi %s8932_s27, %s11797_s27   ;;  %s8804_s26 = sphi %s8930_s26, %s11799_s26   ;;  %s8800_s25 = sphi %s8928_s25, %s11801_s25   ;;  %s8796_s2 = sphi %s8926_s2, %s11800_s2  }
   0xd   : > { %11776 = sst [smem:[#allocation6_spill]] %s8804_s26  ;;  %s6974_s28 = sadd.s32 4294967294, %s8808_s27  }
   0xe   : > { %11777 = sst [smem:[#allocation7_spill]] %s8808_s27  ;;  %s8951_s29 = sadd.s32 1, %s8808_s27  }
   0xf   : > { %11778 = sst [smem:[#allocation8_spill]] %s8951_s29  ;;  %s492_s0 = sadd.s32 1, %s8804_s26 }
  0x10   : > { %s489_s4 = ssub.s32 %s8808_s27, %s8951_s29  ;;  %p502_p0 = scmp.ne.s32.totalorder %s8804_s26, %s8800_s25 }
  0x11   : > { %p490_p1 = scmp.eq.s32.totalorder %s489_s4, 0  ;;  %p503_p2 = scmp.eq.s32.totalorder %s8947_s3, 1 }
  0x12   : > { %p508_p3 = scmp.ne.s32.totalorder %s8800_s25, %s8796_s2  ;;  %p509_p4 = scmp.eq.s32.totalorder %s6974_s28, 1 }
  0x13   : > { %s8962_s30 = scalar_select %p490_p1, %s8804_s26, %s492_s0  }
  0x14   : > { %p8964_p5 = por %p503_p2, %p502_p0  ;;  %p8968_p6 = por %p509_p4, %p508_p3 }
  0x15   : > { %11779 = sst [smem:[#allocation9_spill]] %s8962_s30  ;;  %p6977_p7 = scmp.ge.s32.totalorder %s8808_s27, 1 }
  0x16   : > { %s11781_s22 = scalar_select %p8968_p6, 1, 0 }
  0x17   : > { %p598_p8 = scmp.lt.s32.totalorder %s8808_s27, 3 }
  0x18   : > { %11782 = sst [smem:[#allocation10_spill]] %s11781_s22 }
  0x19   : > { %p599_p9 = pnand %p6977_p7, %p598_p8 }
  0x1a   : > { %p660_p10 = scmp.lt.s32.totalorder (!%p599_p9), %s8947_s3, 1  ;;  %s11783_s24 = sld [smem:[#allocation13_spill]] (!%p599_p9) }
  0x1b   : > { %602 = sbr.rel (%p599_p9) target bundleno = 3148 (0xc4c), region = 104  ;;  %s11784_s26 = sld [smem:[#allocation11_spill]] (!%p599_p9) }
  0x1c   : > { %s11785_s1 = sld [smem:[#allocation14_spill]] (!%p599_p9)  ;;  %s11762_s21 = smov (!%p599_p9), 127  }
  0x1d   : > { %s11764_s30 = smov (!%p599_p9), 126   ;;  %s11788_s6 = sld [smem:[#allocation17_spill]] (!%p599_p9) }
  0x1e   : > { %s11789_s27 = sld [smem:[#allocation16_spill]] (!%p599_p9) }
  0x1f   : > { %s11792_s22 = sld [smem:[#allocation12_spill]] (!%p599_p9) }
  0x20   : > { %v8249_v0 = vld [vmem:[%s11783_s24 + $0x4] ss:$8 sps:$4 sm:$0xff]   ;;  %vm1412_vm0 = vcmask 15360   ;;  %s8979_s28 = scalar_select %p660_p10, %s8947_s3, 1  ;;  %vm805_vm1 = vcmask 1046528   ;;  %vm1074_vm2 = vcmask 1045504  }
  0x21   : > { %6986 = vmatprep.mubr.msk.bf16.mxu0 %vm1412_vm0, %v8249_v0  ;;  %6990 = vmatprep.mubr.msk.bf16.mxu1 %vm1412_vm0, %v8249_v0  ;;  %vm1422_vm3 = vcmask 1040384   ;;  %vm2135_vm4 = vcmask 1044480   ;;  %vm1633_vm5 = vcmask 1039360   ;;  %vm1748_vm6 = vcmask 1031168   ;;  %s11793_s4 = sld [smem:[#allocation18_spill]] }
  0x22   : > { %s8052_s0 = smul.u32 544, %s8979_s28  ;;  %vm2125_vm7 = vcmask 80896   ;;  %vm2456_vm8 = vcmask 1041408   ;;  %vm2446_vm9 = vcmask 31744   ;;  %vm2311_vm10 = vsmask.f32 7424 }
  0x23   : > { %vm2910_vm11 = vsmask.f32 6400  ;;  %vm3638_vm12 = vcmask 261120   ;;  %vm8814_vm13 = vmmov 0   ;;  %vm5323_vm14 = vcmask 277504  }
  0x24   : > { %s8987_s29 = scalar_lea.vmem %s11784_s26, %s8052_s0  ;;  %s11786_s26 = sld [smem:[#allocation15_spill]]  ;;  %vm5628_vm15 = vcmask 244736  }
  0x25   : > { %v8990_v1 = vld [vmem:[%s8987_s29 + $0x1c8] sm:$0xff]  ;;  %v9000_v8 = vld [vmem:[%s8987_s29 + $0x1d8] sm:$0xff]  ;;  %v9024_v23 = vld [vmem:[%s8987_s29 + $0x1c0] sm:$0xff]  ;;  %s667_s23 = scalar_lea.vmem %s11792_s22, %s8979_s28  ;;  %s658_s22 = sand.u32 1, %s8800_s25  }
  0x26   : > { %v730_v2 = vld [vmem:[%s8987_s29 + $0x1e8] sm:$0xff]  ;;  %v916_v4 = vrot.slane %v8990_v1, 1  ;;  %v1185_v7 = vrot.slane %v8990_v1, 2  ;;  %v732_v9 = vld [vmem:[%s8987_s29 + $0x1f8] sm:$0xff]  ;;  %v920_v13 = vrot.slane %v9000_v8, 1  ;;  %v1189_v18 = vrot.slane %v9000_v8, 2 }
  0x27   : > { %v8994_v3 = vld [vmem:[%s8987_s29 + $0x208] sm:$0xf]  ;;  %v924_v5 = vrot.slane %v730_v2, 1  ;;  %v1193_v10 = vrot.slane %v730_v2, 2  ;;  %v9005_v12 = vld [vmem:[%s8987_s29 + $0x218] sm:$0xf] }
  0x28   : > { %v932_v6 = vrot.slane %v8994_v3, 1  ;;  %v1201_v11 = vrot.slane %v8994_v3, 2  ;;  %v928_v14 = vrot.slane %v732_v9, 1  ;;  %v936_v17 = vrot.slane %v9005_v12, 1  ;;  %v729_v24 = vld [vmem:[%s8987_s29 + $0x1e0] sm:$0xff]  ;;  %v9046_v38 = vld [vmem:[%s8987_s29 + $0x1d0] sm:$0xff] }
  0x29   : > { %v925_v15 = vsel %vm805_vm1, %v916_v4, %v924_v5  ;;  %v1194_v21 = vsel %vm1074_vm2, %v1185_v7, %v1193_v10  ;;  %v1197_v27 = vrot.slane %v732_v9, 2  ;;  %v1205_v28 = vrot.slane %v9005_v12, 2  ;;  %v9035_v29 = vld [vmem:[%s8987_s29 + $0x200] sm:$0xf]  ;;  %v731_v43 = vld [vmem:[%s8987_s29 + $0x1f0] sm:$0xff]  ;;  %v9064_v53 = vld [vmem:[%s8987_s29 + $0x188] sm:$0xff] }
  0x2a   : > { %v933_v16 = vsel %vm805_vm1, %v924_v5, %v932_v6  ;;  %v1063_v19 = vmax.f32 %v8990_v1, %v925_v15  ;;  %v1202_v22 = vsel %vm1074_vm2, %v1193_v10, %v1201_v11  ;;  %v929_v25 = vsel %vm805_vm1, %v920_v13, %v928_v14  ;;  %v9056_v48 = vld [vmem:[%s8987_s29 + $0x210] sm:$0xf]  ;;  %v722_v58 = vld [vmem:[%s8987_s29 + $0x1a8] sm:$0xff]  ;;  %s659_s28 = scalar_lea.vmem [#allocation2], %s658_s22 }
  0x2b   : > { %v1067_v20 = vmax.f32 %v730_v2, %v933_v16  ;;  %v937_v26 = vsel %vm805_vm1, %v928_v14, %v936_v17  ;;  %v1065_v32 = vmax.f32 %v9000_v8, %v929_v25  ;;  %v1198_v34 = vsel %vm1074_vm2, %v1189_v18, %v1197_v27  ;;  %v9088_v16 = vld [vmem:[%s8987_s29 + $0x198] sm:$0xff]  ;;  %s6910_s0 = sshll.u32 %s659_s28, 4  ;;  %s11691_s0 = int_to_ptr.vmem [resolvable:$true] %s6910_s0 }
  0x2c   : > { %v1332_v30 = vmax.f32 %v1063_v19, %v1194_v21  ;;  %v1069_v33 = vmax.f32 %v732_v9, %v937_v26  ;;  %v1206_v35 = vsel %vm1074_vm2, %v1197_v27, %v1205_v28  ;;  %v914_v36 = vrot.slane %v9024_v23, 1 }
  0x2d   : > { %v1336_v31 = vmax.f32 %v1067_v20, %v1202_v22  ;;  %v922_v37 = vrot.slane %v729_v24, 1  ;;  %v1334_v40 = vmax.f32 %v1065_v32, %v1198_v34  ;;  %v930_v42 = vrot.slane %v9035_v29, 1 }
  0x2e   : > { %v1338_v41 = vmax.f32 %v1069_v33, %v1206_v35  ;;  %v1183_v45 = vrot.slane %v9024_v23, 2  ;;  %v1191_v46 = vrot.slane %v729_v24, 2  ;;  %v1199_v47 = vrot.slane %v9035_v29, 2  ;;  %v9104_v35 = vld [vmem:[%s8987_s29 + $0x180] sm:$0xff] }
  0x2f   : > { %v1378_v39 = vpack.c.bf16 %v1336_v31, %v1332_v30  ;;  %v923_v44 = vsel %vm805_vm1, %v914_v36, %v922_v37  ;;  %v931_v50 = vsel %vm805_vm1, %v922_v37, %v930_v42  ;;  %v918_v52 = vrot.slane %v9046_v38, 1  ;;  %v721_v37 = vld [vmem:[%s8987_s29 + $0x1a0] sm:$0xff] }
  0x30   : > { %v1380_v49 = vpack.c.bf16 %v1338_v41, %v1334_v40  ;;  %v1062_v51 = vmax.f32 %v9024_v23, %v923_v44  ;;  %v1066_v54 = vmax.f32 %v729_v24, %v931_v50  ;;  %v1192_v55 = vsel %vm1074_vm2, %v1183_v45, %v1191_v46  ;;  %v724_v24 = vld [vmem:[%s8987_s29 + $0x1b8] sm:$0xff]  ;;  %v713_v23 = vld [vmem:[%s8987_s29 + $0x160] sm:$0xff] }
  0x31   : > { %1435 = vmatprep.subr.bf16.mxu0 %v1378_v39  ;;  %v1200_v56 = vsel %vm1074_vm2, %v1191_v46, %v1199_v47  ;;  %v926_v57 = vrot.slane %v731_v43, 1  ;;  %v934_v60 = vrot.slane %v9056_v48, 1  ;;  %v1187_v61 = vrot.slane %v9046_v38, 2 }
  0x32   : > { %1498 = vmatprep.subr.bf16.mxu1 %v1380_v49  ;;  %v1331_v59 = vmax.f32 %v1062_v51, %v1192_v55  ;;  %v1195_v62 = vrot.slane %v731_v43, 2  ;;  %v1335_v63 = vmax.f32 %v1066_v54, %v1200_v56  ;;  %v1203_v2 = vrot.slane %v9056_v48, 2  ;;  %v8252_v48 = vld [vmem:[%s11783_s24 + $0x10] ss:$8 sps:$4 sm:$0xff]  }
  0x33   : > { %v927_v0 = vsel %vm805_vm1, %v918_v52, %v926_v57  ;;  %v900_v5 = vrot.slane %v9064_v53, 1  ;;  %v935_v9 = vsel %vm805_vm1, %v926_v57, %v934_v60  ;;  %v908_v15 = vrot.slane %v722_v58, 1 }
  0x34   : > { %v1064_v10 = vmax.f32 %v9046_v38, %v927_v0  ;;  %v1196_v14 = vsel %vm1074_vm2, %v1187_v61, %v1195_v62  ;;  %v1377_v19 = vpack.c.bf16 %v1335_v63, %v1331_v59  ;;  %v1068_v20 = vmax.f32 %v731_v43, %v935_v9  ;;  %v723_v59 = vld [vmem:[%s8987_s29 + $0x1b0] sm:$0xff]  ;;  %v9140_v9 = vld [vmem:[%s8987_s29 + $0x148] sm:$0xff] }
  0x35   : > { %v1204_v21 = vsel %vm1074_vm2, %v1195_v62, %v1203_v2  ;;  %v1169_v22 = vrot.slane %v9064_v53, 2  ;;  %v909_v26 = vsel %vm805_vm1, %v900_v5, %v908_v15  ;;  %v917_v27 = vsel %vm805_vm1, %v908_v15, %v916_v4 }
  0x36   : > { %v1333_v25 = vmax.f32 %v1064_v10, %v1196_v14  ;;  %v1177_v30 = vrot.slane %v722_v58, 2  ;;  %1436 = vmatpush1.bf16.msra.mxu0 %v1377_v19  ;;  %v1337_v31 = vmax.f32 %v1068_v20, %v1204_v21  ;;  %v1055_v32 = vmax.f32 %v9064_v53, %v909_v26  ;;  %v714_v10 = vld [vmem:[%s8987_s29 + $0x168] sm:$0xff] }
  0x37   : > { %v1059_v33 = vmax.f32 %v722_v58, %v917_v27  ;;  %v904_v34 = vrot.slane %v9088_v16, 1  ;;  %v912_v4 = vrot.slane %v724_v24, 1  ;;  %v1173_v41 = vrot.slane %v9088_v16, 2  ;;  %v9126_v58 = vld [vmem:[%s8987_s29 + $0x190] sm:$0xff]  ;;  %v9202_v53 = vld [vmem:[%s8987_s29 + $0x108] sm:$0xff] }
  0x38   : > { %v1178_v39 = vsel %vm1074_vm2, %v1169_v22, %v1177_v30  ;;  %v1186_v40 = vsel %vm1074_vm2, %v1177_v30, %v1185_v7  ;;  %v1379_v43 = vpack.c.bf16 %v1337_v31, %v1333_v25  ;;  %v1181_v49 = vrot.slane %v724_v24, 2  ;;  %v9148_v30 = vld [vmem:[%s8987_s29 + $0x158] sm:$0xff] }
  0x39   : > { %v1324_v44 = vmax.f32 %v1055_v32, %v1178_v39  ;;  %v1328_v46 = vmax.f32 %v1059_v33, %v1186_v40  ;;  %v913_v50 = vsel %vm805_vm1, %v904_v34, %v912_v4  ;;  %v921_v1 = vsel %vm805_vm1, %v912_v4, %v920_v13  ;;  %v716_v39 = vld [vmem:[%s8987_s29 + $0x178] sm:$0xff] }
  0x3a   : > { %v898_v7 = vrot.slane %v9104_v35, 1  ;;  %v906_v51 = vrot.slane %v721_v37, 1  ;;  %1499 = vmatpush1.bf16.msra.mxu1 %v1379_v43  ;;  %v1057_v55 = vmax.f32 %v9088_v16, %v913_v50  ;;  %v1061_v56 = vmax.f32 %v724_v24, %v921_v1 }
  0x3b   : > { %v1374_v54 = vpack.c.bf16 %v1328_v46, %v1324_v44  ;;  %v1182_v57 = vsel %vm1074_vm2, %v1173_v41, %v1181_v49  ;;  %v1190_v62 = vsel %vm1074_vm2, %v1181_v49, %v1189_v18  ;;  %v1167_v0 = vrot.slane %v9104_v35, 2  ;;  %v9165_v46 = vld [vmem:[%s8987_s29 + $0x140] sm:$0xff] }
  0x3c   : > { %v907_v13 = vsel %vm805_vm1, %v898_v7, %v906_v51  ;;  %v915_v63 = vsel %vm805_vm1, %v906_v51, %v914_v36  ;;  %v1326_v14 = vmax.f32 %v1057_v55, %v1182_v57  ;;  %v1330_v15 = vmax.f32 %v1061_v56, %v1190_v62 }
  0x3d   : > { %1437 = vmatprep.subr.bf16.mxu0 %v1374_v54  ;;  %v1054_v8 = vmax.f32 %v9104_v35, %v907_v13  ;;  %v1058_v18 = vmax.f32 %v721_v37, %v915_v63  ;;  %v1175_v19 = vrot.slane %v721_v37, 2  ;;  %v902_v20 = vrot.slane %v9126_v58, 1  ;;  %v705_v35 = vld [vmem:[%s8987_s29 + $0x120] sm:$0xff] }
  0x3e   : > { %v910_v21 = vrot.slane %v723_v59, 1  ;;  %v1171_v24 = vrot.slane %v9126_v58, 2  ;;  %v1376_v36 = vpack.c.bf16 %v1330_v15, %v1326_v14  ;;  %v1179_v25 = vrot.slane %v723_v59, 2 }
  0x3f   : > { %v884_v26 = vrot.slane %v9140_v9, 1  ;;  %v892_v27 = vrot.slane %v714_v10, 1  ;;  %v1176_v31 = vsel %vm1074_vm2, %v1167_v0, %v1175_v19  ;;  %v1184_v32 = vsel %vm1074_vm2, %v1175_v19, %v1183_v45 }
  0x40   : > { %v911_v33 = vsel %vm805_vm1, %v902_v20, %v910_v21  ;;  %v919_v37 = vsel %vm805_vm1, %v910_v21, %v918_v52  ;;  %1500 = vmatprep.subr.bf16.mxu1 %v1376_v36  ;;  %v1323_v40 = vmax.f32 %v1054_v8, %v1176_v31  ;;  %v1327_v4 = vmax.f32 %v1058_v18, %v1184_v32  ;;  %v9192_v8 = vld [vmem:[%s8987_s29 + $0x150] sm:$0xff] }
  0x41   : > { %v1056_v43 = vmax.f32 %v9126_v58, %v911_v33  ;;  %v1060_v44 = vmax.f32 %v723_v59, %v919_v37  ;;  %v1180_v45 = vsel %vm1074_vm2, %v1171_v24, %v1179_v25  ;;  %v1188_v49 = vsel %vm1074_vm2, %v1179_v25, %v1187_v61  ;;  %v715_v18 = vld [vmem:[%s8987_s29 + $0x170] sm:$0xff] }
  0x42   : > { %v893_v52 = vsel %vm805_vm1, %v884_v26, %v892_v27  ;;  %v901_v50 = vsel %vm805_vm1, %v892_v27, %v900_v5  ;;  %v1373_v1 = vpack.c.bf16 %v1327_v4, %v1323_v40  ;;  %v1153_v38 = vrot.slane %v9140_v9, 2 }
  0x43   : > { %v1325_v51 = vmax.f32 %v1056_v43, %v1180_v45  ;;  %v1329_v54 = vmax.f32 %v1060_v44, %v1188_v49  ;;  %v1047_v55 = vmax.f32 %v9140_v9, %v893_v52  ;;  %v1051_v56 = vmax.f32 %v714_v10, %v901_v50  ;;  %v9278_v9 = vld [vmem:[%s8987_s29 + $0xc8] sm:$0xff] }
  0x44   : > { %v1161_v57 = vrot.slane %v714_v10, 2  ;;  %v888_v61 = vrot.slane %v9148_v30, 1  ;;  %1438 = vmatpush1.bf16.msra.mxu0 %v1373_v1  ;;  %v896_v62 = vrot.slane %v716_v39, 1  ;;  %v1157_v5 = vrot.slane %v9148_v30, 2 }
  0x45   : > { %v1375_v59 = vpack.c.bf16 %v1329_v54, %v1325_v51  ;;  %v1165_v13 = vrot.slane %v716_v39, 2  ;;  %v882_v10 = vrot.slane %v9165_v46, 1  ;;  %v890_v15 = vrot.slane %v713_v23, 1  ;;  %v9224_v54 = vld [vmem:[%s8987_s29 + $0x118] sm:$0xff] }
  0x46   : > { %v1162_v63 = vsel %vm1074_vm2, %v1153_v38, %v1161_v57  ;;  %v1170_v14 = vsel %vm1074_vm2, %v1161_v57, %v1169_v22  ;;  %v897_v36 = vsel %vm805_vm1, %v888_v61, %v896_v62  ;;  %v905_v25 = vsel %vm805_vm1, %v896_v62, %v904_v34  ;;  %v706_v22 = vld [vmem:[%s8987_s29 + $0x128] sm:$0xff] }
  0x47   : > { %1501 = vmatpush1.bf16.msra.mxu1 %v1375_v59  ;;  %v1316_v19 = vmax.f32 %v1047_v55, %v1162_v63  ;;  %v1320_v21 = vmax.f32 %v1051_v56, %v1170_v14  ;;  %v1049_v27 = vmax.f32 %v9148_v30, %v897_v36  ;;  %v1053_v31 = vmax.f32 %v716_v39, %v905_v25  ;;  %v708_v59 = vld [vmem:[%s8987_s29 + $0x138] sm:$0xff] }
  0x48   : > { %v1166_v32 = vsel %vm1074_vm2, %v1157_v5, %v1165_v13  ;;  %v1174_v33 = vsel %vm1074_vm2, %v1165_v13, %v1173_v41  ;;  %v891_v40 = vsel %vm805_vm1, %v882_v10, %v890_v15  ;;  %v899_v34 = vsel %vm805_vm1, %v890_v15, %v898_v7  ;;  %v9241_v15 = vld [vmem:[%s8987_s29 + $0x100] sm:$0xff] }
  0x49   : > { %v1370_v37 = vpack.c.bf16 %v1320_v21, %v1316_v19  ;;  %v1151_v39 = vrot.slane %v9165_v46, 2  ;;  %v1318_v4 = vmax.f32 %v1049_v27, %v1166_v32  ;;  %v1322_v43 = vmax.f32 %v1053_v31, %v1174_v33 }
  0x4a   : > { %v1046_v44 = vmax.f32 %v9165_v46, %v891_v40  ;;  %v1050_v16 = vmax.f32 %v713_v23, %v899_v34  ;;  %v1159_v41 = vrot.slane %v713_v23, 2  ;;  %v886_v45 = vrot.slane %v9192_v8, 1  ;;  %v697_v46 = vld [vmem:[%s8987_s29 + $0xe0] sm:$0xff] }
  0x4b   : > { %1439 = vmatprep.subr.bf16.mxu0 %v1370_v37  ;;  %v894_v49 = vrot.slane %v715_v18, 1  ;;  %v1155_v52 = vrot.slane %v9192_v8, 2  ;;  %v1372_v50 = vpack.c.bf16 %v1322_v43, %v1318_v4  ;;  %v1163_v1 = vrot.slane %v715_v18, 2 }
  0x4c   : > { %v868_v7 = vrot.slane %v9202_v53, 1  ;;  %v876_v51 = vrot.slane %v706_v22, 1  ;;  %v1160_v55 = vsel %vm1074_vm2, %v1151_v39, %v1159_v41  ;;  %v1168_v23 = vsel %vm1074_vm2, %v1159_v41, %v1167_v0 }
  0x4d   : > { %v895_v56 = vsel %vm805_vm1, %v886_v45, %v894_v49  ;;  %v903_v57 = vsel %vm805_vm1, %v894_v49, %v902_v20  ;;  %1502 = vmatprep.subr.bf16.mxu1 %v1372_v50  ;;  %v1315_v62 = vmax.f32 %v1046_v44, %v1160_v55  ;;  %v1319_v13 = vmax.f32 %v1050_v16, %v1168_v23  ;;  %v9268_v44 = vld [vmem:[%s8987_s29 + $0x110] sm:$0xff] }
  0x4e   : > { %v1048_v63 = vmax.f32 %v9192_v8, %v895_v56  ;;  %v1052_v14 = vmax.f32 %v715_v18, %v903_v57  ;;  %v1164_v0 = vsel %vm1074_vm2, %v1155_v52, %v1163_v1  ;;  %v1172_v19 = vsel %vm1074_vm2, %v1163_v1, %v1171_v24  ;;  %v707_v16 = vld [vmem:[%s8987_s29 + $0x130] sm:$0xff] }
  0x4f   : > { %v877_v20 = vsel %vm805_vm1, %v868_v7, %v876_v51  ;;  %v885_v21 = vsel %vm805_vm1, %v876_v51, %v884_v26  ;;  %v1369_v18 = vpack.c.bf16 %v1319_v13, %v1315_v62  ;;  %v1137_v58 = vrot.slane %v9202_v53, 2 }
  0x50   : > { %v1317_v36 = vmax.f32 %v1048_v63, %v1164_v0  ;;  %v1321_v25 = vmax.f32 %v1052_v14, %v1172_v19  ;;  %v1039_v27 = vmax.f32 %v9202_v53, %v877_v20  ;;  %v1043_v31 = vmax.f32 %v706_v22, %v885_v21  ;;  %v9354_v53 = vld [vmem:[%s8987_s29 + $0x88] sm:$0xff] }
  0x51   : > { %v1145_v32 = vrot.slane %v706_v22, 2  ;;  %v872_v24 = vrot.slane %v9224_v54, 1  ;;  %1440 = vmatpush1.bf16.msra.mxu0 %v1369_v18  ;;  %v880_v37 = vrot.slane %v708_v59, 1  ;;  %v1141_v26 = vrot.slane %v9224_v54, 2 }
  0x52   : > { %v1371_v33 = vpack.c.bf16 %v1321_v25, %v1317_v36  ;;  %v1149_v40 = vrot.slane %v708_v59, 2  ;;  %v866_v22 = vrot.slane %v9241_v15, 1  ;;  %v874_v43 = vrot.slane %v705_v35, 1  ;;  %v9300_v25 = vld [vmem:[%s8987_s29 + $0xd8] sm:$0xff] }
  0x53   : > { %v1146_v34 = vsel %vm1074_vm2, %v1137_v58, %v1145_v32  ;;  %v1154_v4 = vsel %vm1074_vm2, %v1145_v32, %v1153_v38  ;;  %v881_v50 = vsel %vm805_vm1, %v872_v24, %v880_v37  ;;  %v889_v1 = vsel %vm805_vm1, %v880_v37, %v888_v61  ;;  %v698_v38 = vld [vmem:[%s8987_s29 + $0xe8] sm:$0xff] }
  0x54   : > { %1503 = vmatpush1.bf16.msra.mxu1 %v1371_v33  ;;  %v1308_v41 = vmax.f32 %v1039_v27, %v1146_v34  ;;  %v1312_v49 = vmax.f32 %v1043_v31, %v1154_v4  ;;  %v1041_v51 = vmax.f32 %v9224_v54, %v881_v50  ;;  %v1045_v55 = vmax.f32 %v708_v59, %v889_v1  ;;  %v700_v33 = vld [vmem:[%s8987_s29 + $0xf8] sm:$0xff] }
  0x55   : > { %v1150_v23 = vsel %vm1074_vm2, %v1141_v26, %v1149_v40  ;;  %v1158_v56 = vsel %vm1074_vm2, %v1149_v40, %v1157_v5  ;;  %v875_v62 = vsel %vm805_vm1, %v866_v22, %v874_v43  ;;  %v883_v61 = vsel %vm805_vm1, %v874_v43, %v882_v10  ;;  %v9317_v43 = vld [vmem:[%s8987_s29 + $0xc0] sm:$0xff] }
  0x56   : > { %v1366_v57 = vpack.c.bf16 %v1312_v49, %v1308_v41  ;;  %v1135_v59 = vrot.slane %v9241_v15, 2  ;;  %v1310_v13 = vmax.f32 %v1041_v51, %v1150_v23  ;;  %v1314_v63 = vmax.f32 %v1045_v55, %v1158_v56 }
  0x57   : > { %v1038_v14 = vmax.f32 %v9241_v15, %v875_v62  ;;  %v1042_v30 = vmax.f32 %v705_v35, %v883_v61  ;;  %v1143_v5 = vrot.slane %v705_v35, 2  ;;  %v870_v0 = vrot.slane %v9268_v44, 1  ;;  %v689_v15 = vld [vmem:[%s8987_s29 + $0xa0] sm:$0xff] }
  0x58   : > { %1441 = vmatprep.subr.bf16.mxu0 %v1366_v57  ;;  %v878_v19 = vrot.slane %v707_v16, 1  ;;  %v1139_v20 = vrot.slane %v9268_v44, 2  ;;  %v1368_v21 = vpack.c.bf16 %v1314_v63, %v1310_v13  ;;  %v1147_v18 = vrot.slane %v707_v16, 2 }
  0x59   : > { %v852_v10 = vrot.slane %v9278_v9, 1  ;;  %v860_v36 = vrot.slane %v698_v38, 1  ;;  %v1144_v27 = vsel %vm1074_vm2, %v1135_v59, %v1143_v5  ;;  %v1152_v35 = vsel %vm1074_vm2, %v1143_v5, %v1151_v39 }
  0x5a   : > { %v879_v31 = vsel %vm805_vm1, %v870_v0, %v878_v19  ;;  %v887_v32 = vsel %vm805_vm1, %v878_v19, %v886_v45  ;;  %1504 = vmatprep.subr.bf16.mxu1 %v1368_v21  ;;  %v1307_v37 = vmax.f32 %v1038_v14, %v1144_v27  ;;  %v1311_v40 = vmax.f32 %v1042_v30, %v1152_v35  ;;  %v9344_v14 = vld [vmem:[%s8987_s29 + $0xd0] sm:$0xff] }
  0x5b   : > { %v1040_v34 = vmax.f32 %v9268_v44, %v879_v31  ;;  %v1044_v4 = vmax.f32 %v707_v16, %v887_v32  ;;  %v1148_v39 = vsel %vm1074_vm2, %v1139_v20, %v1147_v18  ;;  %v1156_v41 = vsel %vm1074_vm2, %v1147_v18, %v1155_v52  ;;  %v699_v30 = vld [vmem:[%s8987_s29 + $0xf0] sm:$0xff] }
  0x5c   : > { %v861_v45 = vsel %vm805_vm1, %v852_v10, %v860_v36  ;;  %v869_v49 = vsel %vm805_vm1, %v860_v36, %v868_v7  ;;  %v1365_v16 = vpack.c.bf16 %v1311_v40, %v1307_v37  ;;  %v1121_v8 = vrot.slane %v9278_v9, 2 }
  0x5d   : > { %v1309_v50 = vmax.f32 %v1040_v34, %v1148_v39  ;;  %v1313_v1 = vmax.f32 %v1044_v4, %v1156_v41  ;;  %v1031_v51 = vmax.f32 %v9278_v9, %v861_v45  ;;  %v1035_v55 = vmax.f32 %v698_v38, %v869_v49  ;;  %v9430_v9 = vld [vmem:[%s8987_s29 + $0x48] sm:$0xff] }
  0x5e   : > { %v1129_v23 = vrot.slane %v698_v38, 2  ;;  %v856_v52 = vrot.slane %v9300_v25, 1  ;;  %1442 = vmatpush1.bf16.msra.mxu0 %v1365_v16  ;;  %v864_v57 = vrot.slane %v700_v33, 1  ;;  %v1125_v7 = vrot.slane %v9300_v25, 2 }
  0x5f   : > { %v1367_v56 = vpack.c.bf16 %v1313_v1, %v1309_v50  ;;  %v1133_v62 = vrot.slane %v700_v33, 2  ;;  %v850_v38 = vrot.slane %v9317_v43, 1  ;;  %v858_v63 = vrot.slane %v697_v46, 1  ;;  %v9376_v1 = vld [vmem:[%s8987_s29 + $0x98] sm:$0xff] }
  0x60   : > { %v1130_v61 = vsel %vm1074_vm2, %v1121_v8, %v1129_v23  ;;  %v1138_v13 = vsel %vm1074_vm2, %v1129_v23, %v1137_v58  ;;  %v865_v21 = vsel %vm805_vm1, %v856_v52, %v864_v57  ;;  %v873_v18 = vsel %vm805_vm1, %v864_v57, %v872_v24  ;;  %v690_v58 = vld [vmem:[%s8987_s29 + $0xa8] sm:$0xff] }
  0x61   : > { %1505 = vmatpush1.bf16.msra.mxu1 %v1367_v56  ;;  %v1300_v5 = vmax.f32 %v1031_v51, %v1130_v61  ;;  %v1304_v19 = vmax.f32 %v1035_v55, %v1138_v13  ;;  %v1033_v36 = vmax.f32 %v9300_v25, %v865_v21  ;;  %v1037_v27 = vmax.f32 %v700_v33, %v873_v18  ;;  %v692_v56 = vld [vmem:[%s8987_s29 + $0xb8] sm:$0xff] }
  0x62   : > { %v1134_v35 = vsel %vm1074_vm2, %v1125_v7, %v1133_v62  ;;  %v1142_v31 = vsel %vm1074_vm2, %v1133_v62, %v1141_v26  ;;  %v859_v37 = vsel %vm805_vm1, %v850_v38, %v858_v63  ;;  %v867_v24 = vsel %vm805_vm1, %v858_v63, %v866_v22  ;;  %v9393_v63 = vld [vmem:[%s8987_s29 + $0x80] sm:$0xff] }
  0x63   : > { %v1362_v32 = vpack.c.bf16 %v1304_v19, %v1300_v5  ;;  %v1119_v33 = vrot.slane %v9317_v43, 2  ;;  %v1302_v40 = vmax.f32 %v1033_v36, %v1134_v35  ;;  %v1306_v34 = vmax.f32 %v1037_v27, %v1142_v31 }
  0x64   : > { %v1030_v4 = vmax.f32 %v9317_v43, %v859_v37  ;;  %v1034_v54 = vmax.f32 %v697_v46, %v867_v24  ;;  %v1127_v26 = vrot.slane %v697_v46, 2  ;;  %v854_v39 = vrot.slane %v9344_v14, 1  ;;  %v681_v43 = vld [vmem:[%s8987_s29 + $0x60] sm:$0xff] }
  0x65   : > { %1443 = vmatprep.subr.bf16.mxu0 %v1362_v32  ;;  %v862_v41 = vrot.slane %v699_v30, 1  ;;  %v1123_v45 = vrot.slane %v9344_v14, 2  ;;  %v1364_v49 = vpack.c.bf16 %v1306_v34, %v1302_v40  ;;  %v1131_v16 = vrot.slane %v699_v30, 2 }
  0x66   : > { %v836_v22 = vrot.slane %v9354_v53, 1  ;;  %v844_v50 = vrot.slane %v690_v58, 1  ;;  %v1128_v51 = vsel %vm1074_vm2, %v1119_v33, %v1127_v26  ;;  %v1136_v46 = vsel %vm1074_vm2, %v1127_v26, %v1135_v59 }
  0x67   : > { %v863_v55 = vsel %vm805_vm1, %v854_v39, %v862_v41  ;;  %v871_v23 = vsel %vm805_vm1, %v862_v41, %v870_v0  ;;  %1506 = vmatprep.subr.bf16.mxu1 %v1364_v49  ;;  %v1299_v57 = vmax.f32 %v1030_v4, %v1128_v51  ;;  %v1303_v62 = vmax.f32 %v1034_v54, %v1136_v46  ;;  %v9420_v4 = vld [vmem:[%s8987_s29 + $0x90] sm:$0xff] }
  0x68   : > { %v1032_v61 = vmax.f32 %v9344_v14, %v863_v55  ;;  %v1036_v13 = vmax.f32 %v699_v30, %v871_v23  ;;  %v1132_v59 = vsel %vm1074_vm2, %v1123_v45, %v1131_v16  ;;  %v1140_v5 = vsel %vm1074_vm2, %v1131_v16, %v1139_v20  ;;  %v691_v54 = vld [vmem:[%s8987_s29 + $0xb0] sm:$0xff] }
  0x69   : > { %v845_v0 = vsel %vm805_vm1, %v836_v22, %v844_v50  ;;  %v853_v19 = vsel %vm805_vm1, %v844_v50, %v852_v10  ;;  %v1361_v30 = vpack.c.bf16 %v1303_v62, %v1299_v57  ;;  %v1105_v44 = vrot.slane %v9354_v53, 2 }
  0x6a   : > { %v1301_v21 = vmax.f32 %v1032_v61, %v1132_v59  ;;  %v1305_v18 = vmax.f32 %v1036_v13, %v1140_v5  ;;  %v1023_v36 = vmax.f32 %v9354_v53, %v845_v0  ;;  %v1027_v27 = vmax.f32 %v690_v58, %v853_v19  ;;  %v670_v53 = vld [vmem:[%s8987_s29 + $0x8] sm:$0xff] }
  0x6b   : > { %v1113_v35 = vrot.slane %v690_v58, 2  ;;  %v840_v20 = vrot.slane %v9376_v1, 1  ;;  %1444 = vmatpush1.bf16.msra.mxu0 %v1361_v30  ;;  %v848_v32 = vrot.slane %v692_v56, 1  ;;  %v1109_v10 = vrot.slane %v9376_v1, 2 }
  0x6c   : > { %v1363_v31 = vpack.c.bf16 %v1305_v18, %v1301_v21  ;;  %v1117_v37 = vrot.slane %v692_v56, 2  ;;  %v834_v58 = vrot.slane %v9393_v63, 1  ;;  %v842_v34 = vrot.slane %v689_v15, 1  ;;  %v9452_v18 = vld [vmem:[%s8987_s29 + $0x58] sm:$0xff] }
  0x6d   : > { %v1114_v24 = vsel %vm1074_vm2, %v1105_v44, %v1113_v35  ;;  %v1122_v40 = vsel %vm1074_vm2, %v1113_v35, %v1121_v8  ;;  %v849_v49 = vsel %vm805_vm1, %v840_v20, %v848_v32  ;;  %v857_v16 = vsel %vm805_vm1, %v848_v32, %v856_v52  ;;  %v682_v8 = vld [vmem:[%s8987_s29 + $0x68] sm:$0xff] }
  0x6e   : > { %1507 = vmatpush1.bf16.msra.mxu1 %v1363_v31  ;;  %v1292_v26 = vmax.f32 %v1023_v36, %v1114_v24  ;;  %v1296_v41 = vmax.f32 %v1027_v27, %v1122_v40  ;;  %v1025_v50 = vmax.f32 %v9376_v1, %v849_v49  ;;  %v1029_v51 = vmax.f32 %v692_v56, %v857_v16  ;;  %v684_v31 = vld [vmem:[%s8987_s29 + $0x78] sm:$0xff] }
  0x6f   : > { %v1118_v46 = vsel %vm1074_vm2, %v1109_v10, %v1117_v37  ;;  %v1126_v55 = vsel %vm1074_vm2, %v1117_v37, %v1125_v7  ;;  %v843_v57 = vsel %vm805_vm1, %v834_v58, %v842_v34  ;;  %v851_v52 = vsel %vm805_vm1, %v842_v34, %v850_v38  ;;  %v9469_v34 = vld [vmem:[%s8987_s29 + $0x40] sm:$0xff] }
  0x70   : > { %v1358_v23 = vpack.c.bf16 %v1296_v41, %v1292_v26  ;;  %v1103_v56 = vrot.slane %v9393_v63, 2  ;;  %v1294_v62 = vmax.f32 %v1025_v50, %v1118_v46  ;;  %v1298_v61 = vmax.f32 %v1029_v51, %v1126_v55 }
  0x71   : > { %v1022_v13 = vmax.f32 %v9393_v63, %v843_v57  ;;  %v1026_v25 = vmax.f32 %v689_v15, %v851_v52  ;;  %v1111_v7 = vrot.slane %v689_v15, 2  ;;  %v838_v59 = vrot.slane %v9420_v4, 1 }
  0x72   : > { %1445 = vmatprep.subr.bf16.mxu0 %v1358_v23  ;;  %v846_v5 = vrot.slane %v691_v54, 1  ;;  %v1107_v0 = vrot.slane %v9420_v4, 2  ;;  %v1360_v19 = vpack.c.bf16 %v1298_v61, %v1294_v62  ;;  %v1115_v30 = vrot.slane %v691_v54, 2 }
  0x73   : > { %v820_v38 = vrot.slane %v9430_v9, 1  ;;  %v828_v21 = vrot.slane %v682_v8, 1  ;;  %v1112_v36 = vsel %vm1074_vm2, %v1103_v56, %v1111_v7  ;;  %v1120_v15 = vsel %vm1074_vm2, %v1111_v7, %v1119_v33 }
  0x74   : > { %v847_v27 = vsel %vm805_vm1, %v838_v59, %v846_v5  ;;  %v855_v35 = vsel %vm805_vm1, %v846_v5, %v854_v39  ;;  %1508 = vmatprep.subr.bf16.mxu1 %v1360_v19  ;;  %v1291_v32 = vmax.f32 %v1022_v13, %v1112_v36  ;;  %v1295_v37 = vmax.f32 %v1026_v25, %v1120_v15  ;;  %v9496_v13 = vld [vmem:[%s8987_s29 + $0x50] sm:$0xff] }
  0x75   : > { %v1024_v24 = vmax.f32 %v9420_v4, %v847_v27  ;;  %v1028_v40 = vmax.f32 %v691_v54, %v855_v35  ;;  %v1116_v33 = vsel %vm1074_vm2, %v1107_v0, %v1115_v30  ;;  %v1124_v26 = vsel %vm1074_vm2, %v1115_v30, %v1123_v45  ;;  %v683_v25 = vld [vmem:[%s8987_s29 + $0x70] sm:$0xff] }
  0x76   : > { %v829_v39 = vsel %vm805_vm1, %v820_v38, %v828_v21  ;;  %v837_v41 = vsel %vm805_vm1, %v828_v21, %v836_v22  ;;  %v1357_v54 = vpack.c.bf16 %v1295_v37, %v1291_v32  ;;  %v1089_v14 = vrot.slane %v9430_v9, 2  ;;  %v674_v21 = vld [vmem:[%s8987_s29 + $0x28] sm:$0xff] }
  0x77   : > { %v1293_v49 = vmax.f32 %v1024_v24, %v1116_v33  ;;  %v1297_v16 = vmax.f32 %v1028_v40, %v1124_v26  ;;  %v1015_v50 = vmax.f32 %v9430_v9, %v829_v39  ;;  %v1019_v51 = vmax.f32 %v682_v8, %v837_v41 }
  0x78   : > { %v1097_v46 = vrot.slane %v682_v8, 2  ;;  %v824_v45 = vrot.slane %v9452_v18, 1  ;;  %1446 = vmatpush1.bf16.msra.mxu0 %v1357_v54  ;;  %v832_v23 = vrot.slane %v684_v31, 1  ;;  %v1093_v22 = vrot.slane %v9452_v18, 2 }
  0x79   : > { %v1359_v55 = vpack.c.bf16 %v1297_v16, %v1293_v49  ;;  %v1101_v57 = vrot.slane %v684_v31, 2  ;;  %v818_v8 = vrot.slane %v9469_v34, 1  ;;  %v826_v61 = vrot.slane %v681_v43, 1  ;;  %v672_v16 = vld [vmem:[%s8987_s29 + $0x18] sm:$0xff] }
  0x7a   : > { %v1098_v52 = vsel %vm1074_vm2, %v1089_v14, %v1097_v46  ;;  %v1106_v62 = vsel %vm1074_vm2, %v1097_v46, %v1105_v44  ;;  %v833_v19 = vsel %vm805_vm1, %v824_v45, %v832_v23  ;;  %v841_v30 = vsel %vm805_vm1, %v832_v23, %v840_v20 }
  0x7b   : > { %1509 = vmatpush1.bf16.msra.mxu1 %v1359_v55  ;;  %v1284_v7 = vmax.f32 %v1015_v50, %v1098_v52  ;;  %v1288_v5 = vmax.f32 %v1019_v51, %v1106_v62  ;;  %v1017_v44 = vmax.f32 %v9452_v18, %v833_v19  ;;  %v1021_v36 = vmax.f32 %v684_v31, %v841_v30  ;;  %v676_v55 = vld [vmem:[%s8987_s29 + $0x38] sm:$0xff] }
  0x7c   : > { %v1102_v15 = vsel %vm1074_vm2, %v1093_v22, %v1101_v57  ;;  %v1110_v27 = vsel %vm1074_vm2, %v1101_v57, %v1109_v10  ;;  %v827_v32 = vsel %vm805_vm1, %v818_v8, %v826_v61  ;;  %v835_v20 = vsel %vm805_vm1, %v826_v61, %v834_v58  ;;  %v669_v61 = vld [vmem:[%s8987_s29] sm:$0xff] }
  0x7d   : > { %v1354_v35 = vpack.c.bf16 %v1288_v5, %v1284_v7  ;;  %v1087_v31 = vrot.slane %v9469_v34, 2  ;;  %v1286_v37 = vmax.f32 %v1017_v44, %v1102_v15  ;;  %v1290_v24 = vmax.f32 %v1021_v36, %v1110_v27  ;;  %v673_v7 = vld [vmem:[%s8987_s29 + $0x20] sm:$0xff] }
  0x7e   : > { %v1014_v40 = vmax.f32 %v9469_v34, %v827_v32  ;;  %v1018_v1 = vmax.f32 %v681_v43, %v835_v20  ;;  %v1095_v10 = vrot.slane %v681_v43, 2  ;;  %v822_v33 = vrot.slane %v9496_v13, 1 }
  0x7f   : > { %1447 = vmatprep.subr.bf16.mxu0 %v1354_v35  ;;  %v830_v26 = vrot.slane %v683_v25, 1  ;;  %v1091_v39 = vrot.slane %v9496_v13, 2  ;;  %v1356_v41 = vpack.c.bf16 %v1290_v24, %v1286_v37  ;;  %v1099_v54 = vrot.slane %v683_v25, 2 }
  0x80   : > { %v809_v58 = vrot.slane %v670_v53, 1  ;;  %v810_v49 = vrot.slane %v674_v21, 1  ;;  %v1096_v50 = vsel %vm1074_vm2, %v1087_v31, %v1095_v10  ;;  %v1104_v43 = vsel %vm1074_vm2, %v1095_v10, %v1103_v56  ;;  %v675_v10 = vld [vmem:[%s8987_s29 + $0x30] sm:$0xff] }
  0x81   : > { %v831_v51 = vsel %vm805_vm1, %v822_v33, %v830_v26  ;;  %v839_v46 = vsel %vm805_vm1, %v830_v26, %v838_v59  ;;  %1510 = vmatprep.subr.bf16.mxu1 %v1356_v41  ;;  %v1283_v23 = vmax.f32 %v1014_v40, %v1096_v50  ;;  %v1287_v57 = vmax.f32 %v1018_v1, %v1104_v43  ;;  %v671_v1 = vld [vmem:[%s8987_s29 + $0x10] sm:$0xff] }
  0x82   : > { %v1016_v52 = vmax.f32 %v9496_v13, %v831_v51  ;;  %v1020_v62 = vmax.f32 %v683_v25, %v839_v46  ;;  %v1100_v63 = vsel %vm1074_vm2, %v1091_v39, %v1099_v54  ;;  %v1108_v56 = vsel %vm1074_vm2, %v1099_v54, %v1107_v0 }
  0x83   : > { %v811_v5 = vsel %vm805_vm1, %v809_v58, %v810_v49  ;;  %v821_v59 = vsel %vm805_vm1, %v810_v49, %v820_v38  ;;  %v1353_v19 = vpack.c.bf16 %v1287_v57, %v1283_v23  ;;  %v1078_v15 = vrot.slane %v670_v53, 2 }
  0x84   : > { %v1285_v30 = vmax.f32 %v1016_v52, %v1100_v63  ;;  %v1289_v25 = vmax.f32 %v1020_v62, %v1108_v56  ;;  %v1007_v44 = vmax.f32 %v670_v53, %v811_v5  ;;  %v1011_v36 = vmax.f32 %v674_v21, %v821_v59  ;;  %v8744_v63 = vld [vmem:[%s8987_s29 + $0x208] sm:$0xf]  ;;  %v8745_v5 = vld [vmem:[%s8987_s29 + $0x218] sm:$0xf] }
  0x85   : > { %v1079_v27 = vrot.slane %v674_v21, 2  ;;  %v815_v35 = vrot.slane %v672_v16, 1  ;;  %1448 = vmatpush1.bf16.msra.mxu0 %v1353_v19  ;;  %v816_v32 = vrot.slane %v676_v55, 1  ;;  %v1084_v0 = vrot.slane %v672_v16, 2 }
  0x86   : > { %v1355_v4 = vpack.c.bf16 %v1289_v25, %v1285_v30  ;;  %v1085_v20 = vrot.slane %v676_v55, 2  ;;  %v806_v24 = vrot.slane %v669_v61, 1  ;;  %v807_v40 = vrot.slane %v673_v7, 1 }
  0x87   : > { %v1080_v37 = vsel %vm1074_vm2, %v1078_v15, %v1079_v27  ;;  %v1090_v38 = vsel %vm1074_vm2, %v1079_v27, %v1089_v14  ;;  %v817_v21 = vsel %vm805_vm1, %v815_v35, %v816_v32  ;;  %v825_v41 = vsel %vm805_vm1, %v816_v32, %v824_v45  ;;  %v8746_v35 = vld [vmem:[%s8987_s29 + $0x200] sm:$0xf] }
  0x88   : > { %1511 = vmatpush1.bf16.msra.mxu1 %v1355_v4  ;;  %v1276_v26 = vmax.f32 %v1007_v44, %v1080_v37  ;;  %v1280_v53 = vmax.f32 %v1011_v36, %v1090_v38  ;;  %v1009_v54 = vmax.f32 %v672_v16, %v817_v21  ;;  %v1013_v58 = vmax.f32 %v676_v55, %v825_v41  ;;  %v8255_v37 = vld [vmem:[%s11783_s24 + $0x20] ss:$8 sps:$4 sm:$0x3f]   ;;  %v8256_v38 = vld [vmem:[%s11785_s1 + $0x70] ss:$8 sps:$4 sm:$0xff]  }
  0x89   : > { %v1086_v49 = vsel %vm1074_vm2, %v1084_v0, %v1085_v20  ;;  %v1094_v9 = vsel %vm1074_vm2, %v1085_v20, %v1093_v22  ;;  %v808_v50 = vsel %vm805_vm1, %v806_v24, %v807_v40  ;;  %v819_v43 = vsel %vm805_vm1, %v807_v40, %v818_v8  ;;  %v8747_v20 = vld [vmem:[%s8987_s29 + $0x210] sm:$0xf]  ;;  %v8258_v24 = vld [vmem:[%s11785_s1 + $0x74] ss:$8 sps:$4 sm:$0xff]   ;;  %v8261_v40 = vld [vmem:[%s11785_s1 + $0x64] ss:$8 sps:$4 sm:$0xff]   ;;  %s11787_s29 = smov %s11786_s26 }
  0x8a   : > { %v1350_v14 = vpack.c.bf16 %v1280_v53, %v1276_v26  ;;  %v1075_v51 = vrot.slane %v669_v61, 2  ;;  %v1278_v45 = vmax.f32 %v1009_v54, %v1086_v49  ;;  %v1282_v16 = vmax.f32 %v1013_v58, %v1094_v9  ;;  %v8277_v26 = vld [vmem:[%s11785_s1 + $0x170] ss:$8 sps:$4 sm:$0xff]   ;;  %v8279_v53 = vld [vmem:[%s11785_s1 + $0x174] ss:$8 sps:$4 sm:$0xff]  }
  0x8b   : > { %v1006_v46 = vmax.f32 %v669_v61, %v808_v50  ;;  %v1010_v55 = vmax.f32 %v673_v7, %v819_v43  ;;  %v1076_v23 = vrot.slane %v673_v7, 2  ;;  %v812_v18 = vrot.slane %v671_v1, 1  ;;  %v8285_v21 = vld [vmem:[%s11785_s1 + $0x164] ss:$8 sps:$4 sm:$0xff]   ;;  %v8262_v41 = vld [vmem:[%s11785_s1 + $0x50] ss:$8 sps:$4 sm:$0xff]  }
  0x8c   : > { %1449 = vmatprep.subr.bf16.mxu0 %v1350_v14  ;;  %v813_v57 = vrot.slane %v675_v10, 1  ;;  %v1081_v22 = vrot.slane %v671_v1, 2  ;;  %v1352_v52 = vpack.c.bf16 %v1282_v16, %v1278_v45  ;;  %v1082_v62 = vrot.slane %v675_v10, 2  ;;  %v8267_v54 = vld [vmem:[%s11785_s1 + $0x44] ss:$8 sps:$4 sm:$0xff]  }
  0x8d   : > { %v1071_v56 = vmax.f32 %v8744_v63, %v932_v6  ;;  %v1073_v8 = vmax.f32 %v8745_v5, %v936_v17  ;;  %v1077_v59 = vsel %vm1074_vm2, %v1075_v51, %v1076_v23  ;;  %v1088_v61 = vsel %vm1074_vm2, %v1076_v23, %v1087_v31  ;;  %v8283_v58 = vld [vmem:[%s11785_s1 + $0x160] ss:$8 sps:$4 sm:$0xff]   ;;  %v8291_v49 = vld [vmem:[%s11785_s1 + $0x154] ss:$8 sps:$4 sm:$0xff]   ;;  %v8289_v50 = vld [vmem:[%s11785_s1 + $0x150] ss:$8 sps:$4 sm:$0xff]  }
  0x8e   : > { %v814_v7 = vsel %vm805_vm1, %v812_v18, %v813_v57  ;;  %v823_v19 = vsel %vm805_vm1, %v813_v57, %v822_v33  ;;  %1512 = vmatprep.subr.bf16.mxu1 %v1352_v52  ;;  %v1275_v6 = vmax.f32 %v1006_v46, %v1077_v59  ;;  %v1279_v30 = vmax.f32 %v1010_v55, %v1088_v61  ;;  %v8265_v9 = vld [vmem:[%s11785_s1 + $0x40] ss:$8 sps:$4 sm:$0xff]   ;;  %v8270_v14 = vld [vmem:[%s11785_s1 + $0x34] ss:$8 sps:$4 sm:$0xff]   ;;  %v8297_v43 = vld [vmem:[%s11785_s1 + $0x144] ss:$8 sps:$4 sm:$0xff]  }
  0x8f   : > { %v1008_v25 = vmax.f32 %v671_v1, %v814_v7  ;;  %v1012_v44 = vmax.f32 %v675_v10, %v823_v19  ;;  %v1083_v17 = vsel %vm1074_vm2, %v1081_v22, %v1082_v62  ;;  %v1092_v34 = vsel %vm1074_vm2, %v1082_v62, %v1091_v39  ;;  %v8259_v1 = vld [vmem:[%s11785_s1 + $0x60] ss:$8 sps:$4 sm:$0xff]   ;;  %v8264_v10 = vld [vmem:[%s11785_s1 + $0x54] ss:$8 sps:$4 sm:$0xff]   ;;  %v8268_v51 = vld [vmem:[%s11785_s1 + $0x30] ss:$8 sps:$4 sm:$0xff]  }
  0x90   : > { %v1340_v31 = vmax.f32 %v1071_v56, %v1201_v11  ;;  %v1342_v36 = vmax.f32 %v1073_v8, %v1205_v28  ;;  %v1349_v15 = vpack.c.bf16 %v1279_v30, %v1275_v6  ;;  %v1070_v4 = vmax.f32 %v8746_v35, %v930_v42  ;;  %v8247_v28 = vld [vmem:[%s11783_s24] ss:$8 sps:$4 sm:$0xff]   ;;  %v8273_v45 = vld [vmem:[%s11785_s1 + $0x24] ss:$8 sps:$4 sm:$0xff]   ;;  %v8276_v55 = vld [vmem:[%s11785_s1 + $0x14] ss:$8 sps:$4 sm:$0xff]  }
  0x91   : > { %v1277_v33 = vmax.f32 %v1008_v25, %v1083_v17  ;;  %v1281_v27 = vmax.f32 %v1012_v44, %v1092_v34  ;;  %v1072_v13 = vmax.f32 %v8747_v20, %v934_v60  ;;  %v8250_v60 = vld [vmem:[%s11783_s24 + $0x14] ss:$8 sps:$4 sm:$0xff]   ;;  %v8295_v16 = vld [vmem:[%s11785_s1 + $0x140] ss:$8 sps:$4 sm:$0xff]   ;;  %v8274_v23 = vld [vmem:[%s11785_s1 + $0x10] ss:$8 sps:$4 sm:$0xff]  }
  0x92   : > { %v1382_v32 = vpack.c.bf16 %v1340_v31, %v1340_v31  ;;  %v1384_v0 = vpack.c.bf16 %v1342_v36, %v1342_v36  ;;  %1450 = vmatpush1.bf16.msra.mxu0 %v1349_v15  ;;  %v1339_v3 = vmax.f32 %v1070_v4, %v1199_v47  ;;  %v8271_v46 = vld [vmem:[%s11785_s1 + $0x20] ss:$8 sps:$4 sm:$0xff]   ;;  %v8282_v18 = vld [vmem:[%s11785_s1 + $0x4] ss:$8 sps:$4 sm:$0xff]   ;;  %v8288_v22 = vld [vmem:[%s11785_s1 + $0xf4] ss:$8 sps:$4 sm:$0xff]  }
  0x93   : > { %v1351_v39 = vpack.c.bf16 %v1281_v27, %v1277_v33  ;;  %v1341_v11 = vmax.f32 %v1072_v13, %v1203_v2  ;;  %v8253_v2 = vld [vmem:[%s11783_s24 + $0x24] ss:$8 sps:$4 sm:$0x3f]   ;;  %v8280_v57 = vld [vmem:[%s11785_s1] ss:$8 sps:$4 sm:$0xff]  }
  0x94   : > { %6985 = vmatprep.subr.msk.bf16.mxu0 %vm1422_vm3, %v1382_v32  ;;  %v1381_v12 = vpack.c.bf16 %v1339_v3, %v1339_v3  ;;  %v8286_v52 = vld [vmem:[%s11785_s1 + $0xf0] ss:$8 sps:$4 sm:$0xff]   ;;  %v8294_v62 = vld [vmem:[%s11785_s1 + $0xe4] ss:$8 sps:$4 sm:$0xff]   ;;  %v8292_v63 = vld [vmem:[%s11785_s1 + $0xe0] ss:$8 sps:$4 sm:$0xff]  }
  0x95   : > { %1513 = vmatpush1.bf16.msra.mxu1 %v1351_v39  ;;  %v1383_v42 = vpack.c.bf16 %v1341_v11, %v1341_v11  ;;  %v8300_v56 = vld [vmem:[%s11785_s1 + $0xd4] ss:$8 sps:$4 sm:$0xff]   ;;  %v8298_v5 = vld [vmem:[%s11785_s1 + $0xd0] ss:$8 sps:$4 sm:$0xff]   ;;  %v8306_v61 = vld [vmem:[%s11785_s1 + $0xc4] ss:$8 sps:$4 sm:$0xff]  }
  0x96   : > { %6989 = vmatprep.subr.msk.bf16.mxu1 %vm1422_vm3, %v1384_v0  ;;  %v1424_v29 = vsel %vm1422_vm3, %v1381_v12, 0  ;;  %v8303_v8 = vld [vmem:[%s11785_s1 + $0x134] ss:$8 sps:$4 sm:$0xff]   ;;  %v8301_v59 = vld [vmem:[%s11785_s1 + $0x130] ss:$8 sps:$4 sm:$0xff]  }
  0x97   : > { %1466 = vmatpush2.bf16.msra.mxu0 %v1424_v29  ;;  %v1430_v47 = vsel %vm1422_vm3, %v1383_v42, 0  ;;  %v8304_v7 = vld [vmem:[%s11785_s1 + $0xc0] ss:$8 sps:$4 sm:$0xff]   ;;  %v8309_v19 = vld [vmem:[%s11785_s1 + $0x124] ss:$8 sps:$4 sm:$0xff]  }
  0x98   : > { %2142 = vmatprep.subr.bf16.mxu0 %v8258_v24  ;;  %v8307_v6 = vld [vmem:[%s11785_s1 + $0x120] ss:$8 sps:$4 sm:$0xff]   ;;  %v8312_v30 = vld [vmem:[%s11785_s1 + $0xb4] ss:$8 sps:$4 sm:$0xff]   ;;  %v8310_v25 = vld [vmem:[%s11785_s1 + $0xb0] ss:$8 sps:$4 sm:$0xff]  }
  0x99   : > { %1529 = vmatpush2.bf16.msra.mxu1 %v1430_v47  ;;  %v8315_v17 = vld [vmem:[%s11785_s1 + $0x114] ss:$8 sps:$4 sm:$0xff]   ;;  %v8313_v31 = vld [vmem:[%s11785_s1 + $0x110] ss:$8 sps:$4 sm:$0xff]   ;;  %v8318_v36 = vld [vmem:[%s11785_s1 + $0xa4] ss:$8 sps:$4 sm:$0xff]  }
  0x9a   : > { %1468 = vmatmul.mubr.bf16.vlgmr.msra.gmra.mxu0 %v8247_v28  ;;  %2205 = vmatprep.subr.bf16.mxu1 %v8279_v53  ;;  %v8316_v33 = vld [vmem:[%s11785_s1 + $0xa0] ss:$8 sps:$4 sm:$0xff]   ;;  %v8321_v0 = vld [vmem:[%s11785_s1 + $0x104] ss:$8 sps:$4 sm:$0xff]   ;;  %v8324_v39 = vld [vmem:[%s11785_s1 + $0x94] ss:$8 sps:$4 sm:$0xff]  }
  0x9b   : > { %6987 = vmatprep.mubr.msk.bf16.mxu0 %vm1412_vm0, %v8250_v60  ;;  %2143 = vmatpush1.bf16.msra.mxu0 %v8256_v38  ;;  %v8319_v13 = vld [vmem:[%s11785_s1 + $0x100] ss:$8 sps:$4 sm:$0xff]   ;;  %v8322_v11 = vld [vmem:[%s11785_s1 + $0x90] ss:$8 sps:$4 sm:$0xff]  }
  0x9c   : > { %1531 = vmatmul.mubr.bf16.vlgmr.msra.gmra.mxu1 %v8247_v28  ;;  %2144 = vmatprep.subr.bf16.mxu0 %v8261_v40  ;;  %v8330_v29 = vld [vmem:[%s11785_s1 + $0x180] ss:$8 sps:$4 sm:$0x1f]  }
  0x9d   : > { %6991 = vmatprep.mubr.msk.bf16.mxu1 %vm1412_vm0, %v8250_v60  ;;  %2206 = vmatpush1.bf16.msra.mxu1 %v8277_v26  ;;  %v8325_v60 = vld [vmem:[%s11785_s1 + $0x184] ss:$8 sps:$4 sm:$0x1f]   ;;  %v2137_v38 = vsel %vm2135_vm4, %v8330_v29, 0 }
  0x9e   : > { %2207 = vmatprep.subr.bf16.mxu1 %v8285_v21 }
  0x9f   : > { %2145 = vmatpush1.bf16.msra.mxu0 %v8259_v1 }
  0xa0   : > { %2146 = vmatprep.subr.bf16.mxu0 %v8264_v10 }
  0xa1   : > { %2208 = vmatpush1.bf16.msra.mxu1 %v8283_v58 }
  0xa2   : > { %1478 = vmatmul.mubr.bf16.gmra.mxu0 %v8252_v48  ;;  %2209 = vmatprep.subr.bf16.mxu1 %v8291_v49 }
  0xa3   : > { %6988 = vmatprep.mubr.msk.bf16.mxu0 %vm1412_vm0, %v8253_v2  ;;  %2147 = vmatpush1.bf16.msra.mxu0 %v8262_v41 }
  0xa4   : > { %1541 = vmatmul.mubr.bf16.gmra.mxu1 %v8252_v48  ;;  %2148 = vmatprep.subr.bf16.mxu0 %v8267_v54  ;;  %v8329_v48 = vld [vmem:[%s11785_s1 + $0x84] ss:$8 sps:$4 sm:$0xff]  }
  0xa5   : > { %6992 = vmatprep.mubr.msk.bf16.mxu1 %vm1412_vm0, %v8253_v2  ;;  %2210 = vmatpush1.bf16.msra.mxu1 %v8289_v50  ;;  %vm5786_vm0 = vcmask 785408  }
  0xa6   : > { %2211 = vmatprep.subr.bf16.mxu1 %v8297_v43 }
  0xa7   : > { %2149 = vmatpush1.bf16.msra.mxu0 %v8265_v9 }
  0xa8   : > { %2150 = vmatprep.subr.bf16.mxu0 %v8270_v14 }
  0xa9   : > { %2212 = vmatpush1.bf16.msra.mxu1 %v8295_v16 }
  0xaa   : > { %1488 = vmatmul.mubr.bf16.gmra.mxu0 %v8255_v37  ;;  %2213 = vmatprep.subr.bf16.mxu1 %v8303_v8 }
  0xab   : > { %2151 = vmatpush1.bf16.msra.mxu0 %v8268_v51 }
  0xac   : > { %1551 = vmatmul.mubr.bf16.gmra.mxu1 %v8255_v37  ;;  %2152 = vmatprep.subr.bf16.mxu0 %v8273_v45  ;;  %v8327_v37 = vld [vmem:[%s11785_s1 + $0x80] ss:$8 sps:$4 sm:$0xff]  }
  0xad   : > { %2214 = vmatpush1.bf16.msra.mxu1 %v8301_v59 }
  0xae   : > { %2215 = vmatprep.subr.bf16.mxu1 %v8309_v19 }
  0xaf   : > { %2153 = vmatpush1.bf16.msra.mxu0 %v8271_v46 }
  0xb0   : > { %2154 = vmatprep.subr.bf16.mxu0 %v8276_v55 }
  0xb1   : > { %2216 = vmatpush1.bf16.msra.mxu1 %v8307_v6 }
  0xb2   : > { %2217 = vmatprep.subr.bf16.mxu1 %v8315_v17 }
  0xb3   : > { %2155 = vmatpush1.bf16.msra.mxu0 %v8274_v23 }
  0xb4   : > { %2156 = vmatprep.subr.bf16.mxu0 %v8282_v18 }
  0xb5   : > { %2218 = vmatpush1.bf16.msra.mxu1 %v8313_v31 }
  0xb6   : > { %2219 = vmatprep.subr.bf16.mxu1 %v8321_v0 }
  0xb7   : > { %2157 = vmatpush1.bf16.msra.mxu0 %v8280_v57  ;;  %v8333_v57 = vld [vmem:[%s11786_s26 + $0x74] ss:$8 sps:$4 sm:$0xff]   ;;  %s11790_s26 = smov 126  }
  0xb8   : > { %2158 = vmatprep.subr.bf16.mxu0 %v8288_v22  ;;  %v8348_v22 = vld [vmem:[%s11787_s29 + $0xfc] ss:$8 sps:$4 sm:$0xff]  }
  0xb9   : > { %2220 = vmatpush1.bf16.msra.mxu1 %v8319_v13 }
  0xba   : > { %7043 = vmatprep.subr.msk.bf16.mxu1 %vm2135_vm4, %v8325_v60  ;;  %vm6773_vm4 = vcmask 523264  }
  0xbb   : > { %2159 = vmatpush2.bf16.msra.mxu0 %v8286_v52 }
  0xbc   : > { %2160 = vmatprep.subr.bf16.mxu0 %v8294_v62 }
  0xbd   : > { %2236 = vmatpush2.bf16.msra.mxu1 %v2137_v38 }
  0xbe   : > { %2463 = vmatprep.subr.bf16.mxu1 %v8348_v22 }
  0xbf   : > { %2161 = vmatpush2.bf16.msra.mxu0 %v8292_v63 }
  0xc0   : > { %2162 = vmatprep.subr.bf16.mxu0 %v8300_v56 }
  0xc3   : > { %2163 = vmatpush2.bf16.msra.mxu0 %v8298_v5 }
  0xc4   : > { %2164 = vmatprep.subr.bf16.mxu0 %v8306_v61 }
  0xc7   : > { %2165 = vmatpush2.bf16.msra.mxu0 %v8304_v7 }
  0xc8   : > { %2166 = vmatprep.subr.bf16.mxu0 %v8312_v30 }
  0xcb   : > { %2167 = vmatpush2.bf16.msra.mxu0 %v8310_v25 }
  0xcc   : > { %2168 = vmatprep.subr.bf16.mxu0 %v8318_v36 }
  0xcf   : > { %2169 = vmatpush2.bf16.msra.mxu0 %v8316_v33 }
  0xd0   : > { %2170 = vmatprep.subr.bf16.mxu0 %v8324_v39 }
  0xd3   : > { %2171 = vmatpush2.bf16.msra.mxu0 %v8322_v11 }
  0xd4   : > { %2172 = vmatprep.subr.bf16.mxu0 %v8329_v48 }
  0xd7   : > { %2173 = vmatpush2.bf16.msra.mxu0 %v8327_v37 }
  0xd8   : > { %2622 = vmatprep.subr.bf16.mxu0 %v8333_v57 }
 0x15a   : > { %v9738_v44 = vpop.f32.mrf.mxu0 }
 0x15c   : > { %v9743_v34 = vpop.f32.mrf.mxu1  ;;  %v9751_v15 = vpop.f32.mrf.mxu0 }
 0x15d   : > { %v8097_v35 = vpack.i.bf16 %v9743_v34, %v9751_v15 }
 0x15e   : > { %v9756_v27 = vpop.f32.mrf.mxu1  ;;  %v9760_v4 = vpop.f32.mrf.mxu0 }
 0x15f   : > { %v8102_v32 = vpack.i.bf16 %v9756_v27, %v9738_v44  ;;  %8098 = vrot.lane.b32.xlu0 %v8097_v35, %s11762_s21 }
 0x160   : > { %v9767_v20 = vpop.f32.mrf.mxu1  ;;  %v9777_v3 = vpop.f32.mrf.mxu0 }
 0x161   : > { %8103 = vrot.lane.b32.xlu1 %v8102_v32, %s11762_s21  ;;  %v8127_v24 = vpack.i.bf16 %v9767_v20, %v9777_v3 }
 0x162   : > { %v9782_v12 = vpop.f32.mrf.mxu1  ;;  %v9784_v28 = vpop.f32.mrf.mxu0 }
 0x163   : > { %v8122_v42 = vpack.i.bf16 %v9782_v12, %v9760_v4  ;;  %8108 = vrot.lane.b32.xlu0 %v8097_v35, %s11764_s30 }
 0x164   : > { %v9794_v47 = vpop.f32.mrf.mxu1  ;;  %v9801_v2 = vpop.f32.mrf.mxu0 }
 0x165   : > { %8123 = vrot.lane.b32.xlu1 %v8122_v42, %s11762_s21  ;;  %v8137_v53 = vpack.i.bf16 %v9794_v47, %v9801_v2 }
 0x166   : > { %v9808_v40 = vpop.f32.mrf.mxu1  ;;  %v9810_v1 = vpop.f32.mrf.mxu0 }
 0x167   : > { %8113 = vrot.lane.b32.xlu0 %v8102_v32, %s11764_s30  ;;  %v8142_v58 = vpack.i.bf16 %v9808_v40, %v9784_v28 }
 0x168   : > { %v9814_v10 = vpop.f32.mrf.mxu1  ;;  %v9816_v26 = vpop.f32.mrf.mxu0 }
 0x169   : > { %8128 = vrot.lane.b32.xlu1 %v8127_v24, %s11764_s30  ;;  %v8157_v21 = vpack.i.bf16 %v9814_v10, %v9816_v26 }
 0x16a   : > { %v9824_v41 = vpop.f32.mrf.mxu1  ;;  %v9827_v54 = vpop.f32.mrf.mxu0 }
 0x16b   : > { %8118 = vrot.lane.b32.xlu0 %v8127_v24, %s11762_s21  ;;  %v8162_v49 = vpack.i.bf16 %v9824_v41, %v9810_v1 }
 0x16c   : > { %v9835_v9 = vpop.f32.mrf.mxu1  ;;  %v9837_v14 = vpop.f32.mrf.mxu0 }
 0x16d   : > { %8133 = vrot.lane.b32.xlu1 %v8122_v42, %s11764_s30  ;;  %v8177_v16 = vpack.i.bf16 %v9835_v9, %v9837_v14 }
 0x16e   : > { %v9840_v50 = vpop.f32.mrf.mxu1  ;;  %v9843_v43 = vpop.f32.mrf.mxu0 }
 0x16f   : > { %8138 = vrot.lane.b32.xlu0 %v8137_v53, %s11762_s21  ;;  %v8182_v23 = vpack.i.bf16 %v9840_v50, %v9827_v54 }
 0x170   : > { %v9846_v51 = vpop.f32.mrf.mxu1  ;;  %v9848_v45 = vpop.f32.mrf.mxu0 }
 0x171   : > { %8158 = vrot.lane.b32.xlu1 %v8157_v21, %s11762_s21  ;;  %v8197_v46 = vpack.i.bf16 %v9846_v51, %v9848_v45 }
 0x172   : > { %v9856_v55 = vpop.f32.mrf.mxu1 }
 0x173   : > { %8143 = vrot.lane.b32.xlu0 %v8142_v58, %s11762_s21  ;;  %v8202_v18 = vpack.i.bf16 %v9856_v55, %v9843_v43 }
 0x175   : > { %8163 = vrot.lane.b32.xlu1 %v8162_v49, %s11762_s21 }
 0x177   : > { %8148 = vrot.lane.b32.xlu0 %v8137_v53, %s11764_s30 }
 0x179   : > { %8168 = vrot.lane.b32.xlu1 %v8157_v21, %s11764_s30 }
 0x17b   : > { %8153 = vrot.lane.b32.xlu0 %v8142_v58, %s11764_s30 }
 0x17d   : > { %8173 = vrot.lane.b32.xlu1 %v8162_v49, %s11764_s30 }
 0x17f   : > { %8178 = vrot.lane.b32.xlu0 %v8177_v16, %s11762_s21 }
 0x181   : > { %8198 = vrot.lane.b32.xlu1 %v8197_v46, %s11762_s21 }
 0x183   : > { %8183 = vrot.lane.b32.xlu0 %v8182_v23, %s11762_s21 }
 0x185   : > { %8203 = vrot.lane.b32.xlu1 %v8202_v18, %s11762_s21  ;;  %s7742_s21 = sshll.u32 %s8947_s3, 4  ;;  %s8748_s3 = scalar_lea.vmem %s11691_s0, 16 }
 0x186   : > { %p8749_p11 = scmp.ne.s32.totalorder %s11691_s0, %s8748_s3 }
 0x187   : > { %8188 = vrot.lane.b32.xlu0 %v8177_v16, %s11764_s30 }
 0x188   : > { %p8750_p12 = pnand %p8749_p11, %p8964_p5 }
 0x189   : > { %8208 = vrot.lane.b32.xlu1 %v8197_v46, %s11764_s30 }
 0x18a   : > { %p8751_p13 = pneg %p8750_p12 }
 0x18b   : > { %8193 = vrot.lane.b32.xlu0 %v8182_v23, %s11764_s30 }
 0x18d   : > { %8213 = vrot.lane.b32.xlu1 %v8202_v18, %s11764_s30 }
 0x1d1   : > { %v8099_v52 = vpop.permute.xlu0 %8098 }
 0x1d2   : > { %v8101_v56 = vunpack.i.h.bf16 %v8099_v52  ;;  %v8100_v5 = vunpack.i.l.bf16 %v8099_v52 }
 0x1d3   : > { %v8104_v62 = vpop.permute.xlu1 %8103 }
 0x1d4   : > { %v8106_v63 = vunpack.i.h.bf16 %v8104_v62  ;;  %v8105_v8 = vunpack.i.l.bf16 %v8104_v62  ;;  %v1635_v19 = vsel %vm1633_vm5, %v8100_v5, %v8101_v56 }
 0x1d5   : > { %v8109_v59 = vpop.permute.xlu0 %8108  ;;  %v1677_v39 = vmax.f32 %v9751_v15, %v1635_v19 }
 0x1d6   : > { %v1636_v7 = vsel %vm1633_vm5, %v8101_v56, %v8106_v63  ;;  %v1634_v6 = vsel %vm1633_vm5, %v8105_v8, %v8100_v5  ;;  %v8111_v30 = vunpack.i.h.bf16 %v8109_v59  ;;  %v8110_v25 = vunpack.i.l.bf16 %v8109_v59 }
 0x1d7   : > { %v8124_v61 = vpop.permute.xlu1 %8123  ;;  %v1679_v32 = vmax.f32 %v9756_v27, %v8106_v63  ;;  %v1678_v0 = vmax.f32 %v9743_v34, %v1636_v7  ;;  %v1676_v13 = vmax.f32 %v9738_v44, %v1634_v6 }
 0x1d8   : > { %v8126_v17 = vunpack.i.h.bf16 %v8124_v61  ;;  %v1750_v11 = vsel %vm1748_vm6, %v8110_v25, %v8111_v30  ;;  %v8125_v60 = vunpack.i.l.bf16 %v8124_v61 }
 0x1d9   : > { %v8114_v31 = vpop.permute.xlu0 %8113 }
 0x1da   : > { %v8116_v36 = vunpack.i.h.bf16 %v8114_v31  ;;  %v8115_v33 = vunpack.i.l.bf16 %v8114_v31  ;;  %v1683_v42 = vmax.f32 %v9782_v12, %v8126_v17 }
 0x1db   : > { %v8129_v35 = vpop.permute.xlu1 %8128 }
 0x1dc   : > { %v1749_v29 = vsel %vm1748_vm6, %v8115_v33, %v8110_v25  ;;  %v1751_v37 = vsel %vm1748_vm6, %v8111_v30, %v8116_v36  ;;  %v8131_v38 = vunpack.i.h.bf16 %v8129_v35  ;;  %v1794_v21 = vmax.f32 %v1679_v32, %v8116_v36 }
 0x1dd   : > { %v8119_v48 = vpop.permute.xlu0 %8118  ;;  %v8130_v34 = vunpack.i.l.bf16 %v8129_v35  ;;  %v1791_v49 = vmax.f32 %v1676_v13, %v1749_v29  ;;  %v1793_v46 = vmax.f32 %v1678_v0, %v1751_v37  ;;  %v8354_v0 = vld [vmem:[%s11787_s29 + $0xec] ss:$8 sps:$4 sm:$0xff]  }
 0x1de   : > { %v8121_v53 = vunpack.i.h.bf16 %v8119_v48  ;;  %v8120_v27 = vunpack.i.l.bf16 %v8119_v48  ;;  %v8352_v48 = vld [vmem:[%s11787_s29 + $0xe8] ss:$8 sps:$4 sm:$0xff]  }
 0x1df   : > { %v8134_v24 = vpop.permute.xlu1 %8133  ;;  %v1753_v8 = vsel %vm1748_vm6, %v8130_v34, %v8131_v38 }
 0x1e0   : > { %v8136_v58 = vunpack.i.h.bf16 %v8134_v24  ;;  %v8135_v44 = vunpack.i.l.bf16 %v8134_v24  ;;  %v1639_v15 = vsel %vm1633_vm5, %v8121_v53, %v8126_v17  ;;  %v1637_v16 = vsel %vm1633_vm5, %v8125_v60, %v8120_v27 }
 0x1e1   : > { %v1638_v12 = vsel %vm1633_vm5, %v8120_v27, %v8121_v53  ;;  %v1682_v57 = vmax.f32 %v9767_v20, %v1639_v15  ;;  %v8139_v22 = vpop.permute.xlu0 %8138  ;;  %v1680_v52 = vmax.f32 %v9760_v4, %v1637_v16  ;;  %v8346_v20 = vld [vmem:[%s11787_s29 + $0xf8] ss:$8 sps:$4 sm:$0xff]   ;;  %v1792_v17 = vmax.f32 %v1677_v39, %v1750_v11  ;;  %v8336_v11 = vld [vmem:[%s11787_s29 + $0x64] ss:$8 sps:$4 sm:$0xff]  }
 0x1e2   : > { %v1798_v23 = vmax.f32 %v1683_v42, %v8136_v58  ;;  %v1754_v18 = vsel %vm1748_vm6, %v8131_v38, %v8136_v58  ;;  %v1681_v62 = vmax.f32 %v9777_v3, %v1638_v12  ;;  %v8141_v63 = vunpack.i.h.bf16 %v8139_v22  ;;  %v8331_v42 = vld [vmem:[%s11787_s29 + $0x70] ss:$8 sps:$4 sm:$0xff]  }
 0x1e3   : > { %v8140_v56 = vunpack.i.l.bf16 %v8139_v22  ;;  %v8159_v5 = vpop.permute.xlu1 %8158  ;;  %v1752_v61 = vsel %vm1748_vm6, %v8135_v44, %v8130_v34  ;;  %v1797_v7 = vmax.f32 %v1682_v57, %v1754_v18 }
 0x1e4   : > { %v1868_v59 = vpack.c.bf16 %v1798_v23, %v1794_v21  ;;  %v1795_v19 = vmax.f32 %v1680_v52, %v1752_v61  ;;  %v8161_v6 = vunpack.i.h.bf16 %v8159_v5  ;;  %v8160_v30 = vunpack.i.l.bf16 %v8159_v5 }
 0x1e5   : > { %v1796_v25 = vmax.f32 %v1681_v62, %v1753_v8  ;;  %v1867_v4 = vpack.c.bf16 %v1797_v7, %v1793_v46  ;;  %v8144_v3 = vpop.permute.xlu0 %8143  ;;  %v1641_v36 = vsel %vm1633_vm5, %v8140_v56, %v8141_v63 }
 0x1e6   : > { %7044 = vmatprep.mubr.msk.bf16.mxu1 %vm2125_vm7, %v1868_v59  ;;  %v1865_v31 = vpack.c.bf16 %v1795_v19, %v1791_v49  ;;  %v8146_v33 = vunpack.i.h.bf16 %v8144_v3  ;;  %v8145_v35 = vunpack.i.l.bf16 %v8144_v3  ;;  %v1644_v60 = vsel %vm1633_vm5, %v8160_v30, %v8161_v6 }
 0x1e7   : > { %v8164_v32 = vpop.permute.xlu1 %8163  ;;  %v1866_v13 = vpack.c.bf16 %v1796_v25, %v1792_v17  ;;  %2238 = vmatmul.mubr.bf16.vlgmr.msra.gmra.mxu1 %v1867_v4  ;;  %v1685_v37 = vmax.f32 %v9801_v2, %v1641_v36  ;;  %v1689_v58 = vmax.f32 %v9816_v26, %v1644_v60  ;;  %v8334_v2 = vld [vmem:[%s11787_s29 + $0x60] ss:$8 sps:$4 sm:$0xff]   ;;  %v8339_v26 = vld [vmem:[%s11787_s29 + $0x54] ss:$8 sps:$4 sm:$0xff]  }
 0x1e8   : > { %v8166_v29 = vunpack.i.h.bf16 %v8164_v32  ;;  %v8165_v39 = vunpack.i.l.bf16 %v8164_v32  ;;  %2464 = vmatpush1.bf16.msra.mxu1 %v8346_v20  ;;  %v1640_v24 = vsel %vm1633_vm5, %v8145_v35, %v8140_v56  ;;  %v1642_v53 = vsel %vm1633_vm5, %v8141_v63, %v8146_v33  ;;  %v8340_v32 = vld [vmem:[%s11787_s29 + $0x40] ss:$8 sps:$4 sm:$0xff]  }
 0x1e9   : > { %2174 = vmatprep.mubr.bf16.mxu0 %v1866_v13  ;;  %v8149_v38 = vpop.permute.xlu0 %8148  ;;  %2465 = vmatprep.subr.bf16.mxu1 %v8354_v0  ;;  %v1687_v44 = vmax.f32 %v9808_v40, %v8146_v33  ;;  %v1684_v40 = vmax.f32 %v9784_v28, %v1640_v24  ;;  %v1686_v23 = vmax.f32 %v9794_v47, %v1642_v53  ;;  %v8337_v28 = vld [vmem:[%s11787_s29 + $0x50] ss:$8 sps:$4 sm:$0xff]  }
 0x1ea   : > { %2175 = vmatmul.mubr.bf16.vlgmr.msra.gmra.mxu0 %v1865_v31  ;;  %v8151_v27 = vunpack.i.h.bf16 %v8149_v38  ;;  %v8150_v21 = vunpack.i.l.bf16 %v8149_v38  ;;  %v1643_v16 = vsel %vm1633_vm5, %v8165_v39, %v8160_v30  ;;  %v1645_v12 = vsel %vm1633_vm5, %v8161_v6, %v8166_v29  ;;  %v8343_v24 = vld [vmem:[%s11787_s29 + $0x30] ss:$8 sps:$4 sm:$0xff]  }
 0x1eb   : > { %v8169_v34 = vpop.permute.xlu1 %8168  ;;  %2623 = vmatpush1.bf16.msra.mxu0 %v8331_v42  ;;  %v1691_v52 = vmax.f32 %v9824_v41, %v8166_v29  ;;  %v1688_v8 = vmax.f32 %v9810_v1, %v1643_v16  ;;  %v1690_v59 = vmax.f32 %v9814_v10, %v1645_v12  ;;  %v8342_v1 = vld [vmem:[%s11787_s29 + $0x44] ss:$8 sps:$4 sm:$0xff]   ;;  %v8345_v29 = vld [vmem:[%s11787_s29 + $0x34] ss:$8 sps:$4 sm:$0xff]  }
 0x1ec   : > { %v8171_v49 = vunpack.i.h.bf16 %v8169_v34  ;;  %v8170_v15 = vunpack.i.l.bf16 %v8169_v34  ;;  %v1756_v46 = vsel %vm1748_vm6, %v8150_v21, %v8151_v27  ;;  %2624 = vmatprep.subr.bf16.mxu0 %v8336_v11  ;;  %2466 = vmatpush1.bf16.msra.mxu1 %v8352_v48 }
 0x1ed   : > { %v8154_v57 = vpop.permute.xlu0 %8153  ;;  %v1800_v22 = vmax.f32 %v1685_v37, %v1756_v46 }
 0x1ee   : > { %v1759_v18 = vsel %vm1748_vm6, %v8170_v15, %v8171_v49  ;;  %v8156_v62 = vunpack.i.h.bf16 %v8154_v57  ;;  %v8155_v63 = vunpack.i.l.bf16 %v8154_v57 }
 0x1ef   : > { %v8174_v56 = vpop.permute.xlu1 %8173  ;;  %v1804_v5 = vmax.f32 %v1689_v58, %v1759_v18  ;;  %2625 = vmatpush1.bf16.msra.mxu0 %v8334_v2  ;;  %v8351_v58 = vld [vmem:[%s11787_s29 + $0x24] ss:$8 sps:$4 sm:$0xff]   ;;  %v8349_v18 = vld [vmem:[%s11787_s29 + $0x20] ss:$8 sps:$4 sm:$0xff]  }
 0x1f0   : > { %v8176_v61 = vunpack.i.h.bf16 %v8174_v56  ;;  %v8175_v7 = vunpack.i.l.bf16 %v8174_v56  ;;  %v1755_v47 = vsel %vm1748_vm6, %v8155_v63, %v8150_v21  ;;  %v1757_v19 = vsel %vm1748_vm6, %v8151_v27, %v8156_v62  ;;  %2626 = vmatprep.subr.bf16.mxu0 %v8339_v26 }
 0x1f1   : > { %v1802_v41 = vmax.f32 %v1687_v44, %v8156_v62  ;;  %v1870_v6 = vpack.c.bf16 %v1804_v5, %v1800_v22  ;;  %v8179_v20 = vpop.permute.xlu0 %8178  ;;  %v1799_v4 = vmax.f32 %v1684_v40, %v1755_v47  ;;  %v1801_v31 = vmax.f32 %v1686_v23, %v1757_v19 }
 0x1f2   : > { %v1758_v10 = vsel %vm1748_vm6, %v8175_v7, %v8170_v15  ;;  %v1760_v30 = vsel %vm1748_vm6, %v8171_v49, %v8176_v61  ;;  %v1806_v25 = vmax.f32 %v1691_v52, %v8176_v61  ;;  %v8181_v33 = vunpack.i.h.bf16 %v8179_v20 }
 0x1f3   : > { %2184 = vmatprep.mubr.bf16.mxu0 %v1870_v6  ;;  %v8199_v3 = vpop.permute.xlu1 %8198  ;;  %v1803_v17 = vmax.f32 %v1688_v8, %v1758_v10  ;;  %v1805_v35 = vmax.f32 %v1690_v59, %v1760_v30  ;;  %2627 = vmatpush1.bf16.msra.mxu0 %v8337_v28  ;;  %v8180_v0 = vunpack.i.l.bf16 %v8179_v20 }
 0x1f4   : > { %v1872_v36 = vpack.c.bf16 %v1806_v25, %v1802_v41  ;;  %v8201_v13 = vunpack.i.h.bf16 %v8199_v3  ;;  %v8200_v42 = vunpack.i.l.bf16 %v8199_v3  ;;  %2628 = vmatprep.subr.bf16.mxu0 %v8342_v1 }
 0x1f5   : > { %v1869_v60 = vpack.c.bf16 %v1803_v17, %v1799_v4  ;;  %v1871_v39 = vpack.c.bf16 %v1805_v35, %v1801_v31  ;;  %v8184_v11 = vpop.permute.xlu0 %8183  ;;  %v1647_v53 = vsel %vm1633_vm5, %v8180_v0, %v8181_v33  ;;  %v8355_v31 = vld [vmem:[%s11787_s29 + $0x10] ss:$8 sps:$4 sm:$0xff]  }
 0x1f6   : > { %7045 = vmatprep.mubr.msk.bf16.mxu1 %vm2125_vm7, %v1872_v36  ;;  %v8186_v48 = vunpack.i.h.bf16 %v8184_v11  ;;  %v8185_v37 = vunpack.i.l.bf16 %v8184_v11  ;;  %v1650_v27 = vsel %vm1633_vm5, %v8200_v42, %v8201_v13  ;;  %v1693_v46 = vmax.f32 %v9837_v14, %v1647_v53  ;;  %v8357_v36 = vld [vmem:[%s11787_s29 + $0x14] ss:$8 sps:$4 sm:$0xff]   ;;  %v8358_v35 = vld [vmem:[%s11787_s29 + $0xd8] ss:$8 sps:$4 sm:$0xff]   ;;  %v8375_v53 = vld [vmem:[%s11787_s29 + $0xa8] ss:$8 sps:$4 sm:$0xff]  }
 0x1f7   : > { %2185 = vmatmul.mubr.bf16.gmra.mxu0 %v1869_v60  ;;  %v8204_v38 = vpop.permute.xlu1 %8203  ;;  %2248 = vmatmul.mubr.bf16.gmra.mxu1 %v1871_v39  ;;  %v1697_v26 = vmax.f32 %v9848_v45, %v1650_v27  ;;  %v2284_v60 = vld [vmem:[%s11787_s29 + $0x80] sm:$0x33] }
 0x1f8   : > { %2629 = vmatpush1.bf16.msra.mxu0 %v8340_v32  ;;  %v8206_v21 = vunpack.i.h.bf16 %v8204_v38  ;;  %v8205_v34 = vunpack.i.l.bf16 %v8204_v38  ;;  %v1646_v49 = vsel %vm1633_vm5, %v8185_v37, %v8180_v0  ;;  %v1648_v15 = vsel %vm1633_vm5, %v8181_v33, %v8186_v48  ;;  %v8360_v33 = vld [vmem:[%s11787_s29 + $0xdc] ss:$8 sps:$4 sm:$0xff]   ;;  %v8361_v0 = vld [vmem:[%s11787_s29] ss:$8 sps:$4 sm:$0xff]   ;;  %v8374_v38 = vld [vmem:[%s11787_s29 + $0x20c] ss:$8 sps:$4 sm:$0xff]  }
 0x1f9   : > { %2630 = vmatprep.subr.bf16.mxu0 %v8345_v29  ;;  %v8189_v44 = vpop.permute.xlu0 %8188  ;;  %v1695_v57 = vmax.f32 %v9840_v50, %v8186_v48  ;;  %v1692_v14 = vmax.f32 %v9827_v54, %v1646_v49  ;;  %v1694_v45 = vmax.f32 %v9835_v9, %v1648_v15  ;;  %2467 = vmatprep.subr.bf16.mxu1 %v8360_v33  ;;  %v8363_v32 = vld [vmem:[%s11787_s29 + $0x4] ss:$8 sps:$4 sm:$0xff]   ;;  %v8369_v37 = vld [vmem:[%s11787_s29 + $0xb8] ss:$8 sps:$4 sm:$0xff]  }
 0x1fa   : > { %v8191_v2 = vunpack.i.h.bf16 %v8189_v44  ;;  %v8190_v16 = vunpack.i.l.bf16 %v8189_v44  ;;  %v1649_v22 = vsel %vm1633_vm5, %v8205_v34, %v8200_v42  ;;  %v1651_v52 = vsel %vm1633_vm5, %v8201_v13, %v8206_v21  ;;  %2468 = vmatpush1.bf16.msra.mxu1 %v8358_v35  ;;  %v8366_v13 = vld [vmem:[%s11787_s29 + $0xcc] ss:$8 sps:$4 sm:$0xff]   ;;  %v8364_v42 = vld [vmem:[%s11787_s29 + $0xc8] ss:$8 sps:$4 sm:$0xff]   ;;  %v8371_v48 = vld [vmem:[%s11787_s29 + $0xbc] ss:$8 sps:$4 sm:$0xff]  }
 0x1fb   : > { %v8209_v12 = vpop.permute.xlu1 %8208  ;;  %v1699_v8 = vmax.f32 %v9856_v55, %v8206_v21  ;;  %v1696_v28 = vmax.f32 %v9843_v43, %v1649_v22  ;;  %v1698_v47 = vmax.f32 %v9846_v51, %v1651_v52  ;;  %2469 = vmatprep.subr.bf16.mxu1 %v8366_v13  ;;  %v7103_v29 = vcombine.high %v2284_v60, %v2284_v60  ;;  %v8383_v27 = vld [vmem:[%s11787_s29 + $0x9c] ss:$8 sps:$4 sm:$0xff]   ;;  %v8381_v21 = vld [vmem:[%s11787_s29 + $0x98] ss:$8 sps:$4 sm:$0xff]   ;;  %v8389_v34 = vld [vmem:[%s11787_s29 + $0x8c] ss:$8 sps:$4 sm:$0xff]  }
 0x1fc   : > { %v8211_v40 = vunpack.i.h.bf16 %v8209_v12  ;;  %v8210_v23 = vunpack.i.l.bf16 %v8209_v12  ;;  %2631 = vmatpush1.bf16.msra.mxu0 %v8343_v24  ;;  %v1762_v62 = vsel %vm1748_vm6, %v8190_v16, %v8191_v2  ;;  %v7102_v39 = vcombine.low %v2284_v60, %v2284_v60  ;;  %v8377_v24 = vld [vmem:[%s11787_s29 + $0xac] ss:$8 sps:$4 sm:$0xff]  }
 0x1fd   : > { %2632 = vmatprep.subr.bf16.mxu0 %v8351_v58  ;;  %v8194_v56 = vpop.permute.xlu0 %8193  ;;  %v1808_v5 = vmax.f32 %v1693_v46, %v1762_v62  ;;  %v8387_v58 = vld [vmem:[%s11787_s29 + $0x88] ss:$8 sps:$4 sm:$0xff]  }
 0x1fe   : > { %v1765_v63 = vsel %vm1748_vm6, %v8210_v23, %v8211_v40  ;;  %v8196_v59 = vunpack.i.h.bf16 %v8194_v56  ;;  %v8195_v61 = vunpack.i.l.bf16 %v8194_v56  ;;  %2470 = vmatpush1.bf16.msra.mxu1 %v8364_v42  ;;  %v2617_v11 = vsel %vm2456_vm8, %v7102_v39, 0  ;;  %v7063_v44 = vld [vmem:[%s11787_s29 + $0x108] sm:$0x33] }
 0x1ff   : > { %v8214_v50 = vpop.permute.xlu1 %8213  ;;  %v1812_v7 = vmax.f32 %v1697_v26, %v1765_v63  ;;  %2471 = vmatprep.subr.bf16.mxu1 %v8371_v48  ;;  %v7081_v49 = vcombine.high %v7063_v44, %v7063_v44  ;;  %v7080_v15 = vcombine.low %v7063_v44, %v7063_v44  ;;  %v8372_v56 = vld [vmem:[%s11787_s29 + $0x208] ss:$8 sps:$4 sm:$0xff]   ;;  %v8403_v48 = vld [vmem:[%s11787_s29 + $0x1bc] ss:$8 sps:$4 sm:$0xff]  }
 0x200   : > { %v8216_v19 = vunpack.i.h.bf16 %v8214_v50  ;;  %v8215_v41 = vunpack.i.l.bf16 %v8214_v50  ;;  %2633 = vmatpush1.bf16.msra.mxu0 %v8349_v18  ;;  %v1761_v54 = vsel %vm1748_vm6, %v8195_v61, %v8190_v16  ;;  %v1763_v9 = vsel %vm1748_vm6, %v8191_v2, %v8196_v59  ;;  %v8400_v16 = vld [vmem:[%s11787_s29 + $0x184] ss:$8 sps:$4 sm:$0xff]   ;;  %v8378_v50 = vld [vmem:[%s11787_s29 + $0x1f8] ss:$8 sps:$4 sm:$0xff]   ;;  %v8395_v42 = vld [vmem:[%s11787_s29 + $0x1c8] ss:$8 sps:$4 sm:$0xff]  }
 0x201   : > { %v1810_v6 = vmax.f32 %v1695_v57, %v8196_v59  ;;  %v1874_v1 = vpack.c.bf16 %v1812_v7, %v1808_v5  ;;  %v1807_v25 = vmax.f32 %v1692_v14, %v1761_v54  ;;  %v1809_v43 = vmax.f32 %v1694_v45, %v1763_v9  ;;  %2634 = vmatprep.subr.bf16.mxu0 %v8357_v36  ;;  %v8384_v54 = vld [vmem:[%s11787_s29 + $0x1e8] ss:$8 sps:$4 sm:$0xff]  }
 0x202   : > { %v1764_v10 = vsel %vm1748_vm6, %v8215_v41, %v8210_v23  ;;  %v1766_v55 = vsel %vm1748_vm6, %v8211_v40, %v8216_v19  ;;  %v1814_v30 = vmax.f32 %v1699_v8, %v8216_v19  ;;  %2472 = vmatpush1.bf16.msra.mxu1 %v8369_v37  ;;  %v2458_v2 = vsel %vm2456_vm8, %v7080_v15, 0  ;;  %v8380_v8 = vld [vmem:[%s11787_s29 + $0x1fc] ss:$8 sps:$4 sm:$0xff]  }
 0x203   : > { %2194 = vmatprep.mubr.bf16.mxu0 %v1874_v1  ;;  %v1811_v20 = vmax.f32 %v1696_v28, %v1764_v10  ;;  %v1813_v4 = vmax.f32 %v1698_v47, %v1766_v55  ;;  %2473 = vmatprep.subr.bf16.mxu1 %v8377_v24  ;;  %v8386_v28 = vld [vmem:[%s11787_s29 + $0x1ec] ss:$8 sps:$4 sm:$0xff]   ;;  %v8392_v10 = vld [vmem:[%s11787_s29 + $0x1dc] ss:$8 sps:$4 sm:$0xff]  }
 0x204   : > { %v1876_v51 = vpack.c.bf16 %v1814_v30, %v1810_v6  ;;  %2635 = vmatpush1.bf16.msra.mxu0 %v8355_v31 }
 0x205   : > { %v1873_v3 = vpack.c.bf16 %v1811_v20, %v1807_v25  ;;  %v1875_v17 = vpack.c.bf16 %v1813_v4, %v1809_v43  ;;  %2636 = vmatprep.subr.bf16.mxu0 %v8363_v32 }
 0x206   : > { %7046 = vmatprep.mubr.msk.bf16.mxu1 %vm2125_vm7, %v1876_v51  ;;  %2474 = vmatpush1.bf16.msra.mxu1 %v8375_v53  ;;  %v8390_v51 = vld [vmem:[%s11787_s29 + $0x1d8] ss:$8 sps:$4 sm:$0xff]  }
 0x207   : > { %2195 = vmatmul.mubr.bf16.gmra.mxu0 %v1873_v3  ;;  %2258 = vmatmul.mubr.bf16.gmra.mxu1 %v1875_v17  ;;  %v8397_v17 = vld [vmem:[%s11787_s29 + $0x1cc] ss:$8 sps:$4 sm:$0xff]  }
 0x208   : > { %2637 = vmatpush1.bf16.msra.mxu0 %v8361_v0  ;;  %2475 = vmatprep.subr.bf16.mxu1 %v8383_v27 }
 0x209   : > { %7104 = vmatprep.subr.msk.bf16.mxu0 %vm2456_vm8, %v7103_v29 }
 0x20a   : > { %2476 = vmatpush1.bf16.msra.mxu1 %v8381_v21 }
 0x20b   : > { %2477 = vmatprep.subr.bf16.mxu1 %v8389_v34  ;;  %v8406_v34 = vld [vmem:[%s11787_s29 + $0x174] ss:$8 sps:$4 sm:$0xff]  }
 0x20c   : > { %2653 = vmatpush2.bf16.msra.mxu0 %v2617_v11 }
 0x20d   : > { %3036 = vmatprep.subr.bf16.mxu0 %v8374_v38  ;;  %v8398_v38 = vld [vmem:[%s11787_s29 + $0x180] ss:$8 sps:$4 sm:$0xff]  }
 0x20e   : > { %2478 = vmatpush1.bf16.msra.mxu1 %v8387_v58 }
 0x20f   : > { %7082 = vmatprep.subr.msk.bf16.mxu1 %vm2456_vm8, %v7081_v49 }
 0x212   : > { %2494 = vmatpush2.bf16.msra.mxu1 %v2458_v2  ;;  %v8401_v2 = vld [vmem:[%s11787_s29 + $0x1b8] ss:$8 sps:$4 sm:$0xff]  }
 0x213   : > { %2821 = vmatprep.subr.bf16.mxu1 %v8400_v16 }
 0x2a7   : > { %v2239_v12 = vpop.f32.mrf.mxu1 }
 0x2a9   : > { %v2241_v46 = vpop.f32.mrf.mxu1 }
 0x2aa   : > { %v2176_v26 = vpop.f32.mrf.mxu0 }
 0x2ab   : > { %v2243_v40 = vpop.f32.mrf.mxu1  ;;  %v2240_v45 = vadd.f32 %v2239_v12, %v2176_v26  ;;  %v8409_v26 = vld [vmem:[%s11787_s29 + $0x1ac] ss:$8 sps:$4 sm:$0xff]  }
 0x2ac   : > { %v2178_v23 = vpop.f32.mrf.mxu0 }
 0x2ad   : > { %v2245_v57 = vpop.f32.mrf.mxu1  ;;  %v2242_v62 = vadd.f32 %v2241_v46, %v2178_v23 }
 0x2ae   : > { %v2180_v18 = vpop.f32.mrf.mxu0 }
 0x2af   : > { %v2244_v22 = vadd.f32 %v2243_v40, %v2180_v18 }
 0x2b0   : > { %v2182_v52 = vpop.f32.mrf.mxu0 }
 0x2b1   : > { %v2246_v14 = vadd.f32 %v2245_v57, %v2182_v52  ;;  %v10050_v5 = vpack.c.bf16 %v2244_v22, %v2240_v45  ;;  %v8404_v57 = vld [vmem:[%s11787_s29 + $0x170] ss:$8 sps:$4 sm:$0xff]  }
 0x2b3   : > { %v10045_v63 = vpack.c.bf16 %v2246_v14, %v2242_v62  ;;  %v2315_v25 = vshll.u32 %v10050_v5, 16  ;;  %v2313_v60 = vshrl.u32 %v10050_v5, 16  ;;  %v3126_v37 = vrot.slane %v10050_v5, 2  ;;  %v8412_v62 = vld [vmem:[%s11787_s29 + $0x164] ss:$8 sps:$4 sm:$0xff]  }
 0x2b5   : > { %7105 = vmatprep.mubr.msk.bf16.mxu0 %vm2446_vm9, %v10045_v63  ;;  %v2327_v55 = vshll.u32 %v10045_v63, 16  ;;  %v2317_v33 = vrot.slane %v2315_v25, 1  ;;  %v2325_v35 = vshrl.u32 %v10045_v63, 16 }
 0x2b6   : > { %2655 = vmatmul.mubr.bf16.vlgmr.msra.gmra.mxu0 %v10050_v5 }
 0x2b7   : > { %v2186_v59 = vpop.f32.mrf.mxu0  ;;  %3037 = vmatpush1.bf16.msra.mxu0 %v8372_v56  ;;  %v2249_v61 = vpop.f32.mrf.mxu1  ;;  %v2329_v31 = vrot.slane %v2327_v55, 1  ;;  %v2318_v24 = vor.u32 %v2317_v33, %v2313_v60  ;;  %v2918_v40 = vrot.slane %v2325_v35, 1  ;;  %v2919_v23 = vrot.slane %v2327_v55, 2  ;;  %v8413_v55 = vld [vmem:[%s11787_s29 + $0x198] ss:$8 sps:$4 sm:$0xff]  }
 0x2b8   : > { %3038 = vmatprep.subr.bf16.mxu0 %v8380_v8  ;;  %v2250_v9 = vadd.f32 %v2249_v61, %v2186_v59  ;;  %v8407_v8 = vld [vmem:[%s11787_s29 + $0x1a8] ss:$8 sps:$4 sm:$0xff]  }
 0x2b9   : > { %v2188_v7 = vpop.f32.mrf.mxu0  ;;  %v2251_v47 = vpop.f32.mrf.mxu1  ;;  %v2330_v39 = vor.u32 %v2329_v31, %v2325_v35  ;;  %v8416_v31 = vld [vmem:[%s11787_s29 + $0x150] ss:$8 sps:$4 sm:$0xff]  }
 0x2ba   : > { %v2252_v20 = vadd.f32 %v2251_v47, %v2188_v7  ;;  %v2920_v7 = vor.u32 %v2919_v23, %v2918_v40  ;;  %v8429_v40 = vld [vmem:[%s11787_s29 + $0x124] ss:$8 sps:$4 sm:$0xff]  }
 0x2bb   : > { %v2190_v19 = vpop.f32.mrf.mxu0  ;;  %3039 = vmatpush1.bf16.msra.mxu0 %v8378_v50  ;;  %v2253_v41 = vpop.f32.mrf.mxu1 }
 0x2bc   : > { %v2254_v6 = vadd.f32 %v2253_v41, %v2190_v19  ;;  %3040 = vmatprep.subr.bf16.mxu0 %v8386_v28  ;;  %v8415_v28 = vld [vmem:[%s11787_s29 + $0x19c] ss:$8 sps:$4 sm:$0xff]  }
 0x2bd   : > { %v2192_v1 = vpop.f32.mrf.mxu0  ;;  %v2255_v30 = vpop.f32.mrf.mxu1 }
 0x2be   : > { %v10072_v43 = vpack.c.bf16 %v2254_v6, %v2250_v9  ;;  %v2256_v4 = vadd.f32 %v2255_v30, %v2192_v1  ;;  %v7163_v9 = vld [vmem:[%s11787_s29 + $0x218] sm:$0x33] }
 0x2bf   : > { %3041 = vmatpush1.bf16.msra.mxu0 %v8384_v54  ;;  %v8410_v54 = vld [vmem:[%s11787_s29 + $0x160] ss:$8 sps:$4 sm:$0xff]   ;;  %v8418_v1 = vld [vmem:[%s11787_s29 + $0x154] ss:$8 sps:$4 sm:$0xff]  }
 0x2c0   : > { %v10077_v3 = vpack.c.bf16 %v2256_v4, %v2252_v20  ;;  %3042 = vmatprep.subr.bf16.mxu0 %v8392_v10  ;;  %v2320_v36 = vshll.u32 %v10072_v43, 16  ;;  %v3127_v13 = vrot.slane %v10072_v43, 2  ;;  %v2336_v47 = vshrl.u32 %v10072_v43, 16 }
 0x2c1   : > { %v7181_v20 = vcombine.high %v7163_v9, %v7163_v9  ;;  %v7180_v4 = vcombine.low %v7163_v9, %v7163_v9  ;;  %v8440_v9 = vld [vmem:[%s11787_s29 + $0x284] ss:$8 sps:$4 sm:$0xff]  }
 0x2c2   : > { %7106 = vmatprep.mubr.msk.bf16.mxu0 %vm2446_vm9, %v10077_v3  ;;  %v2332_v32 = vshll.u32 %v10077_v3, 16  ;;  %v2344_v0 = vshrl.u32 %v10077_v3, 16  ;;  %v10097_v29 = vrot.slane %v2320_v36, 1  ;;  %v10121_v49 = vsel %vm1074_vm2, %v3126_v37, %v3127_v13 }
 0x2c3   : > { %3043 = vmatpush1.bf16.msra.mxu0 %v8390_v51  ;;  %v2914_v51 = vrot.slane %v2336_v47, 1  ;;  %v2712_v23 = vrot.slane %v10077_v3, 1 }
 0x2c4   : > { %2665 = vmatmul.mubr.bf16.gmra.mxu0 %v10072_v43  ;;  %3044 = vmatprep.subr.bf16.mxu0 %v8397_v17  ;;  %v10100_v11 = vrot.slane %v2332_v32, 1  ;;  %v2921_v58 = vrot.slane %v2344_v0, 1  ;;  %v2922_v44 = vrot.slane %v2332_v32, 2  ;;  %v2323_v15 = vsel %vm2311_vm10, %v2318_v24, %v10097_v29 }
 0x2c5   : > { %v2915_v17 = vrot.slane %v2320_v36, 2  ;;  %v2911_v36 = vrot.slane %v2313_v60, 1 }
 0x2c6   : > { %v2335_v21 = vsel %vm2311_vm10, %v2330_v39, %v10100_v11  ;;  %v10138_v14 = vor.u32 %v2922_v44, %v2921_v58  ;;  %v2346_v37 = vor.u32 %v2344_v0, %v10100_v11  ;;  %v8421_v58 = vld [vmem:[%s11787_s29 + $0x140] ss:$8 sps:$4 sm:$0xff]  }
 0x2c7   : > { %v2196_v53 = vpop.f32.mrf.mxu0  ;;  %v2259_v27 = vpop.f32.mrf.mxu1  ;;  %3045 = vmatpush1.bf16.msra.mxu0 %v8395_v42  ;;  %7083 = vmatprep.mubr.msk.bf16.mxu1 %vm2446_vm9, %v2335_v21  ;;  %v8423_v42 = vld [vmem:[%s11787_s29 + $0x144] ss:$8 sps:$4 sm:$0xff]   ;;  %v2338_v21 = vor.u32 %v2336_v47, %v10097_v29 }
 0x2c8   : > { %v2260_v16 = vadd.f32 %v2259_v27, %v2196_v53  ;;  %2496 = vmatmul.mubr.bf16.vlgmr.msra.gmra.mxu1 %v2323_v15  ;;  %3046 = vmatprep.subr.bf16.mxu0 %v8403_v48  ;;  %v2924_v6 = vsel %vm2910_vm11, %v2920_v7, %v10138_v14  ;;  %v2912_v48 = vrot.slane %v2315_v25, 2  ;;  %v3031_v27 = vsel %vm2456_vm8, %v7180_v4, 0  ;;  %v8426_v15 = vld [vmem:[%s11787_s29 + $0x134] ss:$8 sps:$4 sm:$0xff]  }
 0x2c9   : > { %v2198_v12 = vpop.f32.mrf.mxu0  ;;  %v2261_v46 = vpop.f32.mrf.mxu1  ;;  %2822 = vmatpush1.bf16.msra.mxu1 %v8398_v38  ;;  %v8437_v7 = vld [vmem:[%s11787_s29 + $0x294] ss:$8 sps:$4 sm:$0xff]  }
 0x2ca   : > { %v2262_v18 = vadd.f32 %v2261_v46, %v2198_v12  ;;  %2823 = vmatprep.subr.bf16.mxu1 %v8406_v34  ;;  %v2289_v59 = vpack.c.bf16 %v2260_v16, %v2260_v16  ;;  %v2916_v34 = vor.u32 %v2915_v17, %v2914_v51  ;;  %v8424_v12 = vld [vmem:[%s11787_s29 + $0x130] ss:$8 sps:$4 sm:$0xff]   ;;  %v8444_v51 = vld [vmem:[%s11787_s29 + $0x260] ss:$8 sps:$4 sm:$0xff]   ;;  %v8449_v17 = vld [vmem:[%s11787_s29 + $0x254] ss:$8 sps:$4 sm:$0xff]  }
 0x2cb   : > { %v2200_v22 = vpop.f32.mrf.mxu0  ;;  %v2263_v52 = vpop.f32.mrf.mxu1  ;;  %3047 = vmatpush1.bf16.msra.mxu0 %v8401_v2  ;;  %v2913_v2 = vor.u32 %v2912_v48, %v2911_v36  ;;  %v8455_v36 = vld [vmem:[%s11787_s29 + $0x234] ss:$8 sps:$4 sm:$0xff]   ;;  %v8458_v48 = vld [vmem:[%s11787_s29 + $0x224] ss:$8 sps:$4 sm:$0xff]  }
 0x2cc   : > { %v2290_v45 = vpack.c.bf16 %v2262_v18, %v2262_v18  ;;  %v2264_v56 = vadd.f32 %v2263_v52, %v2200_v22  ;;  %3048 = vmatprep.subr.bf16.mxu0 %v8409_v26  ;;  %v2711_v22 = vrot.slane %v10045_v63, 1 }
 0x2cd   : > { %v2202_v61 = vpop.f32.mrf.mxu0  ;;  %v2265_v50 = vpop.f32.mrf.mxu1  ;;  %2824 = vmatpush1.bf16.msra.mxu1 %v8404_v57 }
 0x2ce   : > { %v10147_v19 = vpack.c.bf16 %v2264_v56, %v2260_v16  ;;  %v2266_v41 = vadd.f32 %v2265_v50, %v2202_v61  ;;  %7107 = vmatprep.mubr.msk.bf16.mxu0 %vm2446_vm9, %v2290_v45  ;;  %2825 = vmatprep.subr.bf16.mxu1 %v8412_v62  ;;  %v8432_v62 = vld [vmem:[%s11787_s29 + $0x114] ss:$8 sps:$4 sm:$0xff]  }
 0x2cf   : > { %2675 = vmatmul.mubr.bf16.gmra.mxu0 %v2289_v59  ;;  %v7124_v45 = vld [vmem:[%s11787_s29 + $0x190] sm:$0x33] }
 0x2d0   : > { %v10161_v10 = vpack.c.bf16 %v2266_v41, %v2262_v18  ;;  %3049 = vmatpush1.bf16.msra.mxu0 %v8407_v8  ;;  %7183 = vmatprep.mubr.msk.bf16.mxu0 %vm2446_vm9, %v2924_v6  ;;  %v2340_v30 = vshll.u32 %v10147_v19, 16  ;;  %v3132_v32 = vrot.slane %v10147_v19, 2  ;;  %v2352_v60 = vshrl.u32 %v10147_v19, 16  ;;  %v8427_v18 = vld [vmem:[%s11787_s29 + $0x120] ss:$8 sps:$4 sm:$0xff]  }
 0x2d1   : > { %3050 = vmatprep.subr.bf16.mxu0 %v8415_v28  ;;  %2826 = vmatpush1.bf16.msra.mxu1 %v8410_v54  ;;  %v8430_v8 = vld [vmem:[%s11787_s29 + $0x110] ss:$8 sps:$4 sm:$0xff]   ;;  %v7142_v59 = vcombine.high %v7124_v45, %v7124_v45  ;;  %v7141_v61 = vcombine.low %v7124_v45, %v7124_v45  ;;  %v2709_v28 = vrot.slane %v10072_v43, 1  ;;  %v2708_v41 = vrot.slane %v10050_v5, 1  ;;  %v8438_v5 = vld [vmem:[%s11787_s29 + $0x280] ss:$8 sps:$4 sm:$0xff]  }
 0x2d2   : > { %v2348_v33 = vshll.u32 %v10161_v10, 16  ;;  %v2355_v35 = vshrl.u32 %v10161_v10, 16  ;;  %2827 = vmatprep.subr.bf16.mxu1 %v8418_v1  ;;  %v2342_v39 = vrot.slane %v2340_v30, 1  ;;  %v10199_v44 = vsel %vm1074_vm2, %v3127_v13, %v3132_v32  ;;  %v8435_v54 = vld [vmem:[%s11787_s29 + $0x290] ss:$8 sps:$4 sm:$0xff]  }
 0x2d3   : > { %v2917_v13 = vsel %vm2910_vm11, %v2913_v2, %v2916_v34  ;;  %v2925_v46 = vrot.slane %v2352_v60, 1  ;;  %v2926_v26 = vrot.slane %v2340_v30, 2  ;;  %v2816_v50 = vsel %vm2456_vm8, %v7141_v61, 0  ;;  %v8443_v1 = vld [vmem:[%s11787_s29 + $0x274] ss:$8 sps:$4 sm:$0xff]  }
 0x2d4   : > { %3051 = vmatpush1.bf16.msra.mxu0 %v8413_v55  ;;  %v2350_v38 = vrot.slane %v2348_v33, 1  ;;  %v2929_v24 = vrot.slane %v2355_v35, 1  ;;  %v2930_v53 = vrot.slane %v2348_v33, 2  ;;  %v2343_v29 = vsel %vm2311_vm10, %v2338_v21, %v2342_v39  ;;  %v8441_v30 = vld [vmem:[%s11787_s29 + $0x270] ss:$8 sps:$4 sm:$0xff]  }
 0x2d5   : > { %7182 = vmatprep.subr.msk.bf16.mxu0 %vm2456_vm8, %v7181_v20  ;;  %2828 = vmatpush1.bf16.msra.mxu1 %v8416_v31  ;;  %v2354_v57 = vor.u32 %v2352_v60, %v2342_v39  ;;  %v2927_v52 = vor.u32 %v2926_v26, %v2925_v46  ;;  %v2716_v47 = vrot.slane %v10161_v10, 1  ;;  %v2710_v6 = vsel %vm805_vm1, %v2708_v41, %v2709_v28  ;;  %v8446_v20 = vld [vmem:[%s11787_s29 + $0x264] ss:$8 sps:$4 sm:$0xff]   ;;  %v8447_v33 = vld [vmem:[%s11787_s29 + $0x250] ss:$8 sps:$4 sm:$0xff]  }
 0x2d6   : > { %v2351_v25 = vsel %vm2311_vm10, %v2346_v37, %v2350_v38  ;;  %v2357_v0 = vor.u32 %v2355_v35, %v2350_v38  ;;  %v2931_v11 = vor.u32 %v2930_v53, %v2929_v24  ;;  %2829 = vmatprep.subr.bf16.mxu1 %v8423_v42  ;;  %v2714_v55 = vrot.slane %v10147_v19, 1  ;;  %v8452_v42 = vld [vmem:[%s11787_s29 + $0x244] ss:$8 sps:$4 sm:$0xff]   ;;  %v8456_v38 = vld [vmem:[%s11787_s29 + $0x220] ss:$8 sps:$4 sm:$0xff]  }
 0x2d7   : > { %7084 = vmatprep.mubr.msk.bf16.mxu1 %vm2446_vm9, %v2351_v25  ;;  %v2928_v56 = vsel %vm2910_vm11, %v2916_v34, %v2927_v52  ;;  %v2717_v43 = vsel %vm805_vm1, %v2712_v23, %v2716_v47  ;;  %v3130_v31 = vrot.slane %v10077_v3, 2  ;;  %v3129_v35 = vrot.slane %v10045_v63, 2  ;;  %v8450_v3 = vld [vmem:[%s11787_s29 + $0x240] ss:$8 sps:$4 sm:$0xff]   ;;  %v8453_v63 = vld [vmem:[%s11787_s29 + $0x230] ss:$8 sps:$4 sm:$0xff]  }
 0x2d8   : > { %3067 = vmatpush2.bf16.msra.mxu0 %v3031_v27  ;;  %2506 = vmatmul.mubr.bf16.gmra.mxu1 %v2343_v29  ;;  %v2932_v16 = vsel %vm2910_vm11, %v10138_v14, %v2931_v11  ;;  %v2713_v14 = vsel %vm805_vm1, %v2711_v22, %v2712_v23  ;;  %v2715_v4 = vsel %vm805_vm1, %v2709_v28, %v2714_v55  ;;  %v7202_v37 = vld [vmem:[%s11787_s29 + $0x2a0] sm:$0x33]  ;;  %v3134_v21 = vrot.slane %v10161_v10, 2  ;;  %v8463_v10 = vld [vmem:[%s11788_s6 + $0x19c] ss:$12 sps:$4 sm:$0xff]  }
 0x2d9   : > { %7085 = vmatprep.mubr.msk.bf16.mxu1 %vm2446_vm9, %v2357_v0  ;;  %2830 = vmatpush1.bf16.msra.mxu1 %v8421_v58  ;;  %v3131_v39 = vsel %vm1074_vm2, %v3129_v35, %v3130_v31  ;;  %v7220_v24 = vcombine.high %v7202_v37, %v7202_v37  ;;  %v7219_v53 = vcombine.low %v7202_v37, %v7202_v37  ;;  %v8461_v60 = vld [vmem:[%s11788_s6 + $0x198] ss:$12 sps:$4 sm:$0xff]   ;;  %v8464_v25 = vld [vmem:[%s11788_s6 + $0x1a0] ss:$12 sps:$4 sm:$0xff]   ;;  %v8468_v58 = vld [vmem:[%s11788_s6 + $0x188] ss:$12 sps:$4 sm:$0xff]  }
 0x2da   : > { %2831 = vmatprep.subr.bf16.mxu1 %v8426_v15  ;;  %v3135_v34 = vsel %vm1074_vm2, %v3130_v31, %v3134_v21  ;;  %v8467_v19 = vld [vmem:[%s11788_s6 + $0x184] ss:$12 sps:$4 sm:$0xff]   ;;  %3648 = vmatprep.subr.bf16.mxu0 %v8463_v10  ;;  %v8471_v0 = vld [vmem:[%s11788_s6 + $0x16c] ss:$12 sps:$4 sm:$0xff]   ;;  %v8475_v29 = vld [vmem:[%s11788_s6 + $0x154] ss:$12 sps:$4 sm:$0xff]  }
 0x2db   : > { %3069 = vmatmul.mubr.bf16.vlgmr.msra.gmra.mxu0 %v2917_v13  ;;  %v3234_v27 = vsel %vm2456_vm8, %v7219_v53, 0  ;;  %v8473_v15 = vld [vmem:[%s11788_s6 + $0x150] ss:$12 sps:$4 sm:$0xff]   ;;  %v8476_v2 = vld [vmem:[%s11788_s6 + $0x158] ss:$12 sps:$4 sm:$0xff]  }
 0x2dc   : > { %7184 = vmatprep.mubr.msk.bf16.mxu0 %vm2446_vm9, %v2932_v16  ;;  %3649 = vmatpush1.bf16.msra.mxu0 %v8461_v60  ;;  %v8479_v16 = vld [vmem:[%s11788_s6 + $0x13c] ss:$12 sps:$4 sm:$0xff]   ;;  %v8477_v13 = vld [vmem:[%s11788_s6 + $0x138] ss:$12 sps:$4 sm:$0xff]   ;;  %v8481_v26 = vld [vmem:[%s11788_s6 + $0x120] ss:$12 sps:$4 sm:$0xff]  }
 0x2dd   : > { %2832 = vmatpush1.bf16.msra.mxu1 %v8424_v12  ;;  %3650 = vmatprep.subr.bf16.mxu0 %v8467_v19  ;;  %v8480_v12 = vld [vmem:[%s11788_s6 + $0x140] ss:$12 sps:$4 sm:$0xff]   ;;  %v8483_v46 = vld [vmem:[%s11788_s6 + $0x124] ss:$12 sps:$4 sm:$0xff]   ;;  %v8493_v45 = vld [vmem:[%s11788_s6 + $0x1c8] ss:$12 sps:$4 sm:$0xff]  }
 0x2de   : > { %2833 = vmatprep.subr.bf16.mxu1 %v8429_v40  ;;  %v8484_v40 = vld [vmem:[%s11788_s6 + $0x128] ss:$12 sps:$4 sm:$0xff]   ;;  %v8487_v23 = vld [vmem:[%s11788_s6 + $0x10c] ss:$12 sps:$4 sm:$0xff]  }
 0x2df   : > { %v8491_v22 = vld [vmem:[%s11788_s6 + $0xf4] ss:$12 sps:$4 sm:$0xff]   ;;  %v8500_v61 = vld [vmem:[%s11788_s6 + $0x1b8] ss:$12 sps:$4 sm:$0xff]  }
 0x2e0   : > { %2516 = vmatmul.mubr.bf16.gmra.mxu1 %v2354_v57  ;;  %v8488_v57 = vld [vmem:[%s11788_s6 + $0x110] ss:$12 sps:$4 sm:$0xff]  }
 0x2e1   : > { %7144 = vmatprep.mubr.msk.bf16.mxu1 %vm2446_vm9, %v2713_v14  ;;  %2834 = vmatpush1.bf16.msra.mxu1 %v8427_v18  ;;  %v8485_v18 = vld [vmem:[%s11788_s6 + $0x108] ss:$12 sps:$4 sm:$0xff]   ;;  %v8495_v14 = vld [vmem:[%s11788_s6 + $0x1cc] ss:$12 sps:$4 sm:$0xff]  }
 0x2e2   : > { %2835 = vmatprep.subr.bf16.mxu1 %v8432_v62  ;;  %v8492_v62 = vld [vmem:[%s11788_s6 + $0xf8] ss:$12 sps:$4 sm:$0xff]  }
 0x2e3   : > { %3079 = vmatmul.mubr.bf16.gmra.mxu0 %v2928_v56  ;;  %v8496_v56 = vld [vmem:[%s11788_s6 + $0x1d0] ss:$12 sps:$4 sm:$0xff]  }
 0x2e4   : > { %7185 = vmatprep.mubr.msk.bf16.mxu0 %vm2446_vm9, %v2931_v11  ;;  %v8469_v11 = vld [vmem:[%s11788_s6 + $0x168] ss:$12 sps:$4 sm:$0xff]  }
 0x2e5   : > { %2836 = vmatpush1.bf16.msra.mxu1 %v8430_v8  ;;  %v8497_v8 = vld [vmem:[%s11788_s6 + $0x1b0] ss:$12 sps:$4 sm:$0xff]  }
 0x2e6   : > { %7143 = vmatprep.subr.msk.bf16.mxu1 %vm2456_vm8, %v7142_v59  ;;  %v8499_v59 = vld [vmem:[%s11788_s6 + $0x1b4] ss:$12 sps:$4 sm:$0xff]  }
 0x2e9   : > { %2852 = vmatpush2.bf16.msra.mxu1 %v2816_v50  ;;  %v8503_v50 = vld [vmem:[%s11788_s6 + $0xac] ss:$12 sps:$4 sm:$0xff]  }
 0x2ea   : > { %3239 = vmatprep.subr.bf16.mxu1 %v8437_v7 }
 0x2eb   : > { %3089 = vmatmul.mubr.bf16.gmra.mxu0 %v2927_v52  ;;  %v8489_v52 = vld [vmem:[%s11788_s6 + $0xf0] ss:$12 sps:$4 sm:$0xff]  }
 0x2ec   : > { %2854 = vmatmul.mubr.bf16.vlgmr.msra.gmra.mxu1 %v2710_v6 }
 0x2ed   : > { %7145 = vmatprep.mubr.msk.bf16.mxu1 %vm2446_vm9, %v2717_v43  ;;  %3240 = vmatpush1.bf16.msra.mxu1 %v8435_v54 }
 0x2ee   : > { %3241 = vmatprep.subr.bf16.mxu1 %v8440_v9 }
 0x2f1   : > { %3242 = vmatpush1.bf16.msra.mxu1 %v8438_v5 }
 0x2f2   : > { %3243 = vmatprep.subr.bf16.mxu1 %v8443_v1 }
 0x2f4   : > { %2864 = vmatmul.mubr.bf16.gmra.mxu1 %v2715_v4 }
 0x2f5   : > { %7146 = vmatprep.mubr.msk.bf16.mxu1 %vm2446_vm9, %v2716_v47  ;;  %3244 = vmatpush1.bf16.msra.mxu1 %v8441_v30 }
 0x2f6   : > { %3245 = vmatprep.subr.bf16.mxu1 %v8446_v20 }
 0x2f9   : > { %3246 = vmatpush1.bf16.msra.mxu1 %v8444_v51 }
 0x2fa   : > { %3247 = vmatprep.subr.bf16.mxu1 %v8449_v17 }
 0x2fc   : > { %2874 = vmatmul.mubr.bf16.gmra.mxu1 %v2714_v55 }
 0x2fd   : > { %3248 = vmatpush1.bf16.msra.mxu1 %v8447_v33  ;;  %7222 = vmatprep.mubr.msk.bf16.mxu1 %vm2446_vm9, %v3131_v39 }
 0x2fe   : > { %3249 = vmatprep.subr.bf16.mxu1 %v8452_v42 }
 0x301   : > { %3250 = vmatpush1.bf16.msra.mxu1 %v8450_v3 }
 0x302   : > { %3251 = vmatprep.subr.bf16.mxu1 %v8455_v36 }
 0x305   : > { %3252 = vmatpush1.bf16.msra.mxu1 %v8453_v63 }
 0x306   : > { %3253 = vmatprep.subr.bf16.mxu1 %v8458_v48 }
 0x309   : > { %3254 = vmatpush1.bf16.msra.mxu1 %v8456_v38 }
 0x30a   : > { %7221 = vmatprep.subr.msk.bf16.mxu1 %vm2456_vm8, %v7220_v24 }
 0x30d   : > { %3270 = vmatpush2.bf16.msra.mxu1 %v3234_v27 }
 0x310   : > { %3272 = vmatmul.mubr.bf16.vlgmr.msra.gmra.mxu1 %v10121_v49  ;;  %v8812_v49 = vmov 0  }
 0x311   : > { %7223 = vmatprep.mubr.msk.bf16.mxu1 %vm2446_vm9, %v3135_v34  ;;  %3709 = vmatprep.subr.bf16.mxu1 %v8812_v49 }
 0x312   : > { %3710 = vmatpush1.bf16.msra.mxu1 %v8464_v25 }
 0x313   : > { %3711 = vmatprep.subr.bf16.mxu1 %v8812_v49 }
 0x316   : > { %3712 = vmatpush1.bf16.msra.mxu1 %v8468_v58 }
 0x317   : > { %3713 = vmatprep.subr.bf16.mxu1 %v8812_v49 }
 0x318   : > { %3282 = vmatmul.mubr.bf16.gmra.mxu1 %v10199_v44  ;;  %v8472_v44 = vld [vmem:[%s11788_s6 + $0x170] ss:$12 sps:$4 sm:$0xff]  }
 0x319   : > { %7224 = vmatprep.mubr.msk.bf16.mxu1 %vm2446_vm9, %v3134_v21 }
 0x31a   : > { %3714 = vmatpush1.bf16.msra.mxu1 %v8472_v44 }
 0x31b   : > { %3715 = vmatprep.subr.bf16.mxu1 %v8812_v49 }
 0x31e   : > { %3716 = vmatpush1.bf16.msra.mxu1 %v8476_v2 }
 0x31f   : > { %3717 = vmatprep.subr.bf16.mxu1 %v8812_v49 }
 0x320   : > { %3292 = vmatmul.mubr.bf16.gmra.mxu1 %v3132_v32  ;;  %v8465_v32 = vld [vmem:[%s11788_s6 + $0x180] ss:$12 sps:$4 sm:$0xff]  }
 0x321   : > { %3651 = vmatpush1.bf16.msra.mxu0 %v8465_v32 }
 0x322   : > { %3652 = vmatprep.subr.bf16.mxu0 %v8471_v0  ;;  %3718 = vmatpush1.bf16.msra.mxu1 %v8480_v12 }
 0x323   : > { %3719 = vmatprep.subr.bf16.mxu1 %v8812_v49 }
 0x325   : > { %3653 = vmatpush1.bf16.msra.mxu0 %v8469_v11 }
 0x326   : > { %3654 = vmatprep.subr.bf16.mxu0 %v8475_v29  ;;  %3720 = vmatpush1.bf16.msra.mxu1 %v8484_v40 }
 0x327   : > { %3721 = vmatprep.subr.bf16.mxu1 %v8812_v49 }
 0x329   : > { %3655 = vmatpush1.bf16.msra.mxu0 %v8473_v15 }
 0x32a   : > { %3656 = vmatprep.subr.bf16.mxu0 %v8479_v16  ;;  %3722 = vmatpush1.bf16.msra.mxu1 %v8488_v57 }
 0x32b   : > { %3723 = vmatprep.subr.bf16.mxu1 %v8812_v49 }
 0x32d   : > { %3657 = vmatpush1.bf16.msra.mxu0 %v8477_v13 }
 0x32e   : > { %3658 = vmatprep.subr.bf16.mxu0 %v8483_v46  ;;  %3724 = vmatpush1.bf16.msra.mxu1 %v8492_v62  ;;  %v3312_v62 = vlaneseq }
 0x32f   : > { %3737 = vmatprep.subr.bf16.mxu1 %v8812_v49 }
 0x331   : > { %3659 = vmatpush1.bf16.msra.mxu0 %v8481_v26 }
 0x332   : > { %3660 = vmatprep.subr.bf16.mxu0 %v8487_v23  ;;  %3738 = vmatpush2.bf16.msra.mxu1 %v8496_v56 }
 0x333   : > { %3739 = vmatprep.subr.bf16.mxu1 %v8812_v49 }
 0x335   : > { %3661 = vmatpush1.bf16.msra.mxu0 %v8485_v18 }
 0x336   : > { %3662 = vmatprep.subr.bf16.mxu0 %v8491_v22  ;;  %3740 = vmatpush2.bf16.msra.mxu1 %v8500_v61 }
 0x337   : > { %3992 = vmatprep.subr.bf16.mxu1 %v8812_v49 }
 0x339   : > { %3663 = vmatpush1.bf16.msra.mxu0 %v8489_v52 }
 0x33a   : > { %3676 = vmatprep.subr.bf16.mxu0 %v8495_v14  ;;  %v10433_v14 = vshrl.u32 %v3312_v62, 7 }
 0x33c   : > { %v3314_v56 = vsub.s32 0, %v10433_v14 }
 0x33d   : > { %3677 = vmatpush2.bf16.msra.mxu0 %v8493_v45 }
 0x33e   : > { %3678 = vmatprep.subr.bf16.mxu0 %v8499_v59  ;;  %v3318_v59 = vsub.s32 1, %v10433_v14 }
 0x341   : > { %3679 = vmatpush2.bf16.msra.mxu0 %v8497_v8  ;;  %v3310_v8 = vld [vmem:[%s11789_s27] sm:$0x3]  ;;  %s11791_s27 = smov 127  }
 0x342   : > { %3931 = vmatprep.subr.bf16.mxu0 %v8503_v50 }
 0x376   : > { %v2656_v7 = vpop.f32.mrf.mxu0 }
 0x378   : > { %v2658_v28 = vpop.f32.mrf.mxu0 }
 0x37a   : > { %v2660_v47 = vpop.f32.mrf.mxu0 }
 0x37c   : > { %v2662_v41 = vpop.f32.mrf.mxu0 }
 0x384   : > { %v2666_v54 = vpop.f32.mrf.mxu0 }
 0x386   : > { %v10415_v9 = vpop.f32.mrf.mxu0 }
 0x388   : > { %v10417_v6 = vpop.f32.mrf.mxu0  ;;  %v2497_v43 = vpop.f32.mrf.mxu1 }
 0x389   : > { %v2657_v5 = vadd.f32 %v2656_v7, %v2497_v43 }
 0x38a   : > { %v2499_v1 = vpop.f32.mrf.mxu1  ;;  %v10419_v30 = vpop.f32.mrf.mxu0 }
 0x38b   : > { %v2659_v55 = vadd.f32 %v2658_v28, %v2499_v1 }
 0x38c   : > { %v2501_v20 = vpop.f32.mrf.mxu1 }
 0x38d   : > { %v2661_v4 = vadd.f32 %v2660_v47, %v2501_v20 }
 0x38e   : > { %v2503_v35 = vpop.f32.mrf.mxu1 }
 0x38f   : > { %v2676_v51 = vpop.f32.mrf.mxu0  ;;  %v2663_v61 = vadd.f32 %v2662_v41, %v2503_v35 }
 0x391   : > { %v10421_v17 = vpop.f32.mrf.mxu0 }
 0x393   : > { %v2680_v31 = vpop.f32.mrf.mxu0 }
 0x395   : > { %v2681_v33 = vpop.f32.mrf.mxu0 }
 0x398   : > { %v2507_v42 = vpop.f32.mrf.mxu1 }
 0x399   : > { %v2667_v39 = vadd.f32 %v2666_v54, %v2507_v42  ;;  %v10442_v54 = vrot.slane %v3310_v8, %v3314_v56 }
 0x39a   : > { %v2509_v3 = vpop.f32.mrf.mxu1 }
 0x39b   : > { %v3070_v36 = vpop.f32.mrf.mxu0 }
 0x39c   : > { %v2511_v63 = vpop.f32.mrf.mxu1 }
 0x39d   : > { %v3072_v48 = vpop.f32.mrf.mxu0  ;;  %v2671_v41 = vadd.f32 %v10417_v6, %v2511_v63 }
 0x39e   : > { %v2513_v37 = vpop.f32.mrf.mxu1 }
 0x39f   : > { %v3074_v38 = vpop.f32.mrf.mxu0 }
 0x3a0   : > { %v2517_v24 = vpop.f32.mrf.mxu1 }
 0x3a1   : > { %v3076_v53 = vpop.f32.mrf.mxu0  ;;  %v10423_v27 = vadd.f32 %v2676_v51, %v2517_v24 }
 0x3a2   : > { %v2519_v21 = vpop.f32.mrf.mxu1 }
 0x3a3   : > { %v3080_v34 = vpop.f32.mrf.mxu0 }
 0x3a4   : > { %v2521_v60 = vpop.f32.mrf.mxu1 }
 0x3a5   : > { %v3082_v10 = vpop.f32.mrf.mxu0 }
 0x3a6   : > { %v2522_v25 = vpop.f32.mrf.mxu1 }
 0x3a7   : > { %v10425_v19 = vpop.f32.mrf.mxu0 }
 0x3a9   : > { %v10427_v32 = vpop.f32.mrf.mxu0 }
 0x3ab   : > { %v10429_v58 = vpop.f32.mrf.mxu0 }
 0x3ac   : > { %v2855_v0 = vpop.f32.mrf.mxu1 }
 0x3ad   : > { %v10431_v11 = vpop.f32.mrf.mxu0  ;;  %v2882_v44 = vadd.f32 %v2855_v0, %v2657_v5  ;;  %v2669_v5 = vadd.f32 %v10415_v9, %v2509_v3 }
 0x3ae   : > { %v2857_v29 = vpop.f32.mrf.mxu1 }
 0x3af   : > { %v3094_v15 = vpop.f32.mrf.mxu0  ;;  %v3097_v2 = vadd.f32 %v3070_v36, %v2882_v44  ;;  %v2883_v45 = vadd.f32 %v2857_v29, %v2659_v55  ;;  %v10447_v55 = vrot.slane %v3310_v8, %v3318_v59 }
 0x3b0   : > { %v2859_v16 = vpop.f32.mrf.mxu1 }
 0x3b1   : > { %v3095_v13 = vpop.f32.mrf.mxu0  ;;  %v2884_v50 = vadd.f32 %v2859_v16, %v2661_v4  ;;  %v3098_v43 = vadd.f32 %v3072_v48, %v2883_v45  ;;  %v2673_v48 = vadd.f32 %v10419_v30, %v2513_v37 }
 0x3b2   : > { %v2861_v12 = vpop.f32.mrf.mxu1 }
 0x3b3   : > { %v2885_v28 = vadd.f32 %v2861_v12, %v2663_v61  ;;  %v3099_v31 = vadd.f32 %v3074_v38, %v2884_v50  ;;  %v2679_v38 = vadd.f32 %v10421_v17, %v2519_v21 }
 0x3b4   : > { %v2865_v46 = vpop.f32.mrf.mxu1 }
 0x3b5   : > { %v2886_v20 = vadd.f32 %v2865_v46, %v2667_v39  ;;  %v3100_v36 = vadd.f32 %v3076_v53, %v2885_v28 }
 0x3b6   : > { %v2867_v26 = vpop.f32.mrf.mxu1 }
 0x3b7   : > { %v2887_v4 = vadd.f32 %v2867_v26, %v2669_v5  ;;  %v3101_v39 = vadd.f32 %v3080_v34, %v2886_v20 }
 0x3b8   : > { %v2869_v40 = vpop.f32.mrf.mxu1 }
 0x3b9   : > { %v2888_v24 = vadd.f32 %v2869_v40, %v2671_v41  ;;  %v3102_v63 = vadd.f32 %v3082_v10, %v2887_v4 }
 0x3ba   : > { %v2871_v23 = vpop.f32.mrf.mxu1 }
 0x3bb   : > { %v2889_v0 = vadd.f32 %v2871_v23, %v2673_v48  ;;  %v3103_v13 = vadd.f32 %v10425_v19, %v2888_v24 }
 0x3bc   : > { %v2875_v18 = vpop.f32.mrf.mxu1 }
 0x3bd   : > { %v2890_v30 = vadd.f32 %v2875_v18, %v10423_v27  ;;  %v3104_v23 = vadd.f32 %v10427_v32, %v2889_v0 }
 0x3be   : > { %v2877_v57 = vpop.f32.mrf.mxu1 }
 0x3bf   : > { %v2891_v37 = vadd.f32 %v2877_v57, %v2679_v38  ;;  %v3105_v18 = vadd.f32 %v10429_v58, %v2890_v30 }
 0x3c0   : > { %v2879_v22 = vpop.f32.mrf.mxu1 }
 0x3c1   : > { %v3106_v57 = vadd.f32 %v10431_v11, %v2891_v37 }
 0x3c2   : > { %v2880_v52 = vpop.f32.mrf.mxu1 }
 0x3d0   : > { %v3273_v7 = vpop.f32.mrf.mxu1 }
 0x3d1   : > { %v3300_v47 = vadd.f32 %v3273_v7, %v3097_v2 }
 0x3d2   : > { %v3275_v1 = vpop.f32.mrf.mxu1 }
 0x3d3   : > { %v3301_v51 = vadd.f32 %v3275_v1, %v3098_v43  ;;  %v3322_v35 = vadd.f32 %v10442_v54, %v3300_v47 }
 0x3d4   : > { %v3277_v33 = vpop.f32.mrf.mxu1 }
 0x3d5   : > { %v3302_v42 = vadd.f32 %v3277_v33, %v3099_v31  ;;  %v3323_v9 = vadd.f32 %v10447_v55, %v3301_v51  ;;  %v3332_v44 = vmax.f32 %v3322_v35, 0.0 }
 0x3d6   : > { %v3279_v3 = vpop.f32.mrf.mxu1 }
 0x3d7   : > { %v3324_v60 = vadd.f32 %v10442_v54, %v3302_v42  ;;  %v3303_v25 = vadd.f32 %v3279_v3, %v3100_v36  ;;  %v3333_v2 = vmax.f32 %v3323_v9, 0.0 }
 0x3d8   : > { %v3283_v6 = vpop.f32.mrf.mxu1 }
 0x3d9   : > { %v3334_v29 = vmax.f32 %v3324_v60, 0.0  ;;  %v3325_v15 = vadd.f32 %v10447_v55, %v3303_v25  ;;  %v3304_v53 = vadd.f32 %v3283_v6, %v3101_v39 }
 0x3da   : > { %v3285_v16 = vpop.f32.mrf.mxu1 }
 0x3db   : > { %v10458_v12 = vpack.c.bf16 %v3334_v29, %v3332_v44  ;;  %v3335_v34 = vmax.f32 %v3325_v15, 0.0  ;;  %v3326_v17 = vadd.f32 %v10442_v54, %v3304_v53  ;;  %v3305_v21 = vadd.f32 %v3285_v16, %v3102_v63 }
 0x3dc   : > { %v3287_v46 = vpop.f32.mrf.mxu1 }
 0x3dd   : > { %v10461_v10 = vpack.c.bf16 %v3335_v34, %v3333_v2  ;;  %v3327_v26 = vadd.f32 %v10447_v55, %v3305_v21  ;;  %v3306_v40 = vadd.f32 %v3287_v46, %v3103_v13  ;;  %v3430_v19 = vshrl.u32 %v10458_v12, 16  ;;  %v8501_v34 = vld [vmem:[%s11788_s6 + $0xa8] ss:$12 sps:$4 sm:$0xff]   ;;  %v8504_v46 = vld [vmem:[%s11788_s6 + $0xb0] ss:$12 sps:$4 sm:$0xff]  }
 0x3de   : > { %v3289_v27 = vpop.f32.mrf.mxu1  ;;  %v3432_v22 = vshll.u32 %v10458_v12, 16  ;;  %v3336_v52 = vmax.f32 %v3326_v17, 0.0  ;;  %v4095_v32 = vrot.slane %v10458_v12, 1  ;;  %v4817_v9 = vrot.slane %v10458_v12, 2 }
 0x3df   : > { %v3328_v62 = vadd.f32 %v10442_v54, %v3306_v40  ;;  %v3307_v45 = vadd.f32 %v3289_v27, %v3104_v23  ;;  %v3442_v8 = vshrl.u32 %v10461_v10, 16  ;;  %v3337_v61 = vmax.f32 %v3327_v26, 0.0 }
 0x3e0   : > { %v3293_v50 = vpop.f32.mrf.mxu1  ;;  %v3444_v7 = vshll.u32 %v10461_v10, 16  ;;  %v10473_v28 = vrot.slane %v3430_v19, 1  ;;  %v3434_v20 = vrot.slane %v3432_v22, 1  ;;  %v10480_v31 = vrot.slane %v3432_v22, 2 }
 0x3e1   : > { %v3338_v58 = vmax.f32 %v3328_v62, 0.0  ;;  %v3329_v11 = vadd.f32 %v10447_v55, %v3307_v45  ;;  %v3308_v47 = vadd.f32 %v3293_v50, %v3105_v18  ;;  %v10476_v43 = vrot.slane %v3442_v8, 1 }
 0x3e2   : > { %v3295_v5 = vpop.f32.mrf.mxu1  ;;  %v3446_v1 = vrot.slane %v3444_v7, 1  ;;  %v10478_v51 = vrot.slane %v3444_v7, 2  ;;  %v4098_v36 = vrot.slane %v10461_v10, 1  ;;  %v4452_v24 = vor.u32 %v10480_v31, %v10473_v28  ;;  %v8515_v31 = vld [vmem:[%s11788_s6 + $0x64] ss:$12 sps:$4 sm:$0xff]  }
 0x3e3   : > { %v10482_v41 = vpack.c.bf16 %v3338_v58, %v3336_v52  ;;  %v3339_v4 = vmax.f32 %v3329_v11, 0.0  ;;  %v3330_v33 = vadd.f32 %v10442_v54, %v3308_v47  ;;  %v3309_v35 = vadd.f32 %v3295_v5, %v3106_v57  ;;  %v8505_v11 = vld [vmem:[%s11788_s6 + $0x90] ss:$12 sps:$4 sm:$0xff]   ;;  %v8508_v47 = vld [vmem:[%s11788_s6 + $0x98] ss:$12 sps:$4 sm:$0xff]  }
 0x3e4   : > { %v3297_v42 = vpop.f32.mrf.mxu1  ;;  %v4459_v48 = vor.u32 %v10478_v51, %v10476_v43  ;;  %v3447_v38 = vor.u32 %v3446_v1, %v3442_v8  ;;  %v3435_v0 = vor.u32 %v3434_v20, %v3430_v19  ;;  %v8507_v19 = vld [vmem:[%s11788_s6 + $0x94] ss:$12 sps:$4 sm:$0xff]  }
 0x3e5   : > { %v10491_v3 = vpack.c.bf16 %v3339_v4, %v3337_v61  ;;  %v3340_v60 = vmax.f32 %v3330_v33, 0.0  ;;  %v3331_v25 = vadd.f32 %v10447_v55, %v3309_v35  ;;  %v3437_v39 = vshll.u32 %v10482_v41, 16  ;;  %v8511_v35 = vld [vmem:[%s11788_s6 + $0x7c] ss:$12 sps:$4 sm:$0xff]  }
 0x3e6   : > { %v3298_v54 = vpop.f32.mrf.mxu1  ;;  %v3453_v6 = vshrl.u32 %v10482_v41, 16  ;;  %v4096_v63 = vrot.slane %v10482_v41, 1  ;;  %v4818_v2 = vrot.slane %v10482_v41, 2 }
 0x3e7   : > { %v10497_v44 = vpack.c.bf16 %v3340_v60, %v3340_v60  ;;  %v3341_v29 = vmax.f32 %v3331_v25, 0.0  ;;  %v3449_v15 = vshll.u32 %v10491_v3, 16  ;;  %v3439_v53 = vrot.slane %v3437_v39, 1 }
 0x3e8   : > { %v3461_v30 = vshrl.u32 %v10491_v3, 16  ;;  %v4099_v37 = vrot.slane %v10491_v3, 1  ;;  %v10503_v55 = vsel %vm805_vm1, %v4095_v32, %v4096_v63  ;;  %v4453_v21 = vrot.slane %v3453_v6, 1 }
 0x3e9   : > { %v10506_v16 = vpack.c.bf16 %v3341_v29, %v3341_v29  ;;  %v3451_v13 = vrot.slane %v3449_v15, 1  ;;  %v3440_v17 = vsel %vm2311_vm10, %v3435_v0, %v3439_v53  ;;  %v3457_v26 = vshll.u32 %v10497_v44, 16  ;;  %v8512_v29 = vld [vmem:[%s11788_s6 + $0x80] ss:$12 sps:$4 sm:$0xff]  }
 0x3ea   : > { %v3469_v40 = vshrl.u32 %v10497_v44, 16  ;;  %v10518_v23 = vsel %vm805_vm1, %v4098_v36, %v4099_v37  ;;  %v10521_v27 = vrot.slane %v10497_v44, 1  ;;  %v3455_v22 = vor.u32 %v3453_v6, %v3439_v53 }
 0x3eb   : > { %v3452_v18 = vsel %vm2311_vm10, %v3447_v38, %v3451_v13  ;;  %v3465_v57 = vshll.u32 %v10506_v16, 16  ;;  %v3472_v52 = vshrl.u32 %v10506_v16, 16  ;;  %v3463_v62 = vor.u32 %v3461_v30, %v3451_v13  ;;  %v8513_v13 = vld [vmem:[%s11788_s6 + $0x60] ss:$12 sps:$4 sm:$0xff]  }
 0x3ec   : > { %7295 = vmatprep.mubr.msk.bf16.mxu0 %vm3638_vm12, %v3452_v18  ;;  %7298 = vmatprep.mubr.msk.bf16.mxu1 %vm3638_vm12, %v3452_v18  ;;  %v10531_v45 = vrot.slane %v3457_v26, 1  ;;  %v10534_v8 = vrot.slane %v10506_v16, 1  ;;  %v10538_v61 = vsel %vm805_vm1, %v4096_v63, %v10521_v27  ;;  %v4460_v7 = vrot.slane %v3461_v30, 1  ;;  %v8509_v63 = vld [vmem:[%s11788_s6 + $0x78] ss:$12 sps:$4 sm:$0xff]  }
 0x3ed   : > { %3681 = vmatmul.mubr.bf16.vlgmr.msra.gmra.mxu0 %v3440_v17  ;;  %3742 = vmatmul.mubr.bf16.vlgmr.msra.gmra.mxu1 %v3440_v17  ;;  %v3467_v50 = vrot.slane %v3465_v57, 1  ;;  %v4461_v32 = vrot.slane %v3449_v15, 2  ;;  %v4454_v58 = vrot.slane %v3437_v39, 2  ;;  %v4464_v1 = vrot.slane %v3469_v40, 1  ;;  %v8519_v17 = vld [vmem:[%s11788_s6 + $0x4c] ss:$12 sps:$4 sm:$0xff]  }
 0x3ee   : > { %3932 = vmatpush1.bf16.msra.mxu0 %v8501_v34  ;;  %3993 = vmatpush1.bf16.msra.mxu1 %v8504_v46  ;;  %v3460_v5 = vsel %vm2311_vm10, %v3455_v22, %v10531_v45  ;;  %v10552_v20 = vsel %vm805_vm1, %v4099_v37, %v10534_v8  ;;  %v4468_v4 = vrot.slane %v3472_v52, 1  ;;  %v4469_v36 = vrot.slane %v3465_v57, 2  ;;  %v8516_v34 = vld [vmem:[%s11788_s6 + $0x68] ss:$12 sps:$4 sm:$0xff]   ;;  %v8521_v18 = vld [vmem:[%s11788_s6 + $0x30] ss:$12 sps:$4 sm:$0xff]  }
 0x3ef   : > { %v3468_v33 = vsel %vm2311_vm10, %v3463_v62, %v3467_v50  ;;  %3933 = vmatprep.subr.bf16.mxu0 %v8507_v19  ;;  %3994 = vmatprep.subr.bf16.mxu1 %v8812_v49  ;;  %v4462_v42 = vor.u32 %v4461_v32, %v4460_v7  ;;  %v4820_v60 = vrot.slane %v10461_v10, 2  ;;  %v4455_v25 = vor.u32 %v4454_v58, %v4453_v21  ;;  %v8520_v21 = vld [vmem:[%s11788_s6 + $0x50] ss:$12 sps:$4 sm:$0xff]   ;;  %v8524_v57 = vld [vmem:[%s11788_s6 + $0x38] ss:$12 sps:$4 sm:$0xff]  }
 0x3f0   : > { %7296 = vmatprep.mubr.msk.bf16.mxu0 %vm3638_vm12, %v3468_v33  ;;  %7299 = vmatprep.mubr.msk.bf16.mxu1 %vm3638_vm12, %v3468_v33  ;;  %v4465_v39 = vrot.slane %v3457_v26, 2  ;;  %v4821_v54 = vrot.slane %v10491_v3, 2  ;;  %v10568_v38 = vsel %vm1074_vm2, %v4817_v9, %v4818_v2  ;;  %v10576_v6 = vor.u32 %v4469_v36, %v4468_v4  ;;  %v8523_v26 = vld [vmem:[%s11788_s6 + $0x34] ss:$12 sps:$4 sm:$0xff]   ;;  %v8525_v19 = vld [vmem:[%s11788_s6 + $0x18] ss:$12 sps:$4 sm:$0xff]  }
 0x3f1   : > { %v10574_v0 = vsel %vm2910_vm11, %v4459_v48, %v4462_v42  ;;  %v10588_v43 = vsel %vm2910_vm11, %v4452_v24, %v4455_v25  ;;  %v10596_v9 = vrot.slane %v10506_v16, 2  ;;  %v10604_v28 = vrot.slane %v10497_v44, 2  ;;  %v8528_v22 = vld [vmem:[%s11788_s6 + $0x20] ss:$12 sps:$4 sm:$0xff]   ;;  %v8532_v62 = vld [vmem:[%s11788_s6 + $0x8] ss:$12 sps:$4 sm:$0xff]  }
 0x3f2   : > { %3934 = vmatpush1.bf16.msra.mxu0 %v8505_v11  ;;  %3995 = vmatpush1.bf16.msra.mxu1 %v8508_v47  ;;  %v10590_v51 = vor.u32 %v4465_v39, %v4464_v1  ;;  %v10593_v48 = vsel %vm1074_vm2, %v4820_v60, %v4821_v54  ;;  %v10601_v15 = vsel %vm2910_vm11, %v4462_v42, %v10576_v6  ;;  %v8536_v7 = vld [vmem:[%s11788_s6 + $0xe0] ss:$12 sps:$4 sm:$0xff]   ;;  %v8539_v32 = vld [vmem:[%s11788_s6 + $0xc4] ss:$12 sps:$4 sm:$0xff]   ;;  %v8540_v11 = vld [vmem:[%s11788_s6 + $0xc8] ss:$12 sps:$4 sm:$0xff]  }
 0x3f3   : > { %3935 = vmatprep.subr.bf16.mxu0 %v8511_v35  ;;  %3996 = vmatprep.subr.bf16.mxu1 %v8812_v49  ;;  %v10615_v53 = vsel %vm1074_vm2, %v4821_v54, %v10596_v9  ;;  %v3474_v30 = vor.u32 %v3472_v52, %v3467_v50  ;;  %v10621_v37 = vsel %vm1074_vm2, %v4818_v2, %v10604_v28  ;;  %v8517_v2 = vld [vmem:[%s11788_s6 + $0x48] ss:$12 sps:$4 sm:$0xff]   ;;  %v8529_v52 = vld [vmem:[%s11788_s6] ss:$12 sps:$4 sm:$0xff]   ;;  %v8533_v50 = vld [vmem:[%s11788_s6 + $0xd8] ss:$12 sps:$4 sm:$0xff]  }
 0x3f4   : > { %v10611_v24 = vsel %vm2910_vm11, %v4455_v25, %v10590_v51  ;;  %v3471_v46 = vor.u32 %v3469_v40, %v10531_v45  ;;  %v8527_v40 = vld [vmem:[%s11788_s6 + $0x1c] ss:$12 sps:$4 sm:$0xff]   ;;  %v8537_v58 = vld [vmem:[%s11788_s6 + $0xc0] ss:$12 sps:$4 sm:$0xff]   ;;  %v8548_v35 = vld [vmem:[%s11788_s6 + $0x278] ss:$12 sps:$4 sm:$0xff]  }
 0x3f5   : > { %3691 = vmatmul.mubr.bf16.gmra.mxu0 %v3460_v5  ;;  %3750 = vmatmul.mubr.bf16.gmra.mxu1 %v3460_v5  ;;  %v8535_v45 = vld [vmem:[%s11788_s6 + $0xdc] ss:$12 sps:$4 sm:$0xff]   ;;  %v8543_v47 = vld [vmem:[%s11788_s6 + $0x28c] ss:$12 sps:$4 sm:$0xff]   ;;  %v8547_v4 = vld [vmem:[%s11788_s6 + $0x274] ss:$12 sps:$4 sm:$0xff]  }
 0x3f6   : > { %3936 = vmatpush1.bf16.msra.mxu0 %v8509_v63  ;;  %3997 = vmatpush1.bf16.msra.mxu1 %v8512_v29  ;;  %v8541_v5 = vld [vmem:[%s11788_s6 + $0x288] ss:$12 sps:$4 sm:$0xff]   ;;  %v8544_v1 = vld [vmem:[%s11788_s6 + $0x290] ss:$12 sps:$4 sm:$0xff]   ;;  %v8552_v42 = vld [vmem:[%s11788_s6 + $0x260] ss:$12 sps:$4 sm:$0xff]  }
 0x3f7   : > { %7297 = vmatprep.mubr.msk.bf16.mxu0 %vm3638_vm12, %v3474_v30  ;;  %7300 = vmatprep.mubr.msk.bf16.mxu1 %vm3638_vm12, %v3474_v30  ;;  %v8545_v33 = vld [vmem:[%s11788_s6 + $0x270] ss:$12 sps:$4 sm:$0xff]   ;;  %v8553_v60 = vld [vmem:[%s11788_s6 + $0x240] ss:$12 sps:$4 sm:$0xff]   ;;  %v8556_v25 = vld [vmem:[%s11788_s6 + $0x248] ss:$12 sps:$4 sm:$0xff]  }
 0x3f8   : > { %3937 = vmatprep.subr.bf16.mxu0 %v8515_v31  ;;  %3998 = vmatprep.subr.bf16.mxu1 %v8812_v49  ;;  %v8555_v36 = vld [vmem:[%s11788_s6 + $0x244] ss:$12 sps:$4 sm:$0xff]   ;;  %v8563_v54 = vld [vmem:[%s11788_s6 + $0x214] ss:$12 sps:$4 sm:$0xff]  }
 0x3f9   : > { %v8560_v39 = vld [vmem:[%s11788_s6 + $0x230] ss:$12 sps:$4 sm:$0xff]   ;;  %v8564_v29 = vld [vmem:[%s11788_s6 + $0x218] ss:$12 sps:$4 sm:$0xff]   ;;  %v8568_v31 = vld [vmem:[%s11788_s6 + $0x200] ss:$12 sps:$4 sm:$0xff]  }
 0x3fa   : > { %3938 = vmatpush1.bf16.msra.mxu0 %v8513_v13  ;;  %3999 = vmatpush1.bf16.msra.mxu1 %v8516_v34  ;;  %v8561_v63 = vld [vmem:[%s11788_s6 + $0x210] ss:$12 sps:$4 sm:$0xff]   ;;  %v8569_v13 = vld [vmem:[%s11788_s6 + $0x1e0] ss:$12 sps:$4 sm:$0xff]   ;;  %v8572_v34 = vld [vmem:[%s11788_s6 + $0x1e8] ss:$12 sps:$4 sm:$0xff]  }
 0x3fb   : > { %3939 = vmatprep.subr.bf16.mxu0 %v8519_v17  ;;  %4000 = vmatprep.subr.bf16.mxu1 %v8812_v49  ;;  %v8571_v30 = vld [vmem:[%s11788_s6 + $0x1e4] ss:$12 sps:$4 sm:$0xff]   ;;  %v8575_v17 = vld [vmem:[%s11788_s6 + $0x2bc] ss:$12 sps:$4 sm:$0xff]  }
 0x3fd   : > { %3701 = vmatmul.mubr.bf16.gmra.mxu0 %v3471_v46  ;;  %3758 = vmatmul.mubr.bf16.gmra.mxu1 %v3471_v46  ;;  %v8579_v46 = vld [vmem:[%s11788_s6 + $0x2a4] ss:$12 sps:$4 sm:$0xff]  }
 0x3fe   : > { %3940 = vmatpush1.bf16.msra.mxu0 %v8517_v2  ;;  %4001 = vmatpush1.bf16.msra.mxu1 %v8520_v21  ;;  %v8573_v2 = vld [vmem:[%s11788_s6 + $0x2b8] ss:$12 sps:$4 sm:$0xff]   ;;  %v8576_v21 = vld [vmem:[%s11788_s6 + $0x2c0] ss:$12 sps:$4 sm:$0xff]  }
 0x3ff   : > { %7331 = vmatprep.mubr.msk.bf16.mxu0 %vm3638_vm12, %v10461_v10  ;;  %7334 = vmatprep.mubr.msk.bf16.mxu1 %vm3638_vm12, %v10461_v10  ;;  %v8531_v10 = vld [vmem:[%s11788_s6 + $0x4] ss:$12 sps:$4 sm:$0xff]  }
 0x400   : > { %3941 = vmatprep.subr.bf16.mxu0 %v8523_v26  ;;  %4002 = vmatprep.subr.bf16.mxu1 %v8812_v49  ;;  %v8577_v26 = vld [vmem:[%s11788_s6 + $0x2a0] ss:$12 sps:$4 sm:$0xff]  }
 0x402   : > { %3942 = vmatpush1.bf16.msra.mxu0 %v8521_v18  ;;  %4003 = vmatpush1.bf16.msra.mxu1 %v8524_v57  ;;  %v8580_v18 = vld [vmem:[%s11788_s6 + $0x2a8] ss:$12 sps:$4 sm:$0xff]  }
 0x403   : > { %3943 = vmatprep.subr.bf16.mxu0 %v8527_v40  ;;  %4004 = vmatprep.subr.bf16.mxu1 %v8812_v49  ;;  %v8583_v57 = vld [vmem:[%s11788_s6 + $0x37c] ss:$12 sps:$4 sm:$0xff]   ;;  %v8581_v40 = vld [vmem:[%s11788_s6 + $0x378] ss:$12 sps:$4 sm:$0xff]  }
 0x406   : > { %3944 = vmatpush1.bf16.msra.mxu0 %v8525_v19  ;;  %4005 = vmatpush1.bf16.msra.mxu1 %v8528_v22  ;;  %v8584_v19 = vld [vmem:[%s11788_s6 + $0x380] ss:$12 sps:$4 sm:$0xff]   ;;  %v8587_v22 = vld [vmem:[%s11788_s6 + $0x364] ss:$12 sps:$4 sm:$0xff]  }
 0x407   : > { %3945 = vmatprep.subr.bf16.mxu0 %v8531_v10  ;;  %4006 = vmatprep.subr.bf16.mxu1 %v8812_v49  ;;  %v8585_v10 = vld [vmem:[%s11788_s6 + $0x360] ss:$12 sps:$4 sm:$0xff]  }
 0x40a   : > { %3946 = vmatpush1.bf16.msra.mxu0 %v8529_v52  ;;  %4007 = vmatpush1.bf16.msra.mxu1 %v8532_v62  ;;  %v8588_v52 = vld [vmem:[%s11788_s6 + $0x368] ss:$12 sps:$4 sm:$0xff]   ;;  %v8592_v62 = vld [vmem:[%s11788_s6 + $0x350] ss:$12 sps:$4 sm:$0xff]  }
 0x40b   : > { %3959 = vmatprep.subr.bf16.mxu0 %v8535_v45  ;;  %4020 = vmatprep.subr.bf16.mxu1 %v8812_v49  ;;  %v8595_v45 = vld [vmem:[%s11788_s6 + $0x334] ss:$12 sps:$4 sm:$0xff]  }
 0x40e   : > { %3960 = vmatpush2.bf16.msra.mxu0 %v8533_v50  ;;  %4021 = vmatpush2.bf16.msra.mxu1 %v8536_v7  ;;  %v8593_v50 = vld [vmem:[%s11788_s6 + $0x330] ss:$12 sps:$4 sm:$0xff]   ;;  %v8596_v7 = vld [vmem:[%s11788_s6 + $0x338] ss:$12 sps:$4 sm:$0xff]  }
 0x40f   : > { %3961 = vmatprep.subr.bf16.mxu0 %v8539_v32  ;;  %4022 = vmatprep.subr.bf16.mxu1 %v8812_v49  ;;  %v8600_v32 = vld [vmem:[%s11788_s6 + $0x320] ss:$12 sps:$4 sm:$0xff]  }
 0x412   : > { %3962 = vmatpush2.bf16.msra.mxu0 %v8537_v58  ;;  %4023 = vmatpush2.bf16.msra.mxu1 %v8540_v11  ;;  %v8603_v58 = vld [vmem:[%s11788_s6 + $0x304] ss:$12 sps:$4 sm:$0xff]   ;;  %v8601_v11 = vld [vmem:[%s11788_s6 + $0x300] ss:$12 sps:$4 sm:$0xff]  }
 0x413   : > { %4277 = vmatprep.subr.bf16.mxu0 %v8543_v47  ;;  %4338 = vmatprep.subr.bf16.mxu1 %v8812_v49  ;;  %v8604_v47 = vld [vmem:[%s11788_s6 + $0x308] ss:$12 sps:$4 sm:$0xff]  }
 0x415   : > { %3964 = vmatmul.mubr.bf16.vlgmr.msra.gmra.mxu0 %v10458_v12  ;;  %4025 = vmatmul.mubr.bf16.vlgmr.msra.gmra.mxu1 %v10458_v12  ;;  %v8551_v12 = vld [vmem:[%s11788_s6 + $0x25c] ss:$12 sps:$4 sm:$0xff]  }
 0x416   : > { %7332 = vmatprep.mubr.msk.bf16.mxu0 %vm3638_vm12, %v10491_v3  ;;  %7335 = vmatprep.mubr.msk.bf16.mxu1 %vm3638_vm12, %v10491_v3  ;;  %v8549_v3 = vld [vmem:[%s11788_s6 + $0x258] ss:$12 sps:$4 sm:$0xff]  }
 0x417   : > { %4278 = vmatpush1.bf16.msra.mxu0 %v8541_v5  ;;  %4339 = vmatpush1.bf16.msra.mxu1 %v8544_v1  ;;  %v8608_v5 = vld [vmem:[%s11788_s6 + $0x2f0] ss:$12 sps:$4 sm:$0xff]   ;;  %v8611_v1 = vld [vmem:[%s11788_s6 + $0x2d4] ss:$12 sps:$4 sm:$0xff]  }
 0x418   : > { %4279 = vmatprep.subr.bf16.mxu0 %v8547_v4  ;;  %4340 = vmatprep.subr.bf16.mxu1 %v8812_v49  ;;  %v8609_v4 = vld [vmem:[%s11788_s6 + $0x2d0] ss:$12 sps:$4 sm:$0xff]  }
 0x41b   : > { %4280 = vmatpush1.bf16.msra.mxu0 %v8545_v33  ;;  %4341 = vmatpush1.bf16.msra.mxu1 %v8548_v35  ;;  %v8612_v33 = vld [vmem:[%s11788_s6 + $0x2d8] ss:$12 sps:$4 sm:$0xff]  }
 0x41c   : > { %4281 = vmatprep.subr.bf16.mxu0 %v8551_v12  ;;  %4342 = vmatprep.subr.bf16.mxu1 %v8812_v49  ;;  %v8615_v35 = vld [vmem:[%s11788_s6 + $0x3ac] ss:$12 sps:$4 sm:$0xff]   ;;  %v8613_v12 = vld [vmem:[%s11788_s6 + $0x3a8] ss:$12 sps:$4 sm:$0xff]  }
 0x41d   : > { %3974 = vmatmul.mubr.bf16.gmra.mxu0 %v10482_v41  ;;  %4033 = vmatmul.mubr.bf16.gmra.mxu1 %v10482_v41  ;;  %v8559_v41 = vld [vmem:[%s11788_s6 + $0x22c] ss:$12 sps:$4 sm:$0xff]  }
 0x41e   : > { %7333 = vmatprep.mubr.msk.bf16.mxu0 %vm3638_vm12, %v10506_v16  ;;  %7336 = vmatprep.mubr.msk.bf16.mxu1 %vm3638_vm12, %v10506_v16  ;;  %v8557_v16 = vld [vmem:[%s11788_s6 + $0x228] ss:$12 sps:$4 sm:$0xff]  }
 0x41f   : > { %4282 = vmatpush1.bf16.msra.mxu0 %v8549_v3  ;;  %4343 = vmatpush1.bf16.msra.mxu1 %v8552_v42  ;;  %v8616_v3 = vld [vmem:[%s11788_s6 + $0x3b0] ss:$12 sps:$4 sm:$0xff]   ;;  %v8619_v42 = vld [vmem:[%s11788_s6 + $0x394] ss:$12 sps:$4 sm:$0xff]  }
 0x420   : > { %4283 = vmatprep.subr.bf16.mxu0 %v8555_v36  ;;  %4344 = vmatprep.subr.bf16.mxu1 %v8812_v49  ;;  %v8617_v36 = vld [vmem:[%s11788_s6 + $0x390] ss:$12 sps:$4 sm:$0xff]  }
 0x423   : > { %4284 = vmatpush1.bf16.msra.mxu0 %v8553_v60  ;;  %4345 = vmatpush1.bf16.msra.mxu1 %v8556_v25  ;;  %v8620_v60 = vld [vmem:[%s11788_s6 + $0x398] ss:$12 sps:$4 sm:$0xff]  }
 0x424   : > { %4285 = vmatprep.subr.bf16.mxu0 %v8559_v41  ;;  %4346 = vmatprep.subr.bf16.mxu1 %v8812_v49  ;;  %v8623_v25 = vld [vmem:[%s11788_s6 + $0x46c] ss:$12 sps:$4 sm:$0xff]   ;;  %v8621_v41 = vld [vmem:[%s11788_s6 + $0x468] ss:$12 sps:$4 sm:$0xff]  }
 0x425   : > { %3984 = vmatmul.mubr.bf16.gmra.mxu0 %v10497_v44  ;;  %4041 = vmatmul.mubr.bf16.gmra.mxu1 %v10497_v44  ;;  %v8567_v44 = vld [vmem:[%s11788_s6 + $0x1fc] ss:$12 sps:$4 sm:$0xff]  }
 0x426   : > { %7407 = vmatprep.mubr.msk.bf16.mxu0 %vm3638_vm12, %v10518_v23  ;;  %7410 = vmatprep.mubr.msk.bf16.mxu1 %vm3638_vm12, %v10518_v23  ;;  %v8565_v23 = vld [vmem:[%s11788_s6 + $0x1f8] ss:$12 sps:$4 sm:$0xff]  }
 0x427   : > { %4286 = vmatpush1.bf16.msra.mxu0 %v8557_v16  ;;  %4347 = vmatpush1.bf16.msra.mxu1 %v8560_v39  ;;  %v8624_v16 = vld [vmem:[%s11788_s6 + $0x470] ss:$12 sps:$4 sm:$0xff]   ;;  %v8627_v39 = vld [vmem:[%s11788_s6 + $0x454] ss:$12 sps:$4 sm:$0xff]  }
 0x428   : > { %4287 = vmatprep.subr.bf16.mxu0 %v8563_v54  ;;  %4348 = vmatprep.subr.bf16.mxu1 %v8812_v49  ;;  %v8625_v54 = vld [vmem:[%s11788_s6 + $0x450] ss:$12 sps:$4 sm:$0xff]  }
 0x42b   : > { %4288 = vmatpush1.bf16.msra.mxu0 %v8561_v63  ;;  %4349 = vmatpush1.bf16.msra.mxu1 %v8564_v29  ;;  %v8628_v63 = vld [vmem:[%s11788_s6 + $0x458] ss:$12 sps:$4 sm:$0xff]   ;;  %v8632_v29 = vld [vmem:[%s11788_s6 + $0x440] ss:$12 sps:$4 sm:$0xff]  }
 0x42c   : > { %4289 = vmatprep.subr.bf16.mxu0 %v8567_v44  ;;  %4350 = vmatprep.subr.bf16.mxu1 %v8812_v49  ;;  %v8635_v44 = vld [vmem:[%s11788_s6 + $0x424] ss:$12 sps:$4 sm:$0xff]  }
 0x42f   : > { %4290 = vmatpush1.bf16.msra.mxu0 %v8565_v23  ;;  %4351 = vmatpush1.bf16.msra.mxu1 %v8568_v31  ;;  %v8633_v23 = vld [vmem:[%s11788_s6 + $0x420] ss:$12 sps:$4 sm:$0xff]   ;;  %v8636_v31 = vld [vmem:[%s11788_s6 + $0x428] ss:$12 sps:$4 sm:$0xff]  }
 0x430   : > { %4291 = vmatprep.subr.bf16.mxu0 %v8571_v30  ;;  %4352 = vmatprep.subr.bf16.mxu1 %v8812_v49  ;;  %v8640_v30 = vld [vmem:[%s11788_s6 + $0x410] ss:$12 sps:$4 sm:$0xff]  }
 0x433   : > { %4292 = vmatpush1.bf16.msra.mxu0 %v8569_v13  ;;  %4353 = vmatpush1.bf16.msra.mxu1 %v8572_v34  ;;  %v8643_v13 = vld [vmem:[%s11788_s6 + $0x3f4] ss:$12 sps:$4 sm:$0xff]   ;;  %v8641_v34 = vld [vmem:[%s11788_s6 + $0x3f0] ss:$12 sps:$4 sm:$0xff]  }
 0x434   : > { %4305 = vmatprep.subr.bf16.mxu0 %v8575_v17  ;;  %4366 = vmatprep.subr.bf16.mxu1 %v8812_v49  ;;  %v8644_v17 = vld [vmem:[%s11788_s6 + $0x3f8] ss:$12 sps:$4 sm:$0xff]  }
 0x437   : > { %4306 = vmatpush2.bf16.msra.mxu0 %v8573_v2  ;;  %4367 = vmatpush2.bf16.msra.mxu1 %v8576_v21  ;;  %v8648_v2 = vld [vmem:[%s11788_s6 + $0x3e0] ss:$12 sps:$4 sm:$0xff]   ;;  %v8651_v21 = vld [vmem:[%s11788_s6 + $0x3c4] ss:$12 sps:$4 sm:$0xff]  }
 0x438   : > { %4307 = vmatprep.subr.bf16.mxu0 %v8579_v46  ;;  %4368 = vmatprep.subr.bf16.mxu1 %v8812_v49  ;;  %v8649_v46 = vld [vmem:[%s11788_s6 + $0x3c0] ss:$12 sps:$4 sm:$0xff]  }
 0x43b   : > { %4308 = vmatpush2.bf16.msra.mxu0 %v8577_v26  ;;  %4369 = vmatpush2.bf16.msra.mxu1 %v8580_v18  ;;  %v8652_v26 = vld [vmem:[%s11788_s6 + $0x3c8] ss:$12 sps:$4 sm:$0xff]  }
 0x43c   : > { %4644 = vmatprep.subr.bf16.mxu0 %v8583_v57  ;;  %4705 = vmatprep.subr.bf16.mxu1 %v8812_v49  ;;  %v8655_v18 = vld [vmem:[%s11788_s6 + $0x49c] ss:$12 sps:$4 sm:$0xff]   ;;  %v8653_v57 = vld [vmem:[%s11788_s6 + $0x498] ss:$12 sps:$4 sm:$0xff]  }
 0x43e   : > { %4310 = vmatmul.mubr.bf16.vlgmr.msra.gmra.mxu0 %v10503_v55  ;;  %4371 = vmatmul.mubr.bf16.vlgmr.msra.gmra.mxu1 %v10503_v55  ;;  %v8591_v55 = vld [vmem:[%s11788_s6 + $0x34c] ss:$12 sps:$4 sm:$0xff]  }
 0x43f   : > { %7408 = vmatprep.mubr.msk.bf16.mxu0 %vm3638_vm12, %v10552_v20  ;;  %7411 = vmatprep.mubr.msk.bf16.mxu1 %vm3638_vm12, %v10552_v20  ;;  %v8589_v20 = vld [vmem:[%s11788_s6 + $0x348] ss:$12 sps:$4 sm:$0xff]  }
 0x440   : > { %4645 = vmatpush1.bf16.msra.mxu0 %v8581_v40  ;;  %4706 = vmatpush1.bf16.msra.mxu1 %v8584_v19  ;;  %v8656_v40 = vld [vmem:[%s11788_s6 + $0x4a0] ss:$12 sps:$4 sm:$0xff]   ;;  %v8659_v19 = vld [vmem:[%s11788_s6 + $0x484] ss:$12 sps:$4 sm:$0xff]  }
 0x441   : > { %4646 = vmatprep.subr.bf16.mxu0 %v8587_v22  ;;  %4707 = vmatprep.subr.bf16.mxu1 %v8812_v49  ;;  %v8657_v22 = vld [vmem:[%s11788_s6 + $0x480] ss:$12 sps:$4 sm:$0xff]  }
 0x444   : > { %4647 = vmatpush1.bf16.msra.mxu0 %v8585_v10  ;;  %4708 = vmatpush1.bf16.msra.mxu1 %v8588_v52  ;;  %v8660_v10 = vld [vmem:[%s11788_s6 + $0x488] ss:$12 sps:$4 sm:$0xff]  }
 0x445   : > { %4648 = vmatprep.subr.bf16.mxu0 %v8591_v55  ;;  %4709 = vmatprep.subr.bf16.mxu1 %v8812_v49 }
 0x446   : > { %4320 = vmatmul.mubr.bf16.gmra.mxu0 %v10538_v61  ;;  %4379 = vmatmul.mubr.bf16.gmra.mxu1 %v10538_v61  ;;  %v8599_v61 = vld [vmem:[%s11788_s6 + $0x31c] ss:$12 sps:$4 sm:$0xff]  }
 0x447   : > { %7409 = vmatprep.mubr.msk.bf16.mxu0 %vm3638_vm12, %v10534_v8  ;;  %7412 = vmatprep.mubr.msk.bf16.mxu1 %vm3638_vm12, %v10534_v8  ;;  %v8597_v8 = vld [vmem:[%s11788_s6 + $0x318] ss:$12 sps:$4 sm:$0xff]  }
 0x448   : > { %4649 = vmatpush1.bf16.msra.mxu0 %v8589_v20  ;;  %4710 = vmatpush1.bf16.msra.mxu1 %v8592_v62 }
 0x449   : > { %4650 = vmatprep.subr.bf16.mxu0 %v8595_v45  ;;  %4711 = vmatprep.subr.bf16.mxu1 %v8812_v49 }
 0x44c   : > { %4651 = vmatpush1.bf16.msra.mxu0 %v8593_v50  ;;  %4712 = vmatpush1.bf16.msra.mxu1 %v8596_v7 }
 0x44d   : > { %4652 = vmatprep.subr.bf16.mxu0 %v8599_v61  ;;  %4713 = vmatprep.subr.bf16.mxu1 %v8812_v49 }
 0x44e   : > { %4330 = vmatmul.mubr.bf16.gmra.mxu0 %v10521_v27  ;;  %4387 = vmatmul.mubr.bf16.gmra.mxu1 %v10521_v27  ;;  %v8607_v27 = vld [vmem:[%s11788_s6 + $0x2ec] ss:$12 sps:$4 sm:$0xff]  }
 0x44f   : > { %7483 = vmatprep.mubr.msk.bf16.mxu0 %vm3638_vm12, %v10574_v0  ;;  %7486 = vmatprep.mubr.msk.bf16.mxu1 %vm3638_vm12, %v10574_v0  ;;  %v8605_v0 = vld [vmem:[%s11788_s6 + $0x2e8] ss:$12 sps:$4 sm:$0xff]  }
 0x450   : > { %4653 = vmatpush1.bf16.msra.mxu0 %v8597_v8  ;;  %4714 = vmatpush1.bf16.msra.mxu1 %v8600_v32 }
 0x451   : > { %4654 = vmatprep.subr.bf16.mxu0 %v8603_v58  ;;  %4715 = vmatprep.subr.bf16.mxu1 %v8812_v49 }
 0x454   : > { %4655 = vmatpush1.bf16.msra.mxu0 %v8601_v11  ;;  %4716 = vmatpush1.bf16.msra.mxu1 %v8604_v47 }
 0x455   : > { %4656 = vmatprep.subr.bf16.mxu0 %v8607_v27  ;;  %4717 = vmatprep.subr.bf16.mxu1 %v8812_v49 }
 0x458   : > { %4657 = vmatpush1.bf16.msra.mxu0 %v8605_v0  ;;  %4718 = vmatpush1.bf16.msra.mxu1 %v8608_v5 }
 0x459   : > { %4658 = vmatprep.subr.bf16.mxu0 %v8611_v1  ;;  %4719 = vmatprep.subr.bf16.mxu1 %v8812_v49 }
 0x45c   : > { %4659 = vmatpush1.bf16.msra.mxu0 %v8609_v4  ;;  %4720 = vmatpush1.bf16.msra.mxu1 %v8612_v33 }
 0x45d   : > { %4672 = vmatprep.subr.bf16.mxu0 %v8615_v35  ;;  %4733 = vmatprep.subr.bf16.mxu1 %v8812_v49 }
 0x460   : > { %4673 = vmatpush2.bf16.msra.mxu0 %v8613_v12  ;;  %4734 = vmatpush2.bf16.msra.mxu1 %v8616_v3 }
 0x461   : > { %4674 = vmatprep.subr.bf16.mxu0 %v8619_v42  ;;  %4735 = vmatprep.subr.bf16.mxu1 %v8812_v49 }
 0x464   : > { %4675 = vmatpush2.bf16.msra.mxu0 %v8617_v36  ;;  %4736 = vmatpush2.bf16.msra.mxu1 %v8620_v60 }
 0x465   : > { %4999 = vmatprep.subr.bf16.mxu0 %v8623_v25  ;;  %5060 = vmatprep.subr.bf16.mxu1 %v8812_v49 }
 0x467   : > { %4677 = vmatmul.mubr.bf16.vlgmr.msra.gmra.mxu0 %v10588_v43  ;;  %4738 = vmatmul.mubr.bf16.vlgmr.msra.gmra.mxu1 %v10588_v43  ;;  %v8631_v43 = vld [vmem:[%s11788_s6 + $0x43c] ss:$12 sps:$4 sm:$0xff]  }
 0x468   : > { %7484 = vmatprep.mubr.msk.bf16.mxu0 %vm3638_vm12, %v10601_v15  ;;  %7487 = vmatprep.mubr.msk.bf16.mxu1 %vm3638_vm12, %v10601_v15  ;;  %v8629_v15 = vld [vmem:[%s11788_s6 + $0x438] ss:$12 sps:$4 sm:$0xff]  }
 0x469   : > { %5000 = vmatpush1.bf16.msra.mxu0 %v8621_v41  ;;  %5061 = vmatpush1.bf16.msra.mxu1 %v8624_v16 }
 0x46a   : > { %5001 = vmatprep.subr.bf16.mxu0 %v8627_v39  ;;  %5062 = vmatprep.subr.bf16.mxu1 %v8812_v49 }
 0x46d   : > { %5002 = vmatpush1.bf16.msra.mxu0 %v8625_v54  ;;  %5063 = vmatpush1.bf16.msra.mxu1 %v8628_v63 }
 0x46e   : > { %5003 = vmatprep.subr.bf16.mxu0 %v8631_v43  ;;  %5064 = vmatprep.subr.bf16.mxu1 %v8812_v49 }
 0x46f   : > { %4687 = vmatmul.mubr.bf16.gmra.mxu0 %v10611_v24  ;;  %4746 = vmatmul.mubr.bf16.gmra.mxu1 %v10611_v24  ;;  %v8639_v24 = vld [vmem:[%s11788_s6 + $0x40c] ss:$12 sps:$4 sm:$0xff]  }
 0x470   : > { %7485 = vmatprep.mubr.msk.bf16.mxu0 %vm3638_vm12, %v10576_v6  ;;  %7488 = vmatprep.mubr.msk.bf16.mxu1 %vm3638_vm12, %v10576_v6  ;;  %v8637_v6 = vld [vmem:[%s11788_s6 + $0x408] ss:$12 sps:$4 sm:$0xff]  }
 0x471   : > { %5004 = vmatpush1.bf16.msra.mxu0 %v8629_v15  ;;  %5065 = vmatpush1.bf16.msra.mxu1 %v8632_v29 }
 0x472   : > { %5005 = vmatprep.subr.bf16.mxu0 %v8635_v44  ;;  %5066 = vmatprep.subr.bf16.mxu1 %v8812_v49 }
 0x475   : > { %5006 = vmatpush1.bf16.msra.mxu0 %v8633_v23  ;;  %5067 = vmatpush1.bf16.msra.mxu1 %v8636_v31 }
 0x476   : > { %5007 = vmatprep.subr.bf16.mxu0 %v8639_v24  ;;  %5068 = vmatprep.subr.bf16.mxu1 %v8812_v49 }
 0x477   : > { %4697 = vmatmul.mubr.bf16.gmra.mxu0 %v10590_v51  ;;  %4754 = vmatmul.mubr.bf16.gmra.mxu1 %v10590_v51  ;;  %v8647_v51 = vld [vmem:[%s11788_s6 + $0x3dc] ss:$12 sps:$4 sm:$0xff]  }
 0x478   : > { %7559 = vmatprep.mubr.msk.bf16.mxu0 %vm3638_vm12, %v10593_v48  ;;  %7562 = vmatprep.mubr.msk.bf16.mxu1 %vm3638_vm12, %v10593_v48  ;;  %v8645_v48 = vld [vmem:[%s11788_s6 + $0x3d8] ss:$12 sps:$4 sm:$0xff]  }
 0x479   : > { %5008 = vmatpush1.bf16.msra.mxu0 %v8637_v6  ;;  %5069 = vmatpush1.bf16.msra.mxu1 %v8640_v30 }
 0x47a   : > { %5009 = vmatprep.subr.bf16.mxu0 %v8643_v13  ;;  %5070 = vmatprep.subr.bf16.mxu1 %v8812_v49 }
 0x47d   : > { %5010 = vmatpush1.bf16.msra.mxu0 %v8641_v34  ;;  %5071 = vmatpush1.bf16.msra.mxu1 %v8644_v17 }
 0x47e   : > { %5011 = vmatprep.subr.bf16.mxu0 %v8647_v51  ;;  %5072 = vmatprep.subr.bf16.mxu1 %v8812_v49 }
 0x481   : > { %5012 = vmatpush1.bf16.msra.mxu0 %v8645_v48  ;;  %5073 = vmatpush1.bf16.msra.mxu1 %v8648_v2 }
 0x482   : > { %5013 = vmatprep.subr.bf16.mxu0 %v8651_v21  ;;  %5074 = vmatprep.subr.bf16.mxu1 %v8812_v49 }
 0x485   : > { %5014 = vmatpush1.bf16.msra.mxu0 %v8649_v46  ;;  %5075 = vmatpush1.bf16.msra.mxu1 %v8652_v26 }
 0x486   : > { %5027 = vmatprep.subr.bf16.mxu0 %v8655_v18  ;;  %5088 = vmatprep.subr.bf16.mxu1 %v8812_v49 }
 0x489   : > { %5028 = vmatpush2.bf16.msra.mxu0 %v8653_v57  ;;  %5089 = vmatpush2.bf16.msra.mxu1 %v8656_v40 }
 0x48a   : > { %5029 = vmatprep.subr.bf16.mxu0 %v8659_v19  ;;  %5090 = vmatprep.subr.bf16.mxu1 %v8812_v49 }
 0x48d   : > { %5030 = vmatpush2.bf16.msra.mxu0 %v8657_v22  ;;  %5091 = vmatpush2.bf16.msra.mxu1 %v8660_v10 }
 0x490   : > { %5032 = vmatmul.mubr.bf16.vlgmr.msra.gmra.mxu0 %v10568_v38  ;;  %5093 = vmatmul.mubr.bf16.vlgmr.msra.gmra.mxu1 %v10568_v38 }
 0x491   : > { %7560 = vmatprep.mubr.msk.bf16.mxu0 %vm3638_vm12, %v10615_v53  ;;  %7563 = vmatprep.mubr.msk.bf16.mxu1 %vm3638_vm12, %v10615_v53 }
 0x498   : > { %5042 = vmatmul.mubr.bf16.gmra.mxu0 %v10621_v37  ;;  %5101 = vmatmul.mubr.bf16.gmra.mxu1 %v10621_v37 }
 0x499   : > { %7561 = vmatprep.mubr.msk.bf16.mxu0 %vm3638_vm12, %v10596_v9  ;;  %7564 = vmatprep.mubr.msk.bf16.mxu1 %vm3638_vm12, %v10596_v9 }
 0x4a0   : > { %5052 = vmatmul.mubr.bf16.gmra.mxu0 %v10604_v28  ;;  %5109 = vmatmul.mubr.bf16.gmra.mxu1 %v10604_v28 }
 0x4a1   : > { %5368 = vmatprep.mubr.bf16.mxu0 %v8812_v49 }
 0x4ad   : > { %v3682_v38 = vpop.f32.mrf.mxu0  ;;  %v3743_v52 = vpop.f32.mrf.mxu1 }
 0x4af   : > { %v3684_v55 = vpop.f32.mrf.mxu0  ;;  %v3745_v53 = vpop.f32.mrf.mxu1 }
 0x4b1   : > { %v3686_v20 = vpop.f32.mrf.mxu0  ;;  %v3746_v62 = vpop.f32.mrf.mxu1 }
 0x4b3   : > { %v3688_v45 = vpop.f32.mrf.mxu0  ;;  %v3748_v37 = vpop.f32.mrf.mxu1 }
 0x4b5   : > { %v3692_v50 = vpop.f32.mrf.mxu0  ;;  %v3751_v7 = vpop.f32.mrf.mxu1 }
 0x4b7   : > { %v3694_v61 = vpop.f32.mrf.mxu0  ;;  %v3753_v8 = vpop.f32.mrf.mxu1 }
 0x4b9   : > { %v3696_v32 = vpop.f32.mrf.mxu0  ;;  %v3754_v9 = vpop.f32.mrf.mxu1 }
 0x4bb   : > { %v3698_v58 = vpop.f32.mrf.mxu0  ;;  %v3756_v11 = vpop.f32.mrf.mxu1 }
 0x4bd   : > { %v3702_v47 = vpop.f32.mrf.mxu0  ;;  %v3759_v28 = vpop.f32.mrf.mxu1 }
 0x4bf   : > { %v3704_v27 = vpop.f32.mrf.mxu0  ;;  %v3761_v49 = vpop.f32.mrf.mxu1 }
 0x4c1   : > { %v3706_v0 = vpop.f32.mrf.mxu0  ;;  %v3762_v5 = vpop.f32.mrf.mxu1 }
 0x4c3   : > { %v3707_v1 = vpop.f32.mrf.mxu0  ;;  %v3763_v4 = vpop.f32.mrf.mxu1 }
 0x4d5   : > { %v3965_v33 = vpop.f32.mrf.mxu0  ;;  %v4026_v35 = vpop.f32.mrf.mxu1 }
 0x4d6   : > { %v3966_v12 = vadd.f32 %v3965_v33, %v3682_v38  ;;  %v4027_v3 = vadd.f32 %v4026_v35, %v3743_v52 }
 0x4d7   : > { %v3967_v42 = vpop.f32.mrf.mxu0  ;;  %v4028_v36 = vpop.f32.mrf.mxu1 }
 0x4d8   : > { %v3968_v60 = vadd.f32 %v3967_v42, %v3684_v55  ;;  %v8813_v55 = vmov 0.0  }
 0x4d9   : > { %v3969_v25 = vpop.f32.mrf.mxu0  ;;  %v4029_v41 = vpop.f32.mrf.mxu1  ;;  %7852 = vmatprep.subr.bf16.mxu1 %v8813_v55  ;;  %7858 = vmatprep.mubr.msk.bf16.mxu1 %vm8814_vm13, %v8813_v55 }
 0x4da   : > { %v3970_v16 = vadd.f32 %v3969_v25, %v3686_v20  ;;  %v4030_v39 = vadd.f32 %v4029_v41, %v3746_v62 }
 0x4db   : > { %v3971_v54 = vpop.f32.mrf.mxu0  ;;  %v4031_v63 = vpop.f32.mrf.mxu1 }
 0x4dc   : > { %v3972_v43 = vadd.f32 %v3971_v54, %v3688_v45 }
 0x4dd   : > { %v3975_v15 = vpop.f32.mrf.mxu0  ;;  %v4034_v29 = vpop.f32.mrf.mxu1 }
 0x4de   : > { %v3976_v44 = vadd.f32 %v3975_v15, %v3692_v50  ;;  %v4035_v23 = vadd.f32 %v4034_v29, %v3751_v7 }
 0x4df   : > { %v3977_v31 = vpop.f32.mrf.mxu0  ;;  %v4036_v24 = vpop.f32.mrf.mxu1 }
 0x4e0   : > { %v3978_v6 = vadd.f32 %v3977_v31, %v3694_v61 }
 0x4e1   : > { %v3979_v30 = vpop.f32.mrf.mxu0  ;;  %v4037_v13 = vpop.f32.mrf.mxu1 }
 0x4e2   : > { %v3980_v34 = vadd.f32 %v3979_v30, %v3696_v32  ;;  %v4038_v17 = vadd.f32 %v4037_v13, %v3754_v9 }
 0x4e3   : > { %v3981_v51 = vpop.f32.mrf.mxu0  ;;  %v4039_v48 = vpop.f32.mrf.mxu1 }
 0x4e4   : > { %v3982_v2 = vadd.f32 %v3981_v51, %v3698_v58 }
 0x4e5   : > { %v3985_v21 = vpop.f32.mrf.mxu0  ;;  %v4042_v46 = vpop.f32.mrf.mxu1 }
 0x4e6   : > { %v3986_v26 = vadd.f32 %v3985_v21, %v3702_v47  ;;  %v4043_v18 = vadd.f32 %v4042_v46, %v3759_v28 }
 0x4e7   : > { %v3987_v57 = vpop.f32.mrf.mxu0  ;;  %v4044_v40 = vpop.f32.mrf.mxu1 }
 0x4e8   : > { %v3988_v19 = vadd.f32 %v3987_v57, %v3704_v27 }
 0x4e9   : > { %v3989_v22 = vpop.f32.mrf.mxu0  ;;  %v4045_v10 = vpop.f32.mrf.mxu1 }
 0x4eb   : > { %v3990_v38 = vpop.f32.mrf.mxu0  ;;  %v4046_v52 = vpop.f32.mrf.mxu1 }
 0x4fe   : > { %v4311_v53 = vpop.f32.mrf.mxu0  ;;  %v4372_v20 = vpop.f32.mrf.mxu1 }
 0x4ff   : > { %v4394_v62 = vadd.f32 %v4311_v53, %v3966_v12  ;;  %v4396_v45 = vadd.f32 %v4372_v20, %v4027_v3 }
 0x500   : > { %v4313_v37 = vpop.f32.mrf.mxu0  ;;  %v4374_v50 = vpop.f32.mrf.mxu1 }
 0x501   : > { %v11071_v7 = vadd.f32 %v4313_v37, %v3968_v60  ;;  %v5143_v50 = vsub.s32 2, %v10433_v14 }
 0x502   : > { %v4315_v61 = vpop.f32.mrf.mxu0  ;;  %v4375_v8 = vpop.f32.mrf.mxu1 }
 0x503   : > { %v11073_v32 = vadd.f32 %v4315_v61, %v3970_v16  ;;  %v11075_v9 = vadd.f32 %v4375_v8, %v4030_v39  ;;  %v5131_v61 = vld [vmem:[%s11737_s7] sm:$0x7] }
 0x504   : > { %v4317_v58 = vpop.f32.mrf.mxu0  ;;  %v4377_v11 = vpop.f32.mrf.mxu1  ;;  %v11103_v8 = vrot.slane %v5131_v61, %v3314_v56 }
 0x505   : > { %v11077_v47 = vadd.f32 %v4317_v58, %v3972_v43  ;;  %v11105_v58 = vrot.slane %v5131_v61, %v5143_v50 }
 0x506   : > { %v4321_v28 = vpop.f32.mrf.mxu0  ;;  %v4380_v27 = vpop.f32.mrf.mxu1 }
 0x507   : > { %v11079_v49 = vadd.f32 %v4321_v28, %v3976_v44  ;;  %v11081_v0 = vadd.f32 %v4380_v27, %v4035_v23 }
 0x508   : > { %v4323_v5 = vpop.f32.mrf.mxu0  ;;  %v4382_v1 = vpop.f32.mrf.mxu1 }
 0x509   : > { %v11083_v4 = vadd.f32 %v4323_v5, %v3978_v6 }
 0x50a   : > { %v4325_v33 = vpop.f32.mrf.mxu0  ;;  %v4383_v35 = vpop.f32.mrf.mxu1 }
 0x50b   : > { %v11085_v12 = vadd.f32 %v4325_v33, %v3980_v34  ;;  %v11087_v3 = vadd.f32 %v4383_v35, %v4038_v17  ;;  %v11110_v33 = vrot.slane %v5131_v61, %v3318_v59 }
 0x50c   : > { %v4327_v42 = vpop.f32.mrf.mxu0  ;;  %v4385_v36 = vpop.f32.mrf.mxu1 }
 0x50d   : > { %v11089_v60 = vadd.f32 %v4327_v42, %v3982_v2 }
 0x50e   : > { %v4331_v25 = vpop.f32.mrf.mxu0  ;;  %v4388_v41 = vpop.f32.mrf.mxu1 }
 0x50f   : > { %v11091_v16 = vadd.f32 %v4331_v25, %v3986_v26  ;;  %v11093_v39 = vadd.f32 %v4388_v41, %v4043_v18 }
 0x510   : > { %v4333_v54 = vpop.f32.mrf.mxu0  ;;  %v4390_v63 = vpop.f32.mrf.mxu1 }
 0x511   : > { %v11095_v43 = vadd.f32 %v4333_v54, %v3988_v19 }
 0x512   : > { %v4335_v15 = vpop.f32.mrf.mxu0  ;;  %v4391_v29 = vpop.f32.mrf.mxu1 }
 0x514   : > { %v4336_v44 = vpop.f32.mrf.mxu0  ;;  %v4392_v23 = vpop.f32.mrf.mxu1 }
 0x527   : > { %v4678_v31 = vpop.f32.mrf.mxu0  ;;  %v4739_v24 = vpop.f32.mrf.mxu1 }
 0x528   : > { %v4761_v6 = vadd.f32 %v4678_v31, %v4394_v62  ;;  %v4763_v30 = vadd.f32 %v4739_v24, %v4396_v45 }
 0x529   : > { %v4680_v13 = vpop.f32.mrf.mxu0  ;;  %v4741_v34 = vpop.f32.mrf.mxu1 }
 0x52a   : > { %v4762_v27 = vadd.f32 %v4680_v13, %v11071_v7 }
 0x52b   : > { %v4682_v17 = vpop.f32.mrf.mxu0  ;;  %v4742_v51 = vpop.f32.mrf.mxu1 }
 0x52c   : > { %v4764_v36 = vadd.f32 %v4682_v17, %v11073_v32  ;;  %v4766_v54 = vadd.f32 %v4742_v51, %v11075_v9 }
 0x52d   : > { %v4684_v48 = vpop.f32.mrf.mxu0  ;;  %v4744_v2 = vpop.f32.mrf.mxu1 }
 0x52e   : > { %v4765_v63 = vadd.f32 %v4684_v48, %v11077_v47 }
 0x52f   : > { %v4688_v21 = vpop.f32.mrf.mxu0  ;;  %v4747_v46 = vpop.f32.mrf.mxu1 }
 0x530   : > { %v4767_v7 = vadd.f32 %v4688_v21, %v11079_v49  ;;  %v4769_v15 = vadd.f32 %v4747_v46, %v11081_v0 }
 0x531   : > { %v4690_v26 = vpop.f32.mrf.mxu0  ;;  %v4749_v18 = vpop.f32.mrf.mxu1 }
 0x532   : > { %v4768_v31 = vadd.f32 %v4690_v26, %v11083_v4 }
 0x533   : > { %v4692_v57 = vpop.f32.mrf.mxu0  ;;  %v4750_v40 = vpop.f32.mrf.mxu1 }
 0x534   : > { %v4770_v24 = vadd.f32 %v4692_v57, %v11085_v12  ;;  %v4772_v9 = vadd.f32 %v4750_v40, %v11087_v3 }
 0x535   : > { %v4694_v19 = vpop.f32.mrf.mxu0  ;;  %v4752_v22 = vpop.f32.mrf.mxu1 }
 0x536   : > { %v4771_v0 = vadd.f32 %v4694_v19, %v11089_v60 }
 0x537   : > { %v4698_v10 = vpop.f32.mrf.mxu0  ;;  %v4755_v38 = vpop.f32.mrf.mxu1 }
 0x538   : > { %v4775_v13 = vadd.f32 %v4755_v38, %v11093_v39 }
 0x539   : > { %v4700_v52 = vpop.f32.mrf.mxu0  ;;  %v4757_v53 = vpop.f32.mrf.mxu1 }
 0x53a   : > { %v11131_v34 = vadd.f32 %v4700_v52, %v11095_v43 }
 0x53b   : > { %v4702_v20 = vpop.f32.mrf.mxu0  ;;  %v4758_v62 = vpop.f32.mrf.mxu1 }
 0x53d   : > { %v4703_v45 = vpop.f32.mrf.mxu0  ;;  %v4759_v37 = vpop.f32.mrf.mxu1 }
 0x550   : > { %v5033_v11 = vpop.f32.mrf.mxu0  ;;  %v5094_v28 = vpop.f32.mrf.mxu1 }
 0x551   : > { %v5116_v5 = vadd.f32 %v5033_v11, %v4761_v6  ;;  %v5118_v1 = vadd.f32 %v5094_v28, %v4763_v30  ;;  %v4773_v30 = vadd.f32 %v4698_v10, %v11091_v16 }
 0x552   : > { %v5035_v35 = vpop.f32.mrf.mxu0  ;;  %v5096_v42 = vpop.f32.mrf.mxu1 }
 0x553   : > { %v5148_v25 = vadd.f32 %v11103_v8, %v5116_v5  ;;  %v5150_v56 = vadd.f32 %v11105_v58, %v5118_v1  ;;  %v5117_v41 = vadd.f32 %v5035_v35, %v4762_v27 }
 0x554   : > { %v5037_v14 = vpop.f32.mrf.mxu0  ;;  %v5097_v59 = vpop.f32.mrf.mxu1 }
 0x555   : > { %v11119_v29 = vmax.f32 %v5148_v25, 0.0  ;;  %v11121_v44 = vmax.f32 %v5150_v56, 0.0  ;;  %v5149_v32 = vadd.f32 %v11110_v33, %v5117_v41  ;;  %v5119_v23 = vadd.f32 %v5037_v14, %v4764_v36 }
 0x556   : > { %v5121_v47 = vadd.f32 %v5097_v59, %v4766_v54  ;;  %v5039_v6 = vpop.f32.mrf.mxu0  ;;  %v5099_v49 = vpop.f32.mrf.mxu1 }
 0x557   : > { %v11133_v17 = vmax.f32 %v5149_v32, 0.0  ;;  %v5151_v4 = vadd.f32 %v11103_v8, %v5119_v23  ;;  %v5120_v51 = vadd.f32 %v5039_v6, %v4765_v63  ;;  %v5193_v2 = vrot.slane %v11119_v29, 1 }
 0x558   : > { %v5153_v12 = vadd.f32 %v11105_v58, %v5121_v47  ;;  %v5043_v3 = vpop.f32.mrf.mxu0  ;;  %v5102_v48 = vpop.f32.mrf.mxu1  ;;  %v5199_v60 = vrot.slane %v11121_v44, 1 }
 0x559   : > { %v5122_v21 = vadd.f32 %v5043_v3, %v4767_v7  ;;  %v5124_v16 = vadd.f32 %v5102_v48, %v4769_v15  ;;  %v5196_v39 = vrot.slane %v11133_v17, 1  ;;  %v5253_v43 = vrot.slane %v11133_v17, 2 }
 0x55a   : > { %v11141_v46 = vmax.f32 %v5151_v4, 0.0  ;;  %v11143_v26 = vmax.f32 %v5153_v12, 0.0  ;;  %v5045_v18 = vpop.f32.mrf.mxu0  ;;  %v5104_v57 = vpop.f32.mrf.mxu1  ;;  %v5152_v40 = vadd.f32 %v11110_v33, %v5120_v51 }
 0x55b   : > { %v5154_v19 = vadd.f32 %v11103_v8, %v5122_v21  ;;  %v5156_v22 = vadd.f32 %v11105_v58, %v5124_v16  ;;  %v5123_v10 = vadd.f32 %v5045_v18, %v4768_v31 }
 0x55c   : > { %v5194_v38 = vrot.slane %v11141_v46, 1  ;;  %v5251_v52 = vrot.slane %v11141_v46, 2  ;;  %v5200_v53 = vrot.slane %v11143_v26, 1  ;;  %v5257_v20 = vrot.slane %v11143_v26, 2  ;;  %v5047_v62 = vpop.f32.mrf.mxu0  ;;  %v5105_v45 = vpop.f32.mrf.mxu1 }
 0x55d   : > { %v11152_v37 = vmax.f32 %v5152_v40, 0.0  ;;  %v11154_v50 = vmax.f32 %v5154_v19, 0.0  ;;  %v11156_v61 = vmax.f32 %v5156_v22, 0.0  ;;  %v5155_v11 = vadd.f32 %v11110_v33, %v5123_v10 }
 0x55e   : > { %v11160_v28 = vsel %vm805_vm1, %v5193_v2, %v5194_v38  ;;  %v11163_v27 = vsel %vm805_vm1, %v5199_v60, %v5200_v53  ;;  %v5125_v5 = vadd.f32 %v5047_v62, %v4770_v24  ;;  %v5127_v1 = vadd.f32 %v5105_v45, %v4772_v9  ;;  %v5049_v35 = vpop.f32.mrf.mxu0  ;;  %v5107_v42 = vpop.f32.mrf.mxu1 }
 0x55f   : > { %v5197_v36 = vrot.slane %v11152_v37, 1  ;;  %v5254_v25 = vrot.slane %v11152_v37, 2  ;;  %v5202_v56 = vrot.slane %v11154_v50, 1  ;;  %v5259_v41 = vrot.slane %v11154_v50, 2 }
 0x560   : > { %v5206_v54 = vrot.slane %v11156_v61, 1  ;;  %v5263_v63 = vrot.slane %v11156_v61, 2  ;;  %v11171_v7 = vmax.f32 %v5155_v11, 0.0  ;;  %v5157_v15 = vadd.f32 %v11103_v8, %v5125_v5  ;;  %v5053_v14 = vpop.f32.mrf.mxu0  ;;  %v5110_v59 = vpop.f32.mrf.mxu1 }
 0x561   : > { %v11175_v32 = vsel %vm805_vm1, %v5194_v38, %v5202_v56  ;;  %v5159_v23 = vadd.f32 %v11105_v58, %v5127_v1  ;;  %v5126_v31 = vadd.f32 %v5049_v35, %v4771_v0  ;;  %v5128_v24 = vadd.f32 %v5053_v14, %v4773_v30 }
 0x562   : > { %v11179_v9 = vsel %vm805_vm1, %v5200_v53, %v5206_v54  ;;  %v5204_v47 = vrot.slane %v11171_v7, 1  ;;  %v5261_v6 = vrot.slane %v11171_v7, 2  ;;  %v11183_v49 = vmax.f32 %v5157_v15, 0.0  ;;  %v5055_v4 = vpop.f32.mrf.mxu0  ;;  %v5112_v12 = vpop.f32.mrf.mxu1 }
 0x563   : > { %v5174_v51 = vmax.f32 %v5159_v23, 0.0  ;;  %v5158_v3 = vadd.f32 %v11110_v33, %v5126_v31  ;;  %v5160_v48 = vadd.f32 %v11103_v8, %v5128_v24  ;;  %v5130_v2 = vadd.f32 %v5110_v59, %v4775_v13 }
 0x564   : > { %v5208_v0 = vrot.slane %v11183_v49, 1  ;;  %v5265_v30 = vrot.slane %v11183_v49, 2  ;;  %v5129_v60 = vadd.f32 %v5055_v4, %v11131_v34  ;;  %v5057_v21 = vpop.f32.mrf.mxu0  ;;  %v5113_v16 = vpop.f32.mrf.mxu1  ;;  %v11193_v18 = vsel %vm805_vm1, %v5196_v39, %v5197_v36 }
 0x565   : > { %v5212_v57 = vrot.slane %v5174_v51, 1  ;;  %v5269_v40 = vrot.slane %v5174_v51, 2  ;;  %v5173_v19 = vmax.f32 %v5158_v3, 0.0  ;;  %v5175_v22 = vmax.f32 %v5160_v48, 0.0 }
 0x566   : > { %v5209_v8 = vsel %vm805_vm1, %v5202_v56, %v5208_v0  ;;  %v5162_v13 = vadd.f32 %v11105_v58, %v5130_v2  ;;  %v5161_v10 = vadd.f32 %v11110_v33, %v5129_v60  ;;  %v5058_v38 = vpop.f32.mrf.mxu0  ;;  %v5114_v53 = vpop.f32.mrf.mxu1  ;;  %v5266_v34 = vsel %vm1074_vm2, %v5259_v41, %v5265_v30 }
 0x567   : > { %v5213_v62 = vsel %vm805_vm1, %v5206_v54, %v5212_v57  ;;  %v5210_v39 = vrot.slane %v5173_v19, 1  ;;  %v5267_v45 = vrot.slane %v5173_v19, 2  ;;  %v5214_v11 = vrot.slane %v5175_v22, 1 }
 0x568   : > { %v5271_v5 = vrot.slane %v5175_v22, 2  ;;  %v5177_v1 = vmax.f32 %v5162_v13, 0.0  ;;  %v5176_v35 = vmax.f32 %v5161_v10, 0.0  ;;  %v5243_v42 = vmax.f32 %v11156_v61, %v5213_v62 }
 0x569   : > { %v5215_v58 = vsel %vm805_vm1, %v5208_v0, %v5214_v11  ;;  %v5247_v56 = vmax.f32 %v5175_v22, %v5214_v11  ;;  %v5211_v33 = vsel %vm805_vm1, %v5204_v47, %v5210_v39  ;;  %v5268_v15 = vsel %vm1074_vm2, %v5261_v6, %v5267_v45 }
 0x56a   : > { %v5218_v54 = vrot.slane %v5177_v1, 1  ;;  %v5275_v14 = vrot.slane %v5177_v1, 2  ;;  %v5216_v59 = vrot.slane %v5176_v35, 1  ;;  %v5273_v23 = vrot.slane %v5176_v35, 2 }
 0x56b   : > { %v5304_v31 = vmax.f32 %v5247_v56, %v5271_v5  ;;  %v5242_v24 = vmax.f32 %v11171_v7, %v5211_v33  ;;  %v5270_v4 = vsel %vm1074_vm2, %v5263_v63, %v5269_v40  ;;  %v5241_v12 = vmax.f32 %v11154_v50, %v5209_v8  ;;  %v8664_v50 = vld [vmem:[%s11739_s9 + $0x70] sm:$0xff]  }
 0x56c   : > { %v5219_v3 = vsel %vm805_vm1, %v5212_v57, %v5218_v54  ;;  %v5249_v48 = vmax.f32 %v5177_v1, %v5218_v54  ;;  %v5248_v2 = vmax.f32 %v5176_v35, %v5216_v59  ;;  %v5217_v0 = vsel %vm805_vm1, %v5210_v39, %v5216_v59  ;;  %v8668_v59 = vld [vmem:[%s11739_s9 + $0x60] sm:$0xff]  }
 0x56d   : > { %v5315_v60 = vpack.c.bf16 %v5304_v31, %v5304_v31  ;;  %v5245_v21 = vmax.f32 %v5173_v19, %v5217_v0  ;;  %v5274_v16 = vsel %vm1074_vm2, %v5267_v45, %v5273_v23  ;;  %v5299_v22 = vmax.f32 %v5242_v24, %v5268_v15  ;;  %v8670_v31 = vld [vmem:[%s11739_s9 + $0x58] sm:$0xff]  }
 0x56e   : > { %v5306_v13 = vmax.f32 %v5249_v48, %v5275_v14  ;;  %v5305_v10 = vmax.f32 %v5248_v2, %v5273_v23  ;;  %v5246_v38 = vmax.f32 %v5174_v51, %v5219_v3  ;;  %v5276_v53 = vsel %vm1074_vm2, %v5269_v40, %v5275_v14  ;;  %v8667_v14 = vld [vmem:[%s11739_s9 + $0x28] sm:$0xff]   ;;  %v8669_v23 = vld [vmem:[%s11739_s9 + $0x20] sm:$0xff]   ;;  %v8671_v24 = vld [vmem:[%s11739_s9 + $0x18] sm:$0xff]  }
 0x56f   : > { %v5328_v62 = vsel %vm1422_vm3, %v5315_v60, 0  ;;  %v5302_v11 = vmax.f32 %v5245_v21, %v5274_v16  ;;  %v5300_v8 = vmax.f32 %v5243_v42, %v5270_v4  ;;  %v5244_v57 = vmax.f32 %v11183_v49, %v5215_v58  ;;  %v8672_v3 = vld [vmem:[%s11739_s9 + $0x50] sm:$0xff]   ;;  %v8674_v2 = vld [vmem:[%s11739_s9 + $0x88] sm:$0x7f]  }
 0x570   : > { %v5317_v1 = vpack.c.bf16 %v5306_v13, %v5306_v13  ;;  %v5316_v35 = vpack.c.bf16 %v5305_v10, %v5305_v10  ;;  %v5303_v56 = vmax.f32 %v5246_v38, %v5276_v53  ;;  %v5272_v39 = vsel %vm1074_vm2, %v5265_v30, %v5271_v5  ;;  %v8673_v48 = vld [vmem:[%s11739_s9 + $0x10] sm:$0xff]   ;;  %v8675_v53 = vld [vmem:[%s11739_s9 + $0x48] sm:$0xff]  }
 0x571   : > { %v5313_v19 = vpack.c.bf16 %v5302_v11, %v5299_v22  ;;  %v5298_v33 = vmax.f32 %v5241_v12, %v5266_v34  ;;  %v5301_v45 = vmax.f32 %v5244_v57, %v5272_v39  ;;  %v5205_v51 = vsel %vm805_vm1, %v5197_v36, %v5204_v47  ;;  %v8677_v11 = vld [vmem:[%s11739_s9 + $0x80] sm:$0xff]  }
 0x572   : > { %v5334_v40 = vsel %vm1422_vm3, %v5317_v1, 0  ;;  %7566 = vmatprep.subr.msk.bf16.mxu0 %vm1422_vm3, %v5316_v35  ;;  %v5314_v42 = vpack.c.bf16 %v5303_v56, %v5300_v8  ;;  %v5236_v49 = vmax.f32 %v11133_v17, %v11193_v18  ;;  %v5239_v58 = vmax.f32 %v11152_v37, %v5205_v51  ;;  %v8678_v1 = vld [vmem:[%s11739_s9 + $0x40] sm:$0xff]  }
 0x573   : > { %v5256_v30 = vrot.slane %v11121_v44, 2  ;;  %7853 = vmatpush3.bf16.msra.mxu1 %v5334_v40  ;;  %5347 = vmatpush1.bf16.msra.mxu0 %v5328_v62  ;;  %v5312_v34 = vpack.c.bf16 %v5301_v45, %v5298_v33  ;;  %v5255_v36 = vsel %vm1074_vm2, %v5253_v43, %v5254_v25  ;;  %v5262_v47 = vsel %vm1074_vm2, %v5254_v25, %v5261_v6  ;;  %v8676_v62 = vld [vmem:[%s11739_s9 + $0x8] sm:$0xff]   ;;  %v8679_v35 = vld [vmem:[%s11739_s9] sm:$0xff]  }
 0x574   : > { %v5250_v18 = vrot.slane %v11119_v29, 2  ;;  %5348 = vmatprep.subr.bf16.mxu0 %v5313_v19  ;;  %7854 = vmatprep.subr.bf16.mxu1 %v8813_v55  ;;  %v5293_v5 = vmax.f32 %v5236_v49, %v5255_v36  ;;  %v5296_v15 = vmax.f32 %v5239_v58, %v5262_v47  ;;  %v5237_v54 = vmax.f32 %v11121_v44, %v11163_v27 }
 0x575   : > { %v5240_v17 = vmax.f32 %v11143_v26, %v11179_v9  ;;  %v5258_v43 = vsel %vm1074_vm2, %v5256_v30, %v5257_v20  ;;  %v5264_v37 = vsel %vm1074_vm2, %v5257_v20, %v5263_v63  ;;  %v5235_v25 = vmax.f32 %v11119_v29, %v11160_v28  ;;  %v8661_v63 = vld [vmem:[%s11738_s8] sm:$0x3f]  }
 0x576   : > { %v5310_v7 = vpack.c.bf16 %v5296_v15, %v5293_v5  ;;  %v5294_v6 = vmax.f32 %v5237_v54, %v5258_v43  ;;  %v5238_v44 = vmax.f32 %v11141_v46, %v11175_v32  ;;  %v5252_v27 = vsel %vm1074_vm2, %v5250_v18, %v5251_v52  ;;  %v8662_v46 = vld [vmem:[%s11739_s9 + $0x78] sm:$0xff]   ;;  %v8666_v32 = vld [vmem:[%s11739_s9 + $0x68] sm:$0xff]  }
 0x577   : > { %7855 = vmatpush3.bf16.msra.mxu1 %v5314_v42  ;;  %5349 = vmatpush1.bf16.msra.mxu0 %v5312_v34  ;;  %v5297_v9 = vmax.f32 %v5240_v17, %v5264_v37  ;;  %v5260_v26 = vsel %vm1074_vm2, %v5251_v52, %v5259_v41  ;;  %v5292_v20 = vmax.f32 %v5235_v25, %v5252_v27  ;;  %v8663_v52 = vld [vmem:[%s11739_s9 + $0x38] sm:$0xff]   ;;  %v8665_v41 = vld [vmem:[%s11739_s9 + $0x30] sm:$0xff]   ;;  %v5633_v21 = vsel %vm805_vm1, %v8674_v2, 0  ;;  %v8686_v2 = vld [vmem:[%s11740_s10 + $0x48] sm:$0xff]  }
 0x578   : > { %5350 = vmatprep.subr.bf16.mxu0 %v5310_v7  ;;  %7856 = vmatprep.subr.bf16.mxu1 %v8813_v55  ;;  %v5295_v29 = vmax.f32 %v5238_v44, %v5260_v26  ;;  %vm6174_vm2 = vcmask 1043456   ;;  %vm6170_vm3 = vcmask 588800  }
 0x579   : > { %v5311_v61 = vpack.c.bf16 %v5297_v9, %v5294_v6 }
 0x57a   : > { %v5309_v28 = vpack.c.bf16 %v5295_v29, %v5292_v20 }
 0x57b   : > { %7857 = vmatpush3.bf16.msra.mxu1 %v5311_v61 }
 0x57c   : > { %5351 = vmatpush1.bf16.msra.mxu0 %v5309_v28  ;;  %7862 = vmatprep.subr.bf16.mxu1 %v8813_v55 }
 0x57d   : > { %7749 = vmatprep.subr.bf16.mxu0 %v8662_v46 }
 0x57e   : > { %7859 = vmatmul.mubr.msk.bf16.vlgmr.msra.gmra.mxu1 %vm5323_vm14, %v8661_v63 }
 0x57f   : > { %7567 = vmatmul.mubr.msk.bf16.vlgmr.msra.gmra.mxu0 %vm5323_vm14, %v8661_v63  ;;  %7866 = vmatprep.mubr.msk.bf16.mxu1 %vm8814_vm13, %v8813_v55 }
 0x580   : > { %7750 = vmatpush3.bf16.msra.mxu0 %v8663_v52  ;;  %7863 = vmatpush3.bf16.msra.mxu1 %v5633_v21  ;;  %v8689_v21 = vld [vmem:[%s11740_s10] sm:$0xff]  }
 0x581   : > { %7751 = vmatprep.subr.bf16.mxu0 %v8664_v50  ;;  %7864 = vmatprep.subr.bf16.mxu1 %v8813_v55 }
 0x584   : > { %7752 = vmatpush3.bf16.msra.mxu0 %v8665_v41  ;;  %7865 = vmatpush3.bf16.msra.mxu1 %v8677_v11  ;;  %v8682_v41 = vld [vmem:[%s11740_s10 + $0x58] sm:$0xff]  }
 0x585   : > { %7753 = vmatprep.subr.bf16.mxu0 %v8666_v32  ;;  %7870 = vmatprep.subr.bf16.mxu1 %v8813_v55 }
 0x588   : > { %7754 = vmatpush3.bf16.msra.mxu0 %v8667_v14 }
 0x589   : > { %7755 = vmatprep.subr.bf16.mxu0 %v8668_v59 }
 0x58c   : > { %7756 = vmatpush3.bf16.msra.mxu0 %v8669_v23 }
 0x58d   : > { %7757 = vmatprep.subr.bf16.mxu0 %v8670_v31  ;;  %v8680_v31 = vld [vmem:[%s11740_s10 + $0x28] sm:$0xff]  }
 0x590   : > { %7758 = vmatpush3.bf16.msra.mxu0 %v8671_v24 }
 0x591   : > { %7759 = vmatprep.subr.bf16.mxu0 %v8672_v3  ;;  %v8684_v3 = vld [vmem:[%s11740_s10 + $0x50] sm:$0xff]  }
 0x594   : > { %7760 = vmatpush3.bf16.msra.mxu0 %v8673_v48  ;;  %v8685_v48 = vld [vmem:[%s11740_s10 + $0x10] sm:$0xff]  }
 0x595   : > { %7761 = vmatprep.subr.bf16.mxu0 %v8675_v53 }
 0x598   : > { %7762 = vmatpush3.bf16.msra.mxu0 %v8676_v62 }
 0x599   : > { %7763 = vmatprep.subr.bf16.mxu0 %v8678_v1 }
 0x59c   : > { %7764 = vmatpush3.bf16.msra.mxu0 %v8679_v35 }
 0x59d   : > { %7886 = vmatprep.subr.bf16.mxu0 %v8813_v55 }
 0x63e   : > { %v5413_v4 = vpop.f32.mrf.mxu1 }
 0x63f   : > { %v11306_v12 = vpop.f32.mrf.mxu0 }
 0x640   : > { %v7860_v0 = vpop.f32.mrf.mxu1 }
 0x641   : > { %v11317_v60 = vpop.f32.mrf.mxu0  ;;  %v8687_v0 = vld [vmem:[%s11740_s10 + $0x8] sm:$0xff]  }
 0x642   : > { %v8222_v16 = vpack.i.bf16 %v5413_v4, %v11317_v60  ;;  %v5416_v22 = vpop.f32.mrf.mxu1 }
 0x643   : > { %v11321_v13 = vpop.f32.mrf.mxu0 }
 0x644   : > { %8223 = vrot.lane.b32.xlu1 %v8222_v16, %s11790_s26  ;;  %8218 = vrot.lane.b32.xlu0 %v8222_v16, %s11791_s27  ;;  %v7861_v10 = vpop.f32.mrf.mxu1  ;;  %v8227_v8 = vpack.i.bf16 %v11321_v13, %v11306_v12  ;;  %v8690_v16 = vld [vmem:[%s11740_s10 + $0x38] sm:$0xff]  }
 0x645   : > { %v5376_v38 = vpop.f32.mrf.mxu0 }
 0x646   : > { %v8232_v57 = vpack.i.bf16 %v5416_v22, %v5376_v38 }
 0x648   : > { %8228 = vrot.lane.b32.xlu0 %v8227_v8, %s11791_s27  ;;  %8233 = vrot.lane.b32.xlu1 %v8232_v57, %s11791_s27 }
 0x64c   : > { %8238 = vrot.lane.b32.xlu0 %v8232_v57, %s11790_s26  ;;  %8243 = vrot.lane.b32.xlu1 %v8227_v8, %s11790_s26 }
 0x6b6   : > { %v8224_v56 = vpop.permute.xlu1 %8223  ;;  %v8219_v39 = vpop.permute.xlu0 %8218 }
 0x6b7   : > { %v8221_v19 = vunpack.i.h.bf16 %v8219_v39  ;;  %v8220_v33 = vunpack.i.l.bf16 %v8219_v39  ;;  %v8226_v45 = vunpack.i.h.bf16 %v8224_v56  ;;  %v8225_v51 = vunpack.i.l.bf16 %v8224_v56 }
 0x6b9   : > { %v5439_v49 = vsel %vm1633_vm5, %v8220_v33, %v8221_v19  ;;  %v5450_v36 = vmax.f32 %v5413_v4, %v8221_v19  ;;  %v5467_v37 = vsel %vm1748_vm6, %v8225_v51, %v8226_v45  ;;  %v8681_v4 = vld [vmem:[%s11740_s10 + $0x20] sm:$0xff]   ;;  %v8691_v19 = vld [vmem:[%s11740_s10 + $0xb8] sm:$0xff]  }
 0x6ba   : > { %v8229_v40 = vpop.permute.xlu0 %8228  ;;  %v8234_v42 = vpop.permute.xlu1 %8233  ;;  %v5449_v18 = vmax.f32 %v11317_v60, %v5439_v49  ;;  %v8688_v60 = vld [vmem:[%s11740_s10 + $0x40] sm:$0xff]   ;;  %v8694_v49 = vld [vmem:[%s11740_s10 + $0x88] sm:$0xff]  }
 0x6bb   : > { %v8231_v58 = vunpack.i.h.bf16 %v8229_v40  ;;  %v8230_v30 = vunpack.i.l.bf16 %v8229_v40  ;;  %v8236_v34 = vunpack.i.h.bf16 %v8234_v42  ;;  %v8235_v47 = vunpack.i.l.bf16 %v8234_v42 }
 0x6bc   : > { %v5478_v44 = vmax.f32 %v5450_v36, %v8226_v45  ;;  %v5477_v52 = vmax.f32 %v5449_v18, %v5467_v37  ;;  %v8697_v36 = vld [vmem:[%s11740_s10 + $0xa0] sm:$0xff]   ;;  %v8699_v18 = vld [vmem:[%s11740_s10 + $0x98] sm:$0xff]  }
 0x6bd   : > { %v5438_v5 = vsel %vm1633_vm5, %v8230_v30, %v8220_v33  ;;  %v5440_v15 = vsel %vm1633_vm5, %v8231_v58, %v8235_v47  ;;  %v5441_v54 = vsel %vm1633_vm5, %v8235_v47, %v8236_v34  ;;  %v5453_v25 = vmax.f32 %v5416_v22, %v8236_v34  ;;  %v8692_v22 = vld [vmem:[%s11740_s10 + $0x30] sm:$0xff]   ;;  %v8695_v30 = vld [vmem:[%s11740_s10 + $0xa8] sm:$0xff]   ;;  %v8696_v34 = vld [vmem:[%s11740_s10 + $0x80] sm:$0xff]  }
 0x6be   : > { %v8239_v17 = vpop.permute.xlu0 %8238  ;;  %v8244_v43 = vpop.permute.xlu1 %8243  ;;  %v5452_v27 = vmax.f32 %v5376_v38, %v5441_v54  ;;  %v5448_v20 = vmax.f32 %v11306_v12, %v5438_v5  ;;  %v5451_v29 = vmax.f32 %v11321_v13, %v5440_v15  ;;  %v8683_v12 = vld [vmem:[%s11740_s10 + $0x18] sm:$0xff]   ;;  %v8700_v5 = vld [vmem:[%s11740_s10 + $0x70] sm:$0xff]   ;;  %vm6895_vm5 = vcmask 16384  }
 0x6bf   : > { %v8241_v7 = vunpack.i.h.bf16 %v8239_v17  ;;  %v8240_v6 = vunpack.i.l.bf16 %v8239_v17  ;;  %v8246_v9 = vunpack.i.h.bf16 %v8244_v43  ;;  %v8245_v26 = vunpack.i.l.bf16 %v8244_v43  ;;  %v8698_v47 = vld [vmem:[%s11740_s10 + $0x78] sm:$0xff]   ;;  %v8701_v15 = vld [vmem:[%s11740_s10 + $0x90] sm:$0xff]   ;;  %v8702_v43 = vld [vmem:[%s11740_s10 + $0x68] sm:$0xff]  }
 0x6c1   : > { %v5469_v61 = vsel %vm1748_vm6, %v8240_v6, %v8241_v7  ;;  %v5481_v28 = vmax.f32 %v5453_v25, %v8241_v7  ;;  %v5468_v63 = vsel %vm1748_vm6, %v8246_v9, %v8240_v6  ;;  %v5466_v46 = vsel %vm1748_vm6, %v8245_v26, %v8225_v51  ;;  %v8693_v51 = vld [vmem:[%s11740_s10 + $0xb0] sm:$0xff]   ;;  %v8703_v25 = vld [vmem:[%s11740_s10 + $0x60] sm:$0xff]  }
 0x6c2   : > { %v5480_v50 = vmax.f32 %v5452_v27, %v5469_v61  ;;  %v5476_v14 = vmax.f32 %v5448_v20, %v5466_v46  ;;  %v5479_v59 = vmax.f32 %v5451_v29, %v5468_v63  ;;  %v8704_v6 = vld [vmem:[%s11742_s12 + $0x20] ss:$0 sps:$4 sm:$0xff]   ;;  %v8705_v27 = vld [vmem:[%s11742_s12 + $0x18] sm:$0xff]   ;;  %v8706_v9 = vld [vmem:[%s11742_s12 + $0x44] ss:$0 sps:$4 sm:$0xff]  }
 0x6c3   : > { %v5520_v32 = vpack.c.bf16 %v5481_v28, %v5478_v44  ;;  %v6248_v44 = vsel %vm6174_vm2, %v8704_v6, 0  ;;  %v6176_v26 = vsel %vm6174_vm2, %v8706_v9, 0  ;;  %v8707_v20 = vld [vmem:[%s11742_s12 + $0x10] sm:$0xff]   ;;  %v8708_v29 = vld [vmem:[%s11742_s12 + $0x3c] sm:$0xff]   ;;  %v8709_v61 = vld [vmem:[%s11742_s12 + $0x8] sm:$0xff]  }
 0x6c4   : > { %v5519_v23 = vpack.c.bf16 %v5480_v50, %v5477_v52  ;;  %v5518_v24 = vpack.c.bf16 %v5479_v59, %v5476_v14  ;;  %v8710_v28 = vld [vmem:[%s11742_s12 + $0x34] sm:$0xff]   ;;  %v8711_v63 = vld [vmem:[%s11742_s12] sm:$0xff]   ;;  %v8712_v46 = vld [vmem:[%s11742_s12 + $0x2c] sm:$0xff]  }
 0x6c5   : > { %7867 = vmatmul.mubr.msk.bf16.vlgmr.msra.gmra.mxu1 %vm5628_vm15, %v5520_v32  ;;  %v8714_v52 = vld [vmem:[%s11742_s12 + $0x24] sm:$0xff]  }
 0x6c6   : > { %5667 = vmatprep.mubr.bf16.mxu0 %v5519_v23  ;;  %7871 = vmatpush3.bf16.msra.mxu1 %v8682_v41  ;;  %v8724_v6 = vld [vmem:[%s11744_s14 + $0x28] sm:$0x7f]  }
 0x6c7   : > { %5668 = vmatmul.mubr.bf16.vlgmr.msra.gmra.mxu0 %v5518_v24  ;;  %7872 = vmatprep.subr.bf16.mxu1 %v8813_v55 }
 0x6c8   : > { %7887 = vmatpush3.bf16.msra.mxu0 %v8680_v31  ;;  %7898 = vmatprep.mubr.msk.bf16.mxu0 %vm8814_vm13, %v8813_v55 }
 0x6c9   : > { %7888 = vmatprep.subr.bf16.mxu0 %v8813_v55  ;;  %7882 = vmatprep.mubr.msk.bf16.mxu1 %vm8814_vm13, %v8813_v55 }
 0x6ca   : > { %7873 = vmatpush3.bf16.msra.mxu1 %v8684_v3 }
 0x6cb   : > { %7874 = vmatprep.subr.bf16.mxu1 %v8813_v55 }
 0x6cc   : > { %7889 = vmatpush3.bf16.msra.mxu0 %v8681_v4 }
 0x6cd   : > { %7890 = vmatprep.subr.bf16.mxu0 %v8813_v55 }
 0x6ce   : > { %7875 = vmatpush3.bf16.msra.mxu1 %v8686_v2 }
 0x6cf   : > { %7876 = vmatprep.subr.bf16.mxu1 %v8813_v55 }
 0x6d0   : > { %7891 = vmatpush3.bf16.msra.mxu0 %v8683_v12 }
 0x6d1   : > { %7892 = vmatprep.subr.bf16.mxu0 %v8813_v55 }
 0x6d2   : > { %7877 = vmatpush3.bf16.msra.mxu1 %v8688_v60 }
 0x6d3   : > { %7878 = vmatprep.subr.bf16.mxu1 %v8813_v55 }
 0x6d4   : > { %7893 = vmatpush3.bf16.msra.mxu0 %v8685_v48 }
 0x6d5   : > { %7894 = vmatprep.subr.bf16.mxu0 %v8813_v55 }
 0x6d6   : > { %7879 = vmatpush3.bf16.msra.mxu1 %v8690_v16 }
 0x6d7   : > { %7880 = vmatprep.subr.bf16.mxu1 %v8813_v55 }
 0x6d8   : > { %7895 = vmatpush3.bf16.msra.mxu0 %v8687_v0 }
 0x6d9   : > { %7896 = vmatprep.subr.bf16.mxu0 %v8813_v55 }
 0x6da   : > { %7881 = vmatpush3.bf16.msra.mxu1 %v8692_v22 }
 0x6db   : > { %7902 = vmatprep.subr.bf16.mxu1 %v8813_v55 }
 0x6dc   : > { %7897 = vmatpush3.bf16.msra.mxu0 %v8689_v21  ;;  %v7652_v21 = vld [vmem:[%s11741_s11] ss:$0 sm:$0xff] }
 0x6dd   : > { %7918 = vmatprep.subr.bf16.mxu0 %v8813_v55 }
 0x785   : > { %v5710_v13 = vpop.f32.mrf.mxu1 }
 0x787   : > { %v7765_v10 = vpop.f32.mrf.mxu0  ;;  %v7868_v38 = vpop.f32.mrf.mxu1 }
 0x789   : > { %v7766_v53 = vpop.f32.mrf.mxu0  ;;  %v5713_v62 = vpop.f32.mrf.mxu1 }
 0x78a   : > { %v7767_v57 = vadd.f32 %v7766_v53, %v7765_v10 }
 0x78b   : > { %v7768_v11 = vpop.f32.mrf.mxu0  ;;  %v7869_v8 = vpop.f32.mrf.mxu1 }
 0x78c   : > { %v5711_v56 = vadd.f32 %v7767_v57, %v5710_v13 }
 0x78d   : > { %v7769_v1 = vpop.f32.mrf.mxu0 }
 0x78e   : > { %v7770_v35 = vadd.f32 %v7769_v1, %v7768_v11 }
 0x790   : > { %v5714_v39 = vadd.f32 %v7770_v35, %v5713_v62  ;;  %v8713_v62 = vld [vmem:[%s11742_s12 + $0x8c] ss:$0 sps:$4 sm:$0xff]  }
 0x792   : > { %v5729_v33 = vpack.c.bf16 %v5714_v39, %v5711_v56  ;;  %v6426_v56 = vsel %vm6174_vm2, %v8713_v62, 0  ;;  %v8733_v62 = vld [vmem:[%s11744_s14 + $0x38] sm:$0xff]  }
 0x794   : > { %v5746_v45 = vshll.u32 %v5729_v33, 16  ;;  %7899 = vmatmul.mubr.msk.bf16.vlgmr.msra.gmra.mxu0 %vm5786_vm0, %v5729_v33  ;;  %v5744_v40 = vshrl.u32 %v5729_v33, 16  ;;  %v5924_v7 = vrot.slane %v5729_v33, 1  ;;  %v8715_v33 = vld [vmem:[%s11742_s12 + $0x84] sm:$0xff]  }
 0x795   : > { %7919 = vmatpush3.bf16.msra.mxu0 %v8691_v19  ;;  %7930 = vmatprep.mubr.msk.bf16.mxu0 %vm8814_vm13, %v8813_v55  ;;  %v8716_v19 = vld [vmem:[%s11742_s12 + $0x68] ss:$0 sps:$4 sm:$0xff]  }
 0x796   : > { %v5748_v42 = vrot.slane %v5746_v45, 1  ;;  %7920 = vmatprep.subr.bf16.mxu0 %v8813_v55  ;;  %v6020_v54 = vrot.slane %v5744_v40, 1  ;;  %v6021_v17 = vrot.slane %v5746_v45, 2 }
 0x798   : > { %v5749_v58 = vor.u32 %v5748_v42, %v5744_v40  ;;  %v6022_v37 = vor.u32 %v6021_v17, %v6020_v54 }
 0x799   : > { %7921 = vmatpush3.bf16.msra.mxu0 %v8693_v51 }
 0x79a   : > { %7883 = vmatmul.mubr.msk.bf16.vlgmr.msra.gmra.mxu1 %vm5786_vm0, %v5749_v58  ;;  %7922 = vmatprep.subr.bf16.mxu0 %v8813_v55  ;;  %v8717_v58 = vld [vmem:[%s11742_s12 + $0x7c] sm:$0xff]  }
 0x79b   : > { %7903 = vmatpush3.bf16.msra.mxu1 %v8694_v49  ;;  %7914 = vmatprep.mubr.msk.bf16.mxu1 %vm8814_vm13, %v8813_v55  ;;  %v6333_v49 = vsel %vm6174_vm2, %v8716_v19, 0 }
 0x79c   : > { %7904 = vmatprep.subr.bf16.mxu1 %v8813_v55 }
 0x79d   : > { %7923 = vmatpush3.bf16.msra.mxu0 %v8695_v30 }
 0x79e   : > { %7924 = vmatprep.subr.bf16.mxu0 %v8813_v55 }
 0x79f   : > { %7905 = vmatpush3.bf16.msra.mxu1 %v8696_v34  ;;  %v8718_v34 = vld [vmem:[%s11742_s12 + $0x60] sm:$0xff]  }
 0x7a0   : > { %7906 = vmatprep.subr.bf16.mxu1 %v8813_v55 }
 0x7a1   : > { %7925 = vmatpush3.bf16.msra.mxu0 %v8697_v36  ;;  %v8719_v36 = vld [vmem:[%s11742_s12 + $0x74] sm:$0xff]  }
 0x7a2   : > { %7926 = vmatprep.subr.bf16.mxu0 %v8813_v55 }
 0x7a3   : > { %7907 = vmatpush3.bf16.msra.mxu1 %v8698_v47 }
 0x7a4   : > { %7908 = vmatprep.subr.bf16.mxu1 %v8813_v55 }
 0x7a5   : > { %7927 = vmatpush3.bf16.msra.mxu0 %v8699_v18 }
 0x7a6   : > { %7928 = vmatprep.subr.bf16.mxu0 %v8813_v55 }
 0x7a7   : > { %7909 = vmatpush3.bf16.msra.mxu1 %v8700_v5  ;;  %v8720_v5 = vld [vmem:[%s11742_s12 + $0x58] sm:$0xff]  }
 0x7a8   : > { %7910 = vmatprep.subr.bf16.mxu1 %v8813_v55 }
 0x7a9   : > { %7929 = vmatpush3.bf16.msra.mxu0 %v8701_v15  ;;  %v8721_v15 = vld [vmem:[%s11742_s12 + $0x6c] sm:$0xff]  }
 0x7aa   : > { %7948 = vmatprep.subr.bf16.mxu0 %v8813_v55 }
 0x7ab   : > { %7911 = vmatpush3.bf16.msra.mxu1 %v8702_v43  ;;  %v8722_v43 = vld [vmem:[%s11742_s12 + $0x50] sm:$0xff]  }
 0x7ac   : > { %7931 = vmatmul.mubr.msk.bf16.vlgmr.msra.gmra.mxu0 %vm5786_vm0, %v6022_v37  ;;  %7912 = vmatprep.subr.bf16.mxu1 %v8813_v55 }
 0x7ad   : > { %7958 = vmatprep.mubr.msk.bf16.mxu0 %vm8814_vm13, %v8813_v55  ;;  %7949 = vmatpush3.bf16.msra.mxu0 %v6248_v44  ;;  %v8725_v44 = vld [vmem:[%s11744_s14 + $0x58] sm:$0x7f]  }
 0x7ae   : > { %7950 = vmatprep.subr.bf16.mxu0 %v8813_v55  ;;  %v6564_v9 = vsel %vm805_vm1, %v8725_v44, 0 }
 0x7af   : > { %7913 = vmatpush3.bf16.msra.mxu1 %v8703_v25  ;;  %v8723_v25 = vld [vmem:[%s11742_s12 + $0x48] sm:$0xff]  }
 0x7b0   : > { %7934 = vmatprep.subr.bf16.mxu1 %v8813_v55 }
 0x7b1   : > { %7951 = vmatpush3.bf16.msra.mxu0 %v8705_v27  ;;  %v6644_v27 = vsel %vm805_vm1, %v8724_v6, 0  ;;  %vm6559_vm1 = vcmask 769024  }
 0x7b2   : > { %7915 = vmatmul.mubr.msk.bf16.vlgmr.msra.gmra.mxu1 %vm5786_vm0, %v5924_v7  ;;  %7952 = vmatprep.subr.bf16.mxu0 %v8813_v55 }
 0x7b3   : > { %7944 = vmatprep.mubr.msk.bf16.mxu1 %vm8814_vm13, %v8813_v55  ;;  %7935 = vmatpush3.bf16.msra.mxu1 %v6176_v26  ;;  %v8726_v26 = vld [vmem:[%s11744_s14 + $0x20] sm:$0xff]  }
 0x7b4   : > { %7936 = vmatprep.subr.bf16.mxu1 %v8813_v55 }
 0x7b5   : > { %7953 = vmatpush3.bf16.msra.mxu0 %v8707_v20  ;;  %v8727_v20 = vld [vmem:[%s11744_s14 + $0x50] sm:$0xff]  }
 0x7b6   : > { %7954 = vmatprep.subr.bf16.mxu0 %v8813_v55 }
 0x7b7   : > { %7937 = vmatpush3.bf16.msra.mxu1 %v8708_v29  ;;  %v8728_v29 = vld [vmem:[%s11744_s14 + $0x18] sm:$0xff]  }
 0x7b8   : > { %7938 = vmatprep.subr.bf16.mxu1 %v8813_v55 }
 0x7b9   : > { %7955 = vmatpush3.bf16.msra.mxu0 %v8709_v61  ;;  %v8729_v61 = vld [vmem:[%s11744_s14 + $0x48] sm:$0xff]  }
 0x7ba   : > { %7956 = vmatprep.subr.bf16.mxu0 %v8813_v55 }
 0x7bb   : > { %7939 = vmatpush3.bf16.msra.mxu1 %v8710_v28  ;;  %v8730_v28 = vld [vmem:[%s11744_s14 + $0x10] sm:$0xff]  }
 0x7bc   : > { %7940 = vmatprep.subr.bf16.mxu1 %v8813_v55 }
 0x7bd   : > { %7957 = vmatpush3.bf16.msra.mxu0 %v8711_v63  ;;  %v8731_v63 = vld [vmem:[%s11744_s14 + $0x40] sm:$0xff]  }
 0x7be   : > { %7976 = vmatprep.subr.bf16.mxu0 %v8813_v55 }
 0x7bf   : > { %7941 = vmatpush3.bf16.msra.mxu1 %v8712_v46  ;;  %v8732_v46 = vld [vmem:[%s11744_s14 + $0x8] sm:$0xff]  }
 0x7c0   : > { %7942 = vmatprep.subr.bf16.mxu1 %v8813_v55 }
 0x7c3   : > { %7943 = vmatpush3.bf16.msra.mxu1 %v8714_v52 }
 0x7c4   : > { %7962 = vmatprep.subr.bf16.mxu1 %v8813_v55 }
 0x854   : > { %v5903_v50 = vpop.f32.mrf.mxu0 }
 0x856   : > { %v7900_v41 = vpop.f32.mrf.mxu0 }
 0x858   : > { %v5906_v32 = vpop.f32.mrf.mxu0 }
 0x85a   : > { %v5824_v14 = vpop.f32.mrf.mxu1  ;;  %v7901_v59 = vpop.f32.mrf.mxu0 }
 0x85b   : > { %v5904_v48 = vadd.f32 %v5903_v50, %v5824_v14 }
 0x85c   : > { %v7884_v23 = vpop.f32.mrf.mxu1 }
 0x85e   : > { %v5827_v31 = vpop.f32.mrf.mxu1 }
 0x85f   : > { %v5907_v22 = vadd.f32 %v5906_v32, %v5827_v31 }
 0x860   : > { %v7885_v24 = vpop.f32.mrf.mxu1 }
 0x86c   : > { %v6096_v4 = vpop.f32.mrf.mxu0 }
 0x86e   : > { %v7932_v12 = vpop.f32.mrf.mxu0 }
 0x870   : > { %v6099_v3 = vpop.f32.mrf.mxu0 }
 0x872   : > { %v5998_v2 = vpop.f32.mrf.mxu1  ;;  %v7933_v0 = vpop.f32.mrf.mxu0 }
 0x873   : > { %v6005_v60 = vadd.f32 %v5998_v2, %v5904_v48 }
 0x874   : > { %v7916_v16 = vpop.f32.mrf.mxu1 }
 0x875   : > { %v6103_v13 = vadd.f32 %v6096_v4, %v6005_v60  ;;  %v7704_v60 = vld [vmem:[%s11743_s13] ss:$0 sm:$0xff] }
 0x876   : > { %v6001_v10 = vpop.f32.mrf.mxu1 }
 0x877   : > { %v6112_v38 = vadd.f32 %v7652_v21, %v6103_v13  ;;  %v6006_v53 = vadd.f32 %v6001_v10, %v5907_v22 }
 0x878   : > { %v7917_v11 = vpop.f32.mrf.mxu1 }
 0x879   : > { %v6114_v8 = vmax.f32 %v6112_v38, 0.0  ;;  %v6104_v57 = vadd.f32 %v6099_v3, %v6006_v53  ;;  %v8734_v11 = vld [vmem:[%s11744_s14] sm:$0xff]  }
 0x87b   : > { %v6125_v1 = vpack.c.bf16 %v6114_v8, %v6114_v8  ;;  %v6113_v35 = vadd.f32 %v7652_v21, %v6104_v57 }
 0x87d   : > { %v6139_v39 = vshll.u32 %v6125_v1, 16  ;;  %7959 = vmatmul.mubr.msk.bf16.vlgmr.msra.gmra.mxu0 %vm6170_vm3, %v6125_v1  ;;  %v6137_v45 = vshrl.u32 %v6125_v1, 16  ;;  %v6115_v40 = vmax.f32 %v6113_v35, 0.0  ;;  %v6301_v7 = vrot.slane %v6125_v1, 1  ;;  %v8735_v1 = vld [vmem:[%s11744_s14 + $0x30] sm:$0xff]  }
 0x87e   : > { %7977 = vmatpush3.bf16.msra.mxu0 %v6426_v56  ;;  %7986 = vmatprep.mubr.msk.bf16.mxu0 %vm8814_vm13, %v8813_v55 }
 0x87f   : > { %v6141_v51 = vrot.slane %v6139_v39, 1  ;;  %7978 = vmatprep.subr.bf16.mxu0 %v8813_v55  ;;  %v6386_v30 = vpack.c.bf16 %v6115_v40, %v6114_v8 }
 0x881   : > { %v6142_v42 = vor.u32 %v6141_v51, %v6137_v45  ;;  %v6388_v47 = vshrl.u32 %v6386_v30, 16  ;;  %v6391_v18 = vshll.u32 %v6386_v30, 16  ;;  %v6687_v51 = vld [vmem:[%s11745_s15] sm:$0x3] }
 0x882   : > { %7979 = vmatpush3.bf16.msra.mxu0 %v8715_v33 }
 0x883   : > { %7945 = vmatmul.mubr.msk.bf16.vlgmr.msra.gmra.mxu1 %vm6170_vm3, %v6142_v42  ;;  %7980 = vmatprep.subr.bf16.mxu0 %v8813_v55  ;;  %v6390_v54 = vrot.slane %v6388_v47, 1  ;;  %v6393_v17 = vrot.slane %v6391_v18, 2  ;;  %v8738_v47 = vld [vmem:[%s11747_s17 + $0x8] sm:$0xff]   ;;  %v8739_v18 = vld [vmem:[%s11747_s17] sm:$0xff]  }
 0x884   : > { %7963 = vmatpush3.bf16.msra.mxu1 %v6333_v49  ;;  %7972 = vmatprep.mubr.msk.bf16.mxu1 %vm8814_vm13, %v8813_v55  ;;  %v6693_v49 = vsel %vm2456_vm8, %v6687_v51, 0 }
 0x885   : > { %7964 = vmatprep.subr.bf16.mxu1 %v8813_v55  ;;  %v6394_v37 = vor.u32 %v6393_v17, %v6390_v54 }
 0x886   : > { %7981 = vmatpush3.bf16.msra.mxu0 %v8717_v58  ;;  %v6686_v58 = vld [vmem:[%s667_s23] sm:$0x1]  ;;  %s8815_s23 = smov [#allocation2]  }
 0x887   : > { %7982 = vmatprep.subr.bf16.mxu0 %v8813_v55  ;;  %v6688_v30 = vpack.c.bf16 %v6686_v58, %v6686_v58  ;;  %s8752_s2 = sshll.u32 %s8815_s23, 4  ;;  %s8753_s2 = int_to_ptr.vmem [resolvable:$false] %s8752_s2 }
 0x888   : > { %7965 = vmatpush3.bf16.msra.mxu1 %v8718_v34  ;;  %v8736_v34 = vld [vmem:[%s11747_s17 + $0x18] sm:$0xff]   ;;  %s8754_s1 = scalar_lea.vmem %s8753_s2, 32  ;;  %p8755_p0 = scmp.lt.s32.totalorder %s11691_s0, %s8753_s2 }
 0x889   : > { %7966 = vmatprep.subr.bf16.mxu1 %v8813_v55  ;;  %p8756_p1 = scmp.lt.s32.totalorder %s8754_s1, %s8748_s3 }
 0x88a   : > { %7983 = vmatpush3.bf16.msra.mxu0 %v8719_v36  ;;  %v8737_v36 = vld [vmem:[%s11747_s17 + $0x10] sm:$0xff]  }
 0x88b   : > { %7984 = vmatprep.subr.bf16.mxu0 %v8813_v55  ;;  %p8757_p2 = por %p8756_p1, %p8755_p0 }
 0x88c   : > { %7967 = vmatpush3.bf16.msra.mxu1 %v8720_v5  ;;  %v8740_v5 = vld [vmem:[%s11749_s19 + $0x18] sm:$0xff]  }
 0x88d   : > { %7968 = vmatprep.subr.bf16.mxu1 %v8813_v55  ;;  %p8758_p3 = pnand %p8757_p2, %p8751_p13 }
 0x88e   : > { %7985 = vmatpush3.bf16.msra.mxu0 %v8721_v15  ;;  %v8741_v15 = vld [vmem:[%s11749_s19 + $0x10] sm:$0xff]  }
 0x88f   : > { %8006 = vmatprep.subr.bf16.mxu0 %v8813_v55 }
 0x890   : > { %7969 = vmatpush3.bf16.msra.mxu1 %v8722_v43 }
 0x891   : > { %7987 = vmatmul.mubr.msk.bf16.vlgmr.msra.gmra.mxu0 %vm6170_vm3, %v6394_v37  ;;  %7970 = vmatprep.subr.bf16.mxu1 %v8813_v55 }
 0x892   : > { %8018 = vmatprep.mubr.msk.bf16.mxu0 %vm8814_vm13, %v8813_v55  ;;  %8007 = vmatpush3.bf16.msra.mxu0 %v6644_v27 }
 0x893   : > { %8008 = vmatprep.subr.bf16.mxu0 %v8813_v55 }
 0x894   : > { %7971 = vmatpush3.bf16.msra.mxu1 %v8723_v25 }
 0x895   : > { %7990 = vmatprep.subr.bf16.mxu1 %v8813_v55 }
 0x896   : > { %8009 = vmatpush3.bf16.msra.mxu0 %v8726_v26  ;;  %v6736_v26 = vld [vmem:[%s11746_s16] sm:$0x1] }
 0x897   : > { %7973 = vmatmul.mubr.msk.bf16.vlgmr.msra.gmra.mxu1 %vm6170_vm3, %v6301_v7  ;;  %8010 = vmatprep.subr.bf16.mxu0 %v8813_v55 }
 0x898   : > { %8002 = vmatprep.mubr.msk.bf16.mxu1 %vm8814_vm13, %v8813_v55  ;;  %7991 = vmatpush3.bf16.msra.mxu1 %v6564_v9 }
 0x899   : > { %7992 = vmatprep.subr.bf16.mxu1 %v8813_v55 }
 0x89a   : > { %8011 = vmatpush3.bf16.msra.mxu0 %v8728_v29 }
 0x89b   : > { %8012 = vmatprep.subr.bf16.mxu0 %v8813_v55 }
 0x89c   : > { %7993 = vmatpush3.bf16.msra.mxu1 %v8727_v20 }
 0x89d   : > { %7994 = vmatprep.subr.bf16.mxu1 %v8813_v55 }
 0x89e   : > { %8013 = vmatpush3.bf16.msra.mxu0 %v8730_v28 }
 0x89f   : > { %8014 = vmatprep.subr.bf16.mxu0 %v8813_v55 }
 0x8a0   : > { %7995 = vmatpush3.bf16.msra.mxu1 %v8729_v61 }
 0x8a1   : > { %7996 = vmatprep.subr.bf16.mxu1 %v8813_v55 }
 0x8a2   : > { %8015 = vmatpush3.bf16.msra.mxu0 %v8732_v46 }
 0x8a3   : > { %8016 = vmatprep.subr.bf16.mxu0 %v8813_v55 }
 0x8a4   : > { %7997 = vmatpush3.bf16.msra.mxu1 %v8731_v63 }
 0x8a5   : > { %7998 = vmatprep.subr.bf16.mxu1 %v8813_v55 }
 0x8a6   : > { %8017 = vmatpush3.bf16.msra.mxu0 %v8734_v11 }
 0x8a7   : > { %8040 = vmatprep.subr.bf16.mxu0 %v8813_v55 }
 0x8a8   : > { %7999 = vmatpush3.bf16.msra.mxu1 %v8733_v62 }
 0x8a9   : > { %8000 = vmatprep.subr.bf16.mxu1 %v8813_v55 }
 0x8ac   : > { %8001 = vmatpush3.bf16.msra.mxu1 %v8735_v1 }
 0x8ad   : > { %8022 = vmatprep.subr.bf16.mxu1 %v8813_v55 }
 0x93d   : > { %v6284_v52 = vpop.f32.mrf.mxu0 }
 0x93f   : > { %v7960_v50 = vpop.f32.mrf.mxu0 }
 0x940   : > { %v8742_v50 = vld [vmem:[%s11749_s19 + $0x8] sm:$0xff]  }
 0x941   : > { %v6287_v41 = vpop.f32.mrf.mxu0 }
 0x942   : > { %v8743_v41 = vld [vmem:[%s11749_s19] sm:$0xff]  }
 0x943   : > { %v6212_v32 = vpop.f32.mrf.mxu1  ;;  %v7961_v14 = vpop.f32.mrf.mxu0 }
 0x944   : > { %v6285_v3 = vadd.f32 %v6284_v52, %v6212_v32  ;;  %v6748_v32 = vld [vmem:[%s11748_s18] sm:$0x1] }
 0x945   : > { %v7946_v59 = vpop.f32.mrf.mxu1 }
 0x947   : > { %v6215_v23 = vpop.f32.mrf.mxu1 }
 0x949   : > { %v7947_v31 = vpop.f32.mrf.mxu1 }
 0x951   : > { %v6462_v24 = vpop.f32.mrf.mxu0 }
 0x953   : > { %v7988_v4 = vpop.f32.mrf.mxu0 }
 0x955   : > { %v6465_v12 = vpop.f32.mrf.mxu0 }
 0x957   : > { %v6369_v48 = vpop.f32.mrf.mxu1  ;;  %v7989_v2 = vpop.f32.mrf.mxu0 }
 0x958   : > { %v6375_v0 = vadd.f32 %v6369_v48, %v6285_v3 }
 0x959   : > { %v7974_v21 = vpop.f32.mrf.mxu1 }
 0x95a   : > { %v6468_v16 = vadd.f32 %v6462_v24, %v6375_v0 }
 0x95b   : > { %v6372_v22 = vpop.f32.mrf.mxu1 }
 0x95c   : > { %v6476_v13 = vadd.f32 %v7704_v60, %v6468_v16 }
 0x95d   : > { %v7975_v10 = vpop.f32.mrf.mxu1 }
 0x95e   : > { %v6477_v38 = vmax.f32 %v6476_v13, 0.0 }
 0x960   : > { %v6479_v53 = vrot.slane %v6477_v38, 1  ;;  %v6482_v57 = vrot.slane %v6477_v38, 2 }
 0x962   : > { %v6481_v8 = vmax.f32 %v6477_v38, %v6479_v53 }
 0x964   : > { %v6484_v35 = vmax.f32 %v6481_v8, %v6482_v57 }
 0x966   : > { %6490 = vrot.lane.b32.xlu1 %v6484_v35, %s11790_s26  ;;  %6486 = vrot.lane.b32.xlu0 %v6484_v35, %s11791_s27  ;;  %s11689_s26 = scalar_lea.hbm %s11793_s4, %s7742_s21  ;;  %s6898_s27 = scalar_lea.sflag [#allocation3], %s658_s22 }
 0x9d8   : > { %v6487_v56 = vpop.permute.xlu0 %6486  ;;  %v6491_v19 = vpop.permute.xlu1 %6490 }
 0x9d9   : > { %v6489_v39 = vmax.f32 %v6484_v35, %v6487_v56 }
 0x9db   : > { %v6493_v33 = vmax.f32 %v6489_v39, %v6491_v19 }
 0x9dd   : > { %v6506_v45 = vpack.c.bf16 %v6493_v33, %v6493_v33 }
 0x9df   : > { %v6521_v40 = vshrl.u32 %v6506_v45, 16  ;;  %8019 = vmatmul.mubr.msk.bf16.vlgmr.msra.gmra.mxu0 %vm6559_vm1, %v6506_v45 }
 0x9e0   : > { %8048 = vmatprep.mubr.msk.bf16.mxu0 %vm8814_vm13, %v8813_v55  ;;  %8041 = vmatpush3.bf16.msra.mxu0 %v8740_v5 }
 0x9e1   : > { %v6523_v42 = vrot.slane %v6521_v40, 1  ;;  %8042 = vmatprep.subr.bf16.mxu0 %v8813_v55 }
 0x9e3   : > { %8003 = vmatmul.mubr.msk.bf16.vlgmr.msra.gmra.mxu1 %vm6559_vm1, %v6523_v42 }
 0x9e4   : > { %8023 = vmatpush3.bf16.msra.mxu1 %v6693_v49  ;;  %8024 = vmatprep.mubr.msk.bf16.mxu1 %vm8814_vm13, %v8813_v55 }
 0x9e5   : > { %8028 = vmatprep.subr.bf16.mxu1 %v8813_v55  ;;  %8043 = vmatpush3.bf16.msra.mxu0 %v8741_v15 }
 0x9e6   : > { %8044 = vmatprep.subr.bf16.mxu0 %v8813_v55 }
 0x9e9   : > { %8045 = vmatpush3.bf16.msra.mxu0 %v8742_v50 }
 0x9ea   : > { %8046 = vmatprep.subr.bf16.mxu0 %v8813_v55 }
 0x9eb   : > { %8025 = vmatmul.mubr.msk.bf16.vlgmr.msra.gmra.mxu1 %vm2446_vm9, %v6688_v30 }
 0x9ec   : > { %8036 = vmatprep.mubr.msk.bf16.mxu1 %vm8814_vm13, %v8813_v55  ;;  %8029 = vmatpush3.bf16.msra.mxu1 %v8736_v34 }
 0x9ed   : > { %8030 = vmatprep.subr.bf16.mxu1 %v8813_v55  ;;  %8047 = vmatpush3.bf16.msra.mxu0 %v8743_v41 }
 0x9f0   : > { %8031 = vmatpush3.bf16.msra.mxu1 %v8737_v36 }
 0x9f1   : > { %8032 = vmatprep.subr.bf16.mxu1 %v8813_v55 }
 0x9f4   : > { %8033 = vmatpush3.bf16.msra.mxu1 %v8738_v47 }
 0x9f5   : > { %8034 = vmatprep.subr.bf16.mxu1 %v8813_v55  ;;  %v6827_v55 = vld [vmem:[%s11750_s20] sm:$0x1] }
 0x9f8   : > { %8035 = vmatpush3.bf16.msra.mxu1 %v8739_v18 }
 0xa9f   : > { %v6680_v54 = vpop.f32.mrf.mxu0 }
 0xaa1   : > { %v8020_v17 = vpop.f32.mrf.mxu0 }
 0xaa3   : > { %v6600_v43 = vpop.f32.mrf.mxu1  ;;  %v6683_v37 = vpop.f32.mrf.mxu0 }
 0xaa4   : > { %v6681_v27 = vadd.f32 %v6680_v54, %v6600_v43 }
 0xaa5   : > { %v8004_v25 = vpop.f32.mrf.mxu1  ;;  %v8021_v7 = vpop.f32.mrf.mxu0 }
 0xaa7   : > { %v6603_v6 = vpop.f32.mrf.mxu1 }
 0xaa9   : > { %v8005_v44 = vpop.f32.mrf.mxu1 }
 0xaab   : > { %v6729_v9 = vpop.f32.mrf.mxu1 }
 0xaac   : > { %v6735_v20 = vadd.f32 %v6729_v9, %v6681_v27 }
 0xaad   : > { %v8026_v29 = vpop.f32.mrf.mxu1 }
 0xaae   : > { %v6737_v61 = vadd.f32 %v6736_v26, %v6735_v20 }
 0xaaf   : > { %v6732_v28 = vpop.f32.mrf.mxu1 }
 0xab0   : > { %v6738_v63 = vmax.f32 %v6737_v61, 0.0 }
 0xab1   : > { %v8027_v46 = vpop.f32.mrf.mxu1 }
 0xab2   : > { %v6747_v52 = vpack.c.bf16 %v6738_v63, %v6738_v63 }
 0xab4   : > { %8037 = vmatmul.mubr.msk.bf16.vlgmr.msra.gmra.mxu1 %vm6773_vm4, %v6747_v52 }
 0xb74   : > { %v6811_v14 = vpop.f32.mrf.mxu1 }
 0xb75   : > { %v6812_v59 = vadd.f32 %v6811_v14, %v6748_v32 }
 0xb76   : > { %v8038_v23 = vpop.f32.mrf.mxu1 }
 0xb77   : > { %v6817_v31 = vmax.f32 %v6812_v59, 0.0 }
 0xb78   : > { %v6814_v24 = vpop.f32.mrf.mxu1 }
 0xb79   : > { %v6826_v4 = vpack.c.bf16 %v6817_v31, %v6817_v31 }
 0xb7a   : > { %v8039_v12 = vpop.f32.mrf.mxu1 }
 0xb7b   : > { %8049 = vmatmul.mubr.msk.bf16.vlgmr.msra.gmra.mxu0 %vm6773_vm4, %v6826_v4 }
 0xc3b   : > { %v6889_v3 = vpop.f32.mrf.mxu0 }
 0xc3c   : > { %v6890_v48 = vadd.f32 %v6889_v3, %v6827_v55 }
 0xc3d   : > { %v8050_v2 = vpop.f32.mrf.mxu0 }
 0xc3e   : > { %6896 = vst.msk [vmem:[%s659_s28] sm:$0x1] %vm6895_vm5, %v6890_v48 }
 0xc3f   : > { %v6892_v0 = vpop.f32.mrf.mxu0 }
 0xc40   : > { %8761 = shalt.err (!%p8758_p3)
}
 0xc41   : > { %s8762_s21 = scalar_lea.hbm %s11689_s26, 16  ;;  %s8766_s30 = scalar_lea.hbm %s11793_s4, 32 }
 0xc42   : > { %p8763_p4 = scmp.ne.s32.totalorder %s11689_s26, %s8762_s21  ;;  %p8767_p9 = scmp.lt.s32.totalorder %s11689_s26, %s11793_s4 }
 0xc43   : > { %p8768_p10 = scmp.lt.s32.totalorder %s8766_s30, %s8762_s21 }
 0xc44   : > { %p8764_p7 = pnand %p8763_p4, %p8964_p5 }
 0xc45   : > { %p8769_p11 = por %p8768_p10, %p8767_p9 }
 0xc46   : > { %p8765_p8 = pneg %p8764_p7 }
 0xc48   : > { %p8770_p12 = pnand %p8769_p11, %p8765_p8 }
 0xc4a   : > { %8773 = shalt.err (!%p8770_p12)
}
 0xc4b   : > { %8053 = dma.vmem_to_hbm [thread:$0]  (%p8964_p5), %s11691_s0, 16, %s11689_s26, %s6898_s27   ;;  %v8051_v60 = vpop.f32.mrf.mxu0 }
 0xc4c PF: > { %s11794_s3 = sld [smem:[#allocation7_spill]] }
 0xc4d   : > { %s11795_s2 = sld [smem:[#allocation5_spill]] }
 0xc52   : > { %p8059_p13 = scmp.ge.s32.totalorder %s11794_s3, 2 }
 0xc53   : > { %s6922_s22 = sand.u32 1, %s11795_s2  }
 0xc54   : > { %p8056_p0 = pnand %p8059_p13, %p8968_p6  ;;  %s6923_s6 = scalar_lea.sflag [#allocation3], %s6922_s22 }
 0xc56   : > { %p8057_p1 = pneg %p8056_p0 }
 0xc58   : > { %8791 = dma.done.wait (%p8057_p1), %s6923_s6, 16  }
 0xc59   : > { %8793 = vsyncadd (%p8057_p1), %s6923_s6, 4294967280  ;;  %s11797_s27 = sld [smem:[#allocation8_spill]]  ;;  %s11800_s2 = smov %s8800_s25 }
 0xc5a   : > { %s11798_s21 = sld [smem:[#allocation6_spill]] }
 0xc5b   : > { %s11799_s26 = sld [smem:[#allocation9_spill]] }
 0xc5f   : > { %p31_p2 = scmp.ge.s32.totalorder %s11797_s27, 4  }
 0xc60   : > { %s11801_s25 = smov %s11798_s21 }
 0xc61   :  { %33 = sbr.rel (!%p31_p2) target bundleno = 12 (0xc), region = 157 }
 0xc66   :  { %6927 = vsyncpa [#allocation3], 1 }
 0xc67   :  { %6929 = vsyncpa [#allocation3 + $0x1], 1 }

</bundles_post_ra>
